<compile_context>
chip_gen: v6e
topology: v6e:2x2x1
jax: 0.10.0
libtpu: 0.0.40
codegen_flags: <defaults>
</compile_context>

<pallas_src>
import math
import functools

import jax
import jax.numpy as jnp
from jax import lax
from jax.experimental import pallas as pl
from jax.experimental.pallas import tpu as pltpu


# ----------------------------------------------------------------------------
# helpers
# ----------------------------------------------------------------------------
def new_gelu(x):
    return 0.5 * x * (1.0 + jnp.tanh(math.sqrt(2.0 / math.pi)
                                     * (x + 0.044715 * x ** 3)))


# ----------------------------------------------------------------------------
# Pallas kernel: one full transformer block for one batch element
# ----------------------------------------------------------------------------
def block_kernel(x_ref, cos_ref, sin_ref, rot_ref,
                 ln1w_ref, ln1b_ref, ln2w_ref, ln2b_ref,
                 w_qkv_ref, w_proj_ref, w_fc_ref, w_fcp_ref,
                 out_ref, y_scratch, *, n_heads, head_size):
    f32 = jnp.float32
    bf16 = jnp.bfloat16
    C = n_heads * head_size
    T = x_ref.shape[1]

    x = x_ref[0]                                         # (T, C) f32

    # ---- LayerNorm 1 (eps = 1e-5, with bias), f32 ----
    mu = jnp.mean(x, axis=-1, keepdims=True)
    var = jnp.mean((x - mu) ** 2, axis=-1, keepdims=True)
    xn = (x - mu) * lax.rsqrt(var + 1e-5) * ln1w_ref[0] + ln1b_ref[0]

    # ---- fused QKV projection (c_attn, no bias): bf16 MXU, f32 accum ----
    qkv = jnp.dot(xn.astype(bf16), w_qkv_ref[...],
                  preferred_element_type=f32)            # (T, 3C)

    q_all = qkv[:, :C]
    k_all = qkv[:, C:2 * C]
    v_all = qkv[:, 2 * C:]

    # ---- RoPE on full-width Q/K:  out = x*cos + (x @ R)*sin ----
    # R is block-diagonal pairwise rotation (same block every head), applied in
    # one (T,C)x(C,C) matmul per tensor instead of 2*H tiny per-head matmuls.
    cos = cos_ref[...]                                   # (T, C) f32
    sin = sin_ref[...]                                   # (T, C) f32
    rot = rot_ref[...]                                   # (C, C) bf16 (0 / ±1)

    def rope(z):
        zr = jnp.dot(z.astype(bf16), rot, preferred_element_type=f32)
        return z * cos + zr * sin

    q_all = rope(q_all)
    k_all = rope(k_all)

    # ---- causal mask generated in-kernel (no (T,T) HBM input) ----
    rows = lax.broadcasted_iota(jnp.int32, (T, T), 0)
    cols = lax.broadcasted_iota(jnp.int32, (T, T), 1)
    causal = rows >= cols
    neg_inf = jnp.float32(-1e30)

    scale = 1.0 / math.sqrt(head_size)

    # ---- per-head attention; each head writes straight into (T, C) scratch --
    # TODO(synk): for n_heads >= 8 move heads onto a grid axis / fori_loop to
    # bound code size and vreg live ranges.
    for h in range(n_heads):
        lo = h * head_size
        hi = lo + head_size
        q = q_all[:, lo:hi].astype(bf16)                 # (T, hs)
        k = k_all[:, lo:hi].astype(bf16)
        v = v_all[:, lo:hi].astype(bf16)

        # scores = q @ k^T (contract last dims, no explicit transpose), f32
        s = lax.dot_general(q, k, (((1,), (1,)), ((), ())),
                            preferred_element_type=f32) * scale
        s = jnp.where(causal, s, neg_inf)

        m = jnp.max(s, axis=-1, keepdims=True)
        e = jnp.exp(s - m)                               # f32 softmax
        p = e * pl.reciprocal(jnp.sum(e, axis=-1, keepdims=True), approx=True)

        y_scratch[:, lo:hi] = jnp.dot(p.astype(bf16), v,
                                      preferred_element_type=f32)

    # ---- output projection + first residual ----
    y = jnp.dot(y_scratch[...].astype(bf16), w_proj_ref[...],
                preferred_element_type=f32)
    x2 = x + y

    # ---- LayerNorm 2 + FeedForward (new_gelu), f32 elementwise ----
    mu2 = jnp.mean(x2, axis=-1, keepdims=True)
    var2 = jnp.mean((x2 - mu2) ** 2, axis=-1, keepdims=True)
    xn2 = (x2 - mu2) * lax.rsqrt(var2 + 1e-5) * ln2w_ref[0] + ln2b_ref[0]

    h_mid = new_gelu(jnp.dot(xn2.astype(bf16), w_fc_ref[...],
                             preferred_element_type=f32))
    ff = jnp.dot(h_mid.astype(bf16), w_fcp_ref[...], preferred_element_type=f32)

    out_ref[0] = x2 + ff


# ----------------------------------------------------------------------------
# wrapper
# ----------------------------------------------------------------------------
def block_forward(x, rope, params, n_heads):
    """x: (B, T, C) f32; rope: (T, hs//2, 2) = stack(cos, sin)."""
    B, T, C = x.shape
    hs = C // n_heads
    f32, bf16 = jnp.float32, jnp.bfloat16

    # per-head cos/sin duplicated along pairs -> (T, hs); same for every head
    cos_h = jnp.repeat(rope[:T, :, 0], 2, axis=-1).astype(f32)
    sin_h = jnp.repeat(rope[:T, :, 1], 2, axis=-1).astype(f32)
    cos_C = jnp.tile(cos_h, (1, n_heads))                # (T, C)
    sin_C = jnp.tile(sin_h, (1, n_heads))                # (T, C)

    # block-diag pairwise rotation over full C: (x@R)[2i] = -x[2i+1], [2i+1]=x[2i]
    rot_C = jnp.kron(jnp.eye(C // 2, dtype=f32),
                     jnp.array([[0.0, 1.0], [-1.0, 0.0]], dtype=f32)).astype(bf16)

    ln1w = params["ln1_w"].reshape(1, C).astype(f32)
    ln1b = params["ln1_b"].reshape(1, C).astype(f32)
    ln2w = params["ln2_w"].reshape(1, C).astype(f32)
    ln2b = params["ln2_b"].reshape(1, C).astype(f32)

    # weights pre-cast to bf16 (MXU operands; f32 accumulation in-kernel)
    w_qkv = params["w_qkv"].astype(bf16)
    w_proj = params["w_proj"].astype(bf16)
    w_fc = params["w_fc"].astype(bf16)
    w_fcp = params["w_fcp"].astype(bf16)

    kern = functools.partial(block_kernel, n_heads=n_heads, head_size=hs)
    full = lambda shape: pl.BlockSpec(shape, lambda b: tuple(0 for _ in shape))

    flops = int(B * (28 * T * C * C + 4 * T * T * C))
    transcendentals = int(B * (n_heads * T * T + 4 * T * C + n_heads * T + 2 * T))
    bytes_accessed = int(2 * B * T * C * 4              # x in + out
                         + 9 * C * C * 2                # bf16 weights + rot
                         + 2 * T * C * 4 + 4 * C * 4)   # cos/sin + ln params

    return pl.pallas_call(
        kern,
        out_shape=jax.ShapeDtypeStruct((B, T, C), jnp.float32),
        grid=(B,),
        in_specs=[
            pl.BlockSpec((1, T, C), lambda b: (b, 0, 0)),   # x
            full((T, C)),                                   # cos
            full((T, C)),                                   # sin
            full((C, C)),                                   # RoPE rotation matrix
            full((1, C)), full((1, C)),                     # ln1 w, b
            full((1, C)), full((1, C)),                     # ln2 w, b
            full((C, 3 * C)),                               # c_attn weight (x @ W)
            full((C, C)),                                   # c_proj weight
            full((C, 4 * C)),                               # mlp c_fc weight
            full((4 * C, C)),                               # mlp c_proj weight
        ],
        out_specs=pl.BlockSpec((1, T, C), lambda b: (b, 0, 0)),
        scratch_shapes=[pltpu.VMEM((T, C), jnp.float32)],   # per-head attn outputs
        compiler_params=pltpu.CompilerParams(
            dimension_semantics=("parallel",),
            vmem_limit_bytes=64 * 1024 * 1024),
        cost_estimate=pl.CostEstimate(flops=flops,
                                      transcendentals=transcendentals,
                                      bytes_accessed=bytes_accessed),
    )(x, cos_C, sin_C, rot_C, ln1w, ln1b, ln2w, ln2b,
      w_qkv, w_proj, w_fc, w_fcp)


# ----------------------------------------------------------------------------
# pure-JAX f32 reference (mirrors the PyTorch Block.forward, kv_cache=None)
# ----------------------------------------------------------------------------
def apply_rope_ref(x, rope):
    T = x.shape[1]
    rc = rope[:T]
    xs = x.reshape(*x.shape[:-1], -1, 2)
    rc = rc.reshape(1, T, 1, xs.shape[3], 2)
    out = jnp.stack([xs[..., 0] * rc[..., 0] - xs[..., 1] * rc[..., 1],
                     xs[..., 1] * rc[..., 0] + xs[..., 0] * rc[..., 1]], -1)
    return out.reshape(*x.shape)


def block_ref(x, rope, mask, params, n_heads):
    B, T, C = x.shape
    hs = C // n_heads

    def ln(v, w, b):
        mu = v.mean(-1, keepdims=True)
        var = ((v - mu) ** 2).mean(-1, keepdims=True)
        return (v - mu) / jnp.sqrt(var + 1e-5) * w + b

    xn = ln(x, params["ln1_w"], params["ln1_b"])
    qkv = xn @ params["w_qkv"]
    q, k, v = jnp.split(qkv, 3, axis=-1)
    q = q.reshape(B, T, n_heads, hs)
    k = k.reshape(B, T, n_heads, hs)
    v = v.reshape(B, T, n_heads, hs)
    q = apply_rope_ref(q, rope)
    k = apply_rope_ref(k, rope)
    q, k, v = (t.transpose(0, 2, 1, 3) for t in (q, k, v))
    s = jnp.einsum("bhqd,bhkd->bhqk", q, k) / math.sqrt(hs)
    s = jnp.where(mask[None, None, :T, :T], s, -1e30)
    p = jax.nn.softmax(s, axis=-1)
    y = jnp.einsum("bhqk,bhkd->bhqd", p, v)
    y = y.transpose(0, 2, 1, 3).reshape(B, T, C)
    y = y @ params["w_proj"]
    x2 = x + y
    xn2 = ln(x2, params["ln2_w"], params["ln2_b"])
    ff = new_gelu(xn2 @ params["w_fc"]) @ params["w_fcp"]
    return x2 + ff


# ----------------------------------------------------------------------------
# main
# ----------------------------------------------------------------------------
if __name__ == "__main__":
    B, T, C, H = 2, 32, 256, 2          # batch, seq, n_embd, n_heads (hs = 128)
    hs = C // H

    key = jax.random.PRNGKey(0)
    k_x, k_qkv, k_proj, k_fc, k_fcp, k_lw1, k_lb1, k_lw2, k_lb2 = jax.random.split(key, 9)

    x = jax.random.normal(k_x, (B, T, C), dtype=jnp.float32)

    params = {
        # Linear weights stored pre-transposed so y = x @ W
        "w_qkv":  jax.random.normal(k_qkv,  (C, 3 * C), dtype=jnp.float32) * 0.02,
        "w_proj": jax.random.normal(k_proj, (C, C),     dtype=jnp.float32) * 0.02,
        "w_fc":   jax.random.normal(k_fc,   (C, 4 * C), dtype=jnp.float32) * 0.02,
        "w_fcp":  jax.random.normal(k_fcp,  (4 * C, C), dtype=jnp.float32) * 0.02,
        "ln1_w": 1.0 + 0.1 * jax.random.normal(k_lw1, (C,), dtype=jnp.float32),
        "ln1_b": 0.1 * jax.random.normal(k_lb1, (C,), dtype=jnp.float32),
        "ln2_w": 1.0 + 0.1 * jax.random.normal(k_lw2, (C,), dtype=jnp.float32),
        "ln2_b": 0.1 * jax.random.normal(k_lb2, (C,), dtype=jnp.float32),
    }

    # rope cache (T, hs//2, 2) = stack(cos, sin), theta base 10000
    theta = 1.0 / (10000.0 ** (jnp.arange(0, hs, 2, dtype=jnp.float32) / hs))
    idx_theta = jnp.outer(jnp.arange(T, dtype=jnp.float32), theta)       # (T, hs//2)
    rope = jnp.stack([jnp.cos(idx_theta), jnp.sin(idx_theta)], axis=-1)  # (T, hs//2, 2)

    # causal mask, reference only (the kernel generates it in-kernel via iota)
    mask = jnp.tril(jnp.ones((T, T), dtype=bool))

    out = block_forward(x, rope, params, n_heads=H)
    out = jax.block_until_ready(out)

    ref = block_ref(x, rope, mask, params, n_heads=H)
    assert out.shape == (B, T, C)
    # bf16 MXU operands (f32 accumulation) vs. pure-f32 reference -> loose tol
    assert jnp.allclose(out, ref, atol=3e-2, rtol=3e-2), \
        f"max err = {jnp.max(jnp.abs(out - ref))}"

    print("KERNEL_OK")
</pallas_src>

<mosaic_0001>
module attributes {stable_mosaic.version = 11 : i64} {
  func.func @block_kernel(%arg0: i32, %arg1: memref<1x32x256xf32, #tpu.memory_space<vmem>>, %arg2: memref<32x256xf32, #tpu.memory_space<vmem>>, %arg3: memref<32x256xf32, #tpu.memory_space<vmem>>, %arg4: memref<256x256xbf16, #tpu.memory_space<vmem>>, %arg5: memref<1x256xf32, #tpu.memory_space<vmem>>, %arg6: memref<1x256xf32, #tpu.memory_space<vmem>>, %arg7: memref<1x256xf32, #tpu.memory_space<vmem>>, %arg8: memref<1x256xf32, #tpu.memory_space<vmem>>, %arg9: memref<256x768xbf16, #tpu.memory_space<vmem>>, %arg10: memref<256x256xbf16, #tpu.memory_space<vmem>>, %arg11: memref<256x1024xbf16, #tpu.memory_space<vmem>>, %arg12: memref<1024x256xbf16, #tpu.memory_space<vmem>>, %arg13: memref<1x32x256xf32, #tpu.memory_space<vmem>>, %arg14: memref<32x256xf32, #tpu.memory_space<vmem>>) attributes {dimension_semantics = [#tpu.dimension_semantics<parallel>], iteration_bounds = array<i64: 2>, scalar_prefetch = 0 : i64, scratch_operands = 1 : i64, tpu.core_type = #tpu.core_type<tc>, window_params = [{transform_indices = @transform_0, window_bounds = array<i64: 1, 32, 256>}, {pipeline_mode = #tpu.pipeline_mode<synchronous>, transform_indices = @transform_1, window_bounds = array<i64: 32, 256>}, {pipeline_mode = #tpu.pipeline_mode<synchronous>, transform_indices = @transform_2, window_bounds = array<i64: 32, 256>}, {pipeline_mode = #tpu.pipeline_mode<synchronous>, transform_indices = @transform_3, window_bounds = array<i64: 256, 256>}, {pipeline_mode = #tpu.pipeline_mode<synchronous>, transform_indices = @transform_4, window_bounds = array<i64: 1, 256>}, {pipeline_mode = #tpu.pipeline_mode<synchronous>, transform_indices = @transform_5, window_bounds = array<i64: 1, 256>}, {pipeline_mode = #tpu.pipeline_mode<synchronous>, transform_indices = @transform_6, window_bounds = array<i64: 1, 256>}, {pipeline_mode = #tpu.pipeline_mode<synchronous>, transform_indices = @transform_7, window_bounds = array<i64: 1, 256>}, {pipeline_mode = #tpu.pipeline_mode<synchronous>, transform_indices = @transform_8, window_bounds = array<i64: 256, 768>}, {pipeline_mode = #tpu.pipeline_mode<synchronous>, transform_indices = @transform_9, window_bounds = array<i64: 256, 256>}, {pipeline_mode = #tpu.pipeline_mode<synchronous>, transform_indices = @transform_10, window_bounds = array<i64: 256, 1024>}, {pipeline_mode = #tpu.pipeline_mode<synchronous>, transform_indices = @transform_11, window_bounds = array<i64: 1024, 256>}, {transform_indices = @transform_12, window_bounds = array<i64: 1, 32, 256>}]} {
    %c0 = arith.constant 0 : index
    %c0_0 = arith.constant 0 : index
    %c0_1 = arith.constant 0 : index
    %0 = vector.load %arg1[%c0, %c0_0, %c0_1] : memref<1x32x256xf32, #tpu.memory_space<vmem>>, vector<1x32x256xf32>
    %1 = vector.shape_cast %0 : vector<1x32x256xf32> to vector<32x256xf32>
    %cst = arith.constant dense<0.000000e+00> : vector<32xf32>
    %2 = vector.multi_reduction <add>, %1, %cst [1] : vector<32x256xf32> to vector<32xf32>
    %3 = vector.shape_cast %2 : vector<32xf32> to vector<32x1xf32>
    %cst_2 = arith.constant 2.560000e+02 : f32
    %4 = vector.broadcast %cst_2 : f32 to vector<32x1xf32>
    %5 = arith.divf %3, %4 : vector<32x1xf32>
    %6 = vector.broadcast %5 : vector<32x1xf32> to vector<32x256xf32>
    %7 = arith.subf %1, %6 : vector<32x256xf32>
    %8 = arith.mulf %7, %7 : vector<32x256xf32>
    %cst_3 = arith.constant dense<0.000000e+00> : vector<32xf32>
    %9 = vector.multi_reduction <add>, %8, %cst_3 [1] : vector<32x256xf32> to vector<32xf32>
    %10 = vector.shape_cast %9 : vector<32xf32> to vector<32x1xf32>
    %cst_4 = arith.constant 2.560000e+02 : f32
    %11 = vector.broadcast %cst_4 : f32 to vector<32x1xf32>
    %12 = arith.divf %10, %11 : vector<32x1xf32>
    %13 = vector.broadcast %5 : vector<32x1xf32> to vector<32x256xf32>
    %14 = arith.subf %1, %13 : vector<32x256xf32>
    %cst_5 = arith.constant 9.99999974E-6 : f32
    %15 = vector.broadcast %cst_5 : f32 to vector<32x1xf32>
    %16 = arith.addf %12, %15 : vector<32x1xf32>
    %17 = math.rsqrt %16 : vector<32x1xf32>
    %18 = vector.broadcast %17 : vector<32x1xf32> to vector<32x256xf32>
    %19 = arith.mulf %14, %18 : vector<32x256xf32>
    %c0_6 = arith.constant 0 : index
    %c0_7 = arith.constant 0 : index
    %20 = vector.load %arg5[%c0_6, %c0_7] : memref<1x256xf32, #tpu.memory_space<vmem>>, vector<1x256xf32>
    %21 = vector.shape_cast %20 : vector<1x256xf32> to vector<256xf32>
    %22 = vector.shape_cast %21 : vector<256xf32> to vector<1x256xf32>
    %23 = vector.broadcast %22 : vector<1x256xf32> to vector<32x256xf32>
    %24 = arith.mulf %19, %23 : vector<32x256xf32>
    %c0_8 = arith.constant 0 : index
    %c0_9 = arith.constant 0 : index
    %25 = vector.load %arg6[%c0_8, %c0_9] : memref<1x256xf32, #tpu.memory_space<vmem>>, vector<1x256xf32>
    %26 = vector.shape_cast %25 : vector<1x256xf32> to vector<256xf32>
    %27 = vector.shape_cast %26 : vector<256xf32> to vector<1x256xf32>
    %28 = vector.broadcast %27 : vector<1x256xf32> to vector<32x256xf32>
    %29 = arith.addf %24, %28 : vector<32x256xf32>
    %30 = arith.truncf %29 : vector<32x256xf32> to vector<32x256xbf16>
    %c0_10 = arith.constant 0 : index
    %c0_11 = arith.constant 0 : index
    %31 = vector.load %arg9[%c0_10, %c0_11] : memref<256x768xbf16, #tpu.memory_space<vmem>>, vector<256x768xbf16>
    %cst_12 = arith.constant dense<0.000000e+00> : vector<32x768xf32>
    %32 = tpu.matmul %30, %31, %cst_12 {dimension_numbers = #tpu.dot_dimension_numbers<[1], [0], [0], [1], [0, 0, 1, 1], [], []>} : vector<32x256xbf16>, vector<256x768xbf16>, vector<32x768xf32> -> vector<32x768xf32>
    %33 = vector.extract_strided_slice %32 {offsets = [0, 0], sizes = [32, 256], strides = [1, 1]} : vector<32x768xf32> to vector<32x256xf32>
    %34 = vector.extract_strided_slice %32 {offsets = [0, 256], sizes = [32, 256], strides = [1, 1]} : vector<32x768xf32> to vector<32x256xf32>
    %35 = vector.extract_strided_slice %32 {offsets = [0, 512], sizes = [32, 256], strides = [1, 1]} : vector<32x768xf32> to vector<32x256xf32>
    %c0_13 = arith.constant 0 : index
    %c0_14 = arith.constant 0 : index
    %36 = vector.load %arg2[%c0_13, %c0_14] : memref<32x256xf32, #tpu.memory_space<vmem>>, vector<32x256xf32>
    %c0_15 = arith.constant 0 : index
    %c0_16 = arith.constant 0 : index
    %37 = vector.load %arg3[%c0_15, %c0_16] : memref<32x256xf32, #tpu.memory_space<vmem>>, vector<32x256xf32>
    %c0_17 = arith.constant 0 : index
    %c0_18 = arith.constant 0 : index
    %38 = vector.load %arg4[%c0_17, %c0_18] : memref<256x256xbf16, #tpu.memory_space<vmem>>, vector<256x256xbf16>
    %39 = arith.truncf %33 : vector<32x256xf32> to vector<32x256xbf16>
    %cst_19 = arith.constant dense<0.000000e+00> : vector<32x256xf32>
    %40 = tpu.matmul %39, %38, %cst_19 {dimension_numbers = #tpu.dot_dimension_numbers<[1], [0], [0], [1], [0, 0, 1, 1], [], []>} : vector<32x256xbf16>, vector<256x256xbf16>, vector<32x256xf32> -> vector<32x256xf32>
    %41 = arith.mulf %33, %36 : vector<32x256xf32>
    %42 = arith.mulf %40, %37 : vector<32x256xf32>
    %43 = arith.addf %41, %42 : vector<32x256xf32>
    %44 = arith.truncf %34 : vector<32x256xf32> to vector<32x256xbf16>
    %cst_20 = arith.constant dense<0.000000e+00> : vector<32x256xf32>
    %45 = tpu.matmul %44, %38, %cst_20 {dimension_numbers = #tpu.dot_dimension_numbers<[1], [0], [0], [1], [0, 0, 1, 1], [], []>} : vector<32x256xbf16>, vector<256x256xbf16>, vector<32x256xf32> -> vector<32x256xf32>
    %46 = arith.mulf %34, %36 : vector<32x256xf32>
    %47 = arith.mulf %45, %37 : vector<32x256xf32>
    %48 = arith.addf %46, %47 : vector<32x256xf32>
    %49 = tpu.iota {dimensions = array<i32: 0>} : vector<32x32xi32>
    %50 = tpu.iota {dimensions = array<i32: 1>} : vector<32x32xi32>
    %51 = arith.cmpi sge, %49, %50 : vector<32x32xi32>
    %52 = vector.extract_strided_slice %43 {offsets = [0, 0], sizes = [32, 128], strides = [1, 1]} : vector<32x256xf32> to vector<32x128xf32>
    %53 = arith.truncf %52 : vector<32x128xf32> to vector<32x128xbf16>
    %54 = vector.extract_strided_slice %48 {offsets = [0, 0], sizes = [32, 128], strides = [1, 1]} : vector<32x256xf32> to vector<32x128xf32>
    %55 = arith.truncf %54 : vector<32x128xf32> to vector<32x128xbf16>
    %56 = vector.extract_strided_slice %35 {offsets = [0, 0], sizes = [32, 128], strides = [1, 1]} : vector<32x256xf32> to vector<32x128xf32>
    %57 = arith.truncf %56 : vector<32x128xf32> to vector<32x128xbf16>
    %cst_21 = arith.constant dense<0.000000e+00> : vector<32x32xf32>
    %58 = tpu.matmul %53, %55, %cst_21 {dimension_numbers = #tpu.dot_dimension_numbers<[1], [1], [0], [0], [0, 0, 1, 0], [], []>} : vector<32x128xbf16>, vector<32x128xbf16>, vector<32x32xf32> -> vector<32x32xf32>
    %cst_22 = arith.constant 0.0883883461 : f32
    %59 = vector.broadcast %cst_22 : f32 to vector<32x32xf32>
    %60 = arith.mulf %58, %59 : vector<32x32xf32>
    %cst_23 = arith.constant -1.000000e+30 : f32
    %61 = vector.broadcast %cst_23 : f32 to vector<32x32xf32>
    %62 = arith.select %51, %60, %61 : vector<32x32xi1>, vector<32x32xf32>
    %cst_24 = arith.constant dense<0xFF800000> : vector<32xf32>
    %63 = vector.multi_reduction <maximumf>, %62, %cst_24 [1] : vector<32x32xf32> to vector<32xf32>
    %64 = vector.shape_cast %63 : vector<32xf32> to vector<32x1xf32>
    %65 = vector.broadcast %64 : vector<32x1xf32> to vector<32x32xf32>
    %66 = arith.subf %62, %65 : vector<32x32xf32>
    %67 = math.exp %66 : vector<32x32xf32>
    %cst_25 = arith.constant dense<0.000000e+00> : vector<32xf32>
    %68 = vector.multi_reduction <add>, %67, %cst_25 [1] : vector<32x32xf32> to vector<32xf32>
    %69 = vector.shape_cast %68 : vector<32xf32> to vector<32x1xf32>
    %70 = tpu.reciprocal %69 {approx = true} : vector<32x1xf32> -> vector<32x1xf32>
    %71 = vector.broadcast %70 : vector<32x1xf32> to vector<32x32xf32>
    %72 = arith.mulf %67, %71 : vector<32x32xf32>
    %73 = arith.truncf %72 : vector<32x32xf32> to vector<32x32xbf16>
    %cst_26 = arith.constant dense<0.000000e+00> : vector<32x128xf32>
    %74 = tpu.matmul %73, %57, %cst_26 {dimension_numbers = #tpu.dot_dimension_numbers<[1], [0], [0], [1], [0, 0, 1, 1], [], []>} : vector<32x32xbf16>, vector<32x128xbf16>, vector<32x128xf32> -> vector<32x128xf32>
    %c0_27 = arith.constant 0 : index
    %c0_28 = arith.constant 0 : index
    %75 = vector.load %arg14[%c0_27, %c0_28] : memref<32x256xf32, #tpu.memory_space<vmem>>, vector<32x128xf32>
    tpu.vector_store %arg14[%c0_27, %c0_28], %74 {strides = array<i32>} : memref<32x256xf32, #tpu.memory_space<vmem>>, vector<32x128xf32>,
    %76 = vector.extract_strided_slice %43 {offsets = [0, 128], sizes = [32, 128], strides = [1, 1]} : vector<32x256xf32> to vector<32x128xf32>
    %77 = arith.truncf %76 : vector<32x128xf32> to vector<32x128xbf16>
    %78 = vector.extract_strided_slice %48 {offsets = [0, 128], sizes = [32, 128], strides = [1, 1]} : vector<32x256xf32> to vector<32x128xf32>
    %79 = arith.truncf %78 : vector<32x128xf32> to vector<32x128xbf16>
    %80 = vector.extract_strided_slice %35 {offsets = [0, 128], sizes = [32, 128], strides = [1, 1]} : vector<32x256xf32> to vector<32x128xf32>
    %81 = arith.truncf %80 : vector<32x128xf32> to vector<32x128xbf16>
    %cst_29 = arith.constant dense<0.000000e+00> : vector<32x32xf32>
    %82 = tpu.matmul %77, %79, %cst_29 {dimension_numbers = #tpu.dot_dimension_numbers<[1], [1], [0], [0], [0, 0, 1, 0], [], []>} : vector<32x128xbf16>, vector<32x128xbf16>, vector<32x32xf32> -> vector<32x32xf32>
    %cst_30 = arith.constant 0.0883883461 : f32
    %83 = vector.broadcast %cst_30 : f32 to vector<32x32xf32>
    %84 = arith.mulf %82, %83 : vector<32x32xf32>
    %cst_31 = arith.constant -1.000000e+30 : f32
    %85 = vector.broadcast %cst_31 : f32 to vector<32x32xf32>
    %86 = arith.select %51, %84, %85 : vector<32x32xi1>, vector<32x32xf32>
    %cst_32 = arith.constant dense<0xFF800000> : vector<32xf32>
    %87 = vector.multi_reduction <maximumf>, %86, %cst_32 [1] : vector<32x32xf32> to vector<32xf32>
    %88 = vector.shape_cast %87 : vector<32xf32> to vector<32x1xf32>
    %89 = vector.broadcast %88 : vector<32x1xf32> to vector<32x32xf32>
    %90 = arith.subf %86, %89 : vector<32x32xf32>
    %91 = math.exp %90 : vector<32x32xf32>
    %cst_33 = arith.constant dense<0.000000e+00> : vector<32xf32>
    %92 = vector.multi_reduction <add>, %91, %cst_33 [1] : vector<32x32xf32> to vector<32xf32>
    %93 = vector.shape_cast %92 : vector<32xf32> to vector<32x1xf32>
    %94 = tpu.reciprocal %93 {approx = true} : vector<32x1xf32> -> vector<32x1xf32>
    %95 = vector.broadcast %94 : vector<32x1xf32> to vector<32x32xf32>
    %96 = arith.mulf %91, %95 : vector<32x32xf32>
    %97 = arith.truncf %96 : vector<32x32xf32> to vector<32x32xbf16>
    %cst_34 = arith.constant dense<0.000000e+00> : vector<32x128xf32>
    %98 = tpu.matmul %97, %81, %cst_34 {dimension_numbers = #tpu.dot_dimension_numbers<[1], [0], [0], [1], [0, 0, 1, 1], [], []>} : vector<32x32xbf16>, vector<32x128xbf16>, vector<32x128xf32> -> vector<32x128xf32>
    %c0_35 = arith.constant 0 : index
    %c128 = arith.constant 128 : index
    %99 = vector.load %arg14[%c0_35, %c128] : memref<32x256xf32, #tpu.memory_space<vmem>>, vector<32x128xf32>
    tpu.vector_store %arg14[%c0_35, %c128], %98 {strides = array<i32>} : memref<32x256xf32, #tpu.memory_space<vmem>>, vector<32x128xf32>,
    %c0_36 = arith.constant 0 : index
    %c0_37 = arith.constant 0 : index
    %100 = vector.load %arg14[%c0_36, %c0_37] : memref<32x256xf32, #tpu.memory_space<vmem>>, vector<32x256xf32>
    %101 = arith.truncf %100 : vector<32x256xf32> to vector<32x256xbf16>
    %c0_38 = arith.constant 0 : index
    %c0_39 = arith.constant 0 : index
    %102 = vector.load %arg10[%c0_38, %c0_39] : memref<256x256xbf16, #tpu.memory_space<vmem>>, vector<256x256xbf16>
    %cst_40 = arith.constant dense<0.000000e+00> : vector<32x256xf32>
    %103 = tpu.matmul %101, %102, %cst_40 {dimension_numbers = #tpu.dot_dimension_numbers<[1], [0], [0], [1], [0, 0, 1, 1], [], []>} : vector<32x256xbf16>, vector<256x256xbf16>, vector<32x256xf32> -> vector<32x256xf32>
    %104 = arith.addf %1, %103 : vector<32x256xf32>
    %cst_41 = arith.constant dense<0.000000e+00> : vector<32xf32>
    %105 = vector.multi_reduction <add>, %104, %cst_41 [1] : vector<32x256xf32> to vector<32xf32>
    %106 = vector.shape_cast %105 : vector<32xf32> to vector<32x1xf32>
    %cst_42 = arith.constant 2.560000e+02 : f32
    %107 = vector.broadcast %cst_42 : f32 to vector<32x1xf32>
    %108 = arith.divf %106, %107 : vector<32x1xf32>
    %109 = vector.broadcast %108 : vector<32x1xf32> to vector<32x256xf32>
    %110 = arith.subf %104, %109 : vector<32x256xf32>
    %111 = arith.mulf %110, %110 : vector<32x256xf32>
    %cst_43 = arith.constant dense<0.000000e+00> : vector<32xf32>
    %112 = vector.multi_reduction <add>, %111, %cst_43 [1] : vector<32x256xf32> to vector<32xf32>
    %113 = vector.shape_cast %112 : vector<32xf32> to vector<32x1xf32>
    %cst_44 = arith.constant 2.560000e+02 : f32
    %114 = vector.broadcast %cst_44 : f32 to vector<32x1xf32>
    %115 = arith.divf %113, %114 : vector<32x1xf32>
    %116 = vector.broadcast %108 : vector<32x1xf32> to vector<32x256xf32>
    %117 = arith.subf %104, %116 : vector<32x256xf32>
    %cst_45 = arith.constant 9.99999974E-6 : f32
    %118 = vector.broadcast %cst_45 : f32 to vector<32x1xf32>
    %119 = arith.addf %115, %118 : vector<32x1xf32>
    %120 = math.rsqrt %119 : vector<32x1xf32>
    %121 = vector.broadcast %120 : vector<32x1xf32> to vector<32x256xf32>
    %122 = arith.mulf %117, %121 : vector<32x256xf32>
    %c0_46 = arith.constant 0 : index
    %c0_47 = arith.constant 0 : index
    %123 = vector.load %arg7[%c0_46, %c0_47] : memref<1x256xf32, #tpu.memory_space<vmem>>, vector<1x256xf32>
    %124 = vector.shape_cast %123 : vector<1x256xf32> to vector<256xf32>
    %125 = vector.shape_cast %124 : vector<256xf32> to vector<1x256xf32>
    %126 = vector.broadcast %125 : vector<1x256xf32> to vector<32x256xf32>
    %127 = arith.mulf %122, %126 : vector<32x256xf32>
    %c0_48 = arith.constant 0 : index
    %c0_49 = arith.constant 0 : index
    %128 = vector.load %arg8[%c0_48, %c0_49] : memref<1x256xf32, #tpu.memory_space<vmem>>, vector<1x256xf32>
    %129 = vector.shape_cast %128 : vector<1x256xf32> to vector<256xf32>
    %130 = vector.shape_cast %129 : vector<256xf32> to vector<1x256xf32>
    %131 = vector.broadcast %130 : vector<1x256xf32> to vector<32x256xf32>
    %132 = arith.addf %127, %131 : vector<32x256xf32>
    %133 = arith.truncf %132 : vector<32x256xf32> to vector<32x256xbf16>
    %c0_50 = arith.constant 0 : index
    %c0_51 = arith.constant 0 : index
    %134 = vector.load %arg11[%c0_50, %c0_51] : memref<256x1024xbf16, #tpu.memory_space<vmem>>, vector<256x1024xbf16>
    %cst_52 = arith.constant dense<0.000000e+00> : vector<32x1024xf32>
    %135 = tpu.matmul %133, %134, %cst_52 {dimension_numbers = #tpu.dot_dimension_numbers<[1], [0], [0], [1], [0, 0, 1, 1], [], []>} : vector<32x256xbf16>, vector<256x1024xbf16>, vector<32x1024xf32> -> vector<32x1024xf32>
    %cst_53 = arith.constant 5.000000e-01 : f32
    %136 = vector.broadcast %cst_53 : f32 to vector<32x1024xf32>
    %137 = arith.mulf %136, %135 : vector<32x1024xf32>
    %138 = arith.mulf %135, %135 : vector<32x1024xf32>
    %139 = arith.mulf %135, %138 : vector<32x1024xf32>
    %cst_54 = arith.constant 4.471500e-02 : f32
    %140 = vector.broadcast %cst_54 : f32 to vector<32x1024xf32>
    %141 = arith.mulf %140, %139 : vector<32x1024xf32>
    %142 = arith.addf %135, %141 : vector<32x1024xf32>
    %cst_55 = arith.constant 0.797884583 : f32
    %143 = vector.broadcast %cst_55 : f32 to vector<32x1024xf32>
    %144 = arith.mulf %143, %142 : vector<32x1024xf32>
    %145 = math.tanh %144 : vector<32x1024xf32>
    %cst_56 = arith.constant 1.000000e+00 : f32
    %146 = vector.broadcast %cst_56 : f32 to vector<32x1024xf32>
    %147 = arith.addf %146, %145 : vector<32x1024xf32>
    %148 = arith.mulf %137, %147 : vector<32x1024xf32>
    %149 = arith.truncf %148 : vector<32x1024xf32> to vector<32x1024xbf16>
    %c0_57 = arith.constant 0 : index
    %c0_58 = arith.constant 0 : index
    %150 = vector.load %arg12[%c0_57, %c0_58] : memref<1024x256xbf16, #tpu.memory_space<vmem>>, vector<1024x256xbf16>
    %cst_59 = arith.constant dense<0.000000e+00> : vector<32x256xf32>
    %151 = tpu.matmul %149, %150, %cst_59 {dimension_numbers = #tpu.dot_dimension_numbers<[1], [0], [0], [1], [0, 0, 1, 1], [], []>} : vector<32x1024xbf16>, vector<1024x256xbf16>, vector<32x256xf32> -> vector<32x256xf32>
    %152 = arith.addf %104, %151 : vector<32x256xf32>
    %c0_60 = arith.constant 0 : index
    %c0_61 = arith.constant 0 : index
    %c0_62 = arith.constant 0 : index
    %153 = vector.load %arg13[%c0_60, %c0_61, %c0_62] : memref<1x32x256xf32, #tpu.memory_space<vmem>>, vector<1x32x256xf32>
    %154 = vector.shape_cast %153 : vector<1x32x256xf32> to vector<32x256xf32>
    %155 = vector.shape_cast %152 : vector<32x256xf32> to vector<1x32x256xf32>
    tpu.vector_store %arg13[%c0_60, %c0_61, %c0_62], %155 {strides = array<i32>} : memref<1x32x256xf32, #tpu.memory_space<vmem>>, vector<1x32x256xf32>,
    return
  }
  func.func @transform_0(%arg0: i32) -> (i32, i32, i32) {
    %c0_i32 = arith.constant 0 : i32
    %c0_i32_0 = arith.constant 0 : i32
    %c0_i32_1 = arith.constant 0 : i32
    return %arg0, %c0_i32, %c0_i32_0 : i32, i32, i32
  }
  func.func @transform_1(%arg0: i32) -> (i32, i32) {
    %c0_i32 = arith.constant 0 : i32
    %c0_i32_0 = arith.constant 0 : i32
    %c0_i32_1 = arith.constant 0 : i32
    return %c0_i32, %c0_i32_0 : i32, i32
  }
  func.func @transform_2(%arg0: i32) -> (i32, i32) {
    %c0_i32 = arith.constant 0 : i32
    %c0_i32_0 = arith.constant 0 : i32
    %c0_i32_1 = arith.constant 0 : i32
    return %c0_i32, %c0_i32_0 : i32, i32
  }
  func.func @transform_3(%arg0: i32) -> (i32, i32) {
    %c0_i32 = arith.constant 0 : i32
    %c0_i32_0 = arith.constant 0 : i32
    %c0_i32_1 = arith.constant 0 : i32
    return %c0_i32, %c0_i32_0 : i32, i32
  }
  func.func @transform_4(%arg0: i32) -> (i32, i32) {
    %c0_i32 = arith.constant 0 : i32
    %c0_i32_0 = arith.constant 0 : i32
    %c0_i32_1 = arith.constant 0 : i32
    return %c0_i32, %c0_i32_0 : i32, i32
  }
  func.func @transform_5(%arg0: i32) -> (i32, i32) {
    %c0_i32 = arith.constant 0 : i32
    %c0_i32_0 = arith.constant 0 : i32
    %c0_i32_1 = arith.constant 0 : i32
    return %c0_i32, %c0_i32_0 : i32, i32
  }
  func.func @transform_6(%arg0: i32) -> (i32, i32) {
    %c0_i32 = arith.constant 0 : i32
    %c0_i32_0 = arith.constant 0 : i32
    %c0_i32_1 = arith.constant 0 : i32
    return %c0_i32, %c0_i32_0 : i32, i32
  }
  func.func @transform_7(%arg0: i32) -> (i32, i32) {
    %c0_i32 = arith.constant 0 : i32
    %c0_i32_0 = arith.constant 0 : i32
    %c0_i32_1 = arith.constant 0 : i32
    return %c0_i32, %c0_i32_0 : i32, i32
  }
  func.func @transform_8(%arg0: i32) -> (i32, i32) {
    %c0_i32 = arith.constant 0 : i32
    %c0_i32_0 = arith.constant 0 : i32
    %c0_i32_1 = arith.constant 0 : i32
    return %c0_i32, %c0_i32_0 : i32, i32
  }
  func.func @transform_9(%arg0: i32) -> (i32, i32) {
    %c0_i32 = arith.constant 0 : i32
    %c0_i32_0 = arith.constant 0 : i32
    %c0_i32_1 = arith.constant 0 : i32
    return %c0_i32, %c0_i32_0 : i32, i32
  }
  func.func @transform_10(%arg0: i32) -> (i32, i32) {
    %c0_i32 = arith.constant 0 : i32
    %c0_i32_0 = arith.constant 0 : i32
    %c0_i32_1 = arith.constant 0 : i32
    return %c0_i32, %c0_i32_0 : i32, i32
  }
  func.func @transform_11(%arg0: i32) -> (i32, i32) {
    %c0_i32 = arith.constant 0 : i32
    %c0_i32_0 = arith.constant 0 : i32
    %c0_i32_1 = arith.constant 0 : i32
    return %c0_i32, %c0_i32_0 : i32, i32
  }
  func.func @transform_12(%arg0: i32) -> (i32, i32, i32) {
    %c0_i32 = arith.constant 0 : i32
    %c0_i32_0 = arith.constant 0 : i32
    %c0_i32_1 = arith.constant 0 : i32
    return %arg0, %c0_i32, %c0_i32_0 : i32, i32, i32
  }
}

</mosaic_0001>

<bundles_post_ra>
// kernel: tpu_custom_call.1
= control target key start
LH: loop header
LB: loop body
LE: loop exit
PB: predicated region body
PF: predicated region fallthrough
CT: control target
= control target key end

     0   :  { %s7410_s0 = inlined_call_operand.hbm [shape: f32[2,32,256], index: 0, kind: input, shape index: {}]   ;;  %s7411_s1 = inlined_call_operand.hbm [shape: f32[32,256], index: 1, kind: input, shape index: {}]   ;;  %s7412_s2 = inlined_call_operand.hbm [shape: f32[32,256], index: 2, kind: input, shape index: {}]   ;;  %s7413_s3 = inlined_call_operand.hbm [shape: bf16[256,256], index: 3, kind: input, shape index: {}]   ;;  %s7414_s4 = inlined_call_operand.vmem [shape: f32[1,256], index: 4, kind: input, shape index: {}]   ;;  %s7415_s5 = inlined_call_operand.vmem [shape: f32[1,256], index: 5, kind: input, shape index: {}]   ;;  %s7416_s6 = inlined_call_operand.vmem [shape: f32[1,256], index: 6, kind: input, shape index: {}]   ;;  %s7417_s7 = inlined_call_operand.vmem [shape: f32[1,256], index: 7, kind: input, shape index: {}]   ;;  %s7418_s8 = inlined_call_operand.hbm [shape: bf16[256,768], index: 8, kind: input, shape index: {}]   ;;  %s7419_s9 = inlined_call_operand.hbm [shape: bf16[256,256], index: 9, kind: input, shape index: {}]   ;;  %s7420_s10 = inlined_call_operand.hbm [shape: bf16[256,1024], index: 10, kind: input, shape index: {}]   ;;  %s7421_s11 = inlined_call_operand.hbm [shape: bf16[1024,256], index: 11, kind: input, shape index: {}]   ;;  %s7422_s12 = inlined_call_operand.hbm [shape: f32[2,32,256], index: 12, kind: output, shape index: {}]  }
   0x1   :  { %7433 = sst [smem:[#allocation25_spill]] %s7411_s1 }
   0x2   :  { %7434 = sst [smem:[#allocation26_spill]] %s7412_s2 }
   0x3   :  { %7435 = sst [smem:[#allocation27_spill]] %s7413_s3 }
   0x4   :  { %7436 = sst [smem:[#allocation28_spill]] %s7418_s8 }
   0x5   :  { %7437 = sst [smem:[#allocation29_spill]] %s7419_s9 }
   0x6   :  { %7438 = sst [smem:[#allocation30_spill]] %s7420_s10 }
   0x7   :  { %7439 = sst [smem:[#allocation31_spill]] %s7421_s11 }
   0x8   :  { %17 = vsyncpa [#allocation4], 0 }
   0x9   :  { %19 = vsyncpa [#allocation4 + $0x1], 0 }
   0xa   :  { %20 = vsyncpa [#allocation7], 0 }
   0xb   :  { %21 = vsyncpa [#allocation10], 0 }
   0xc   :  { %22 = vsyncpa [#allocation13], 0 }
   0xd   :  { %23 = vsyncpa [#allocation16], 0 }
   0xe   :  { %24 = vsyncpa [#allocation5], 0 }
   0xf   :  { %26 = vsyncpa [#allocation5 + $0x1], 0  ;;  %s6465_s21 = smov 0   ;;  %s6467_s22 = smov 0  }
  0x10   :  { %s6469_s23 = smov 0   ;;  %s6471_s24 = smov 0  }
  0x11 LB: > { %s6381_s25 = smov [#allocation6]   ;;  %s6486_s27 = sadd.s32 4294967295, %s6379_s24   ;;  %s6379_s24 = sphi %s6471_s24, %s7476_s24   ;;  %s6375_s23 = sphi %s6469_s23, %s7475_s23   ;;  %s6371_s22 = sphi %s6467_s22, %s7474_s22   ;;  %s6367_s21 = sphi %s6465_s21, %s7473_s21  }
  0x12   : > { %s332_s26 = sshll.u32 %s6381_s25, 4  ;;  %p4913_p0 = scmp.ge.s32.totalorder %s6379_s24, 1  ;;  %s333_s26 = int_to_ptr.vmem [resolvable:$true] %s332_s26 }
  0x13   : > { %p7429_p1 = scmp.eq.s32.totalorder %s6486_s27, 0  ;;  %p320_p2 = scmp.lt.s32.totalorder %s6379_s24, 3 }
  0x14   : > { %s6382_s29 = smov [#allocation9]   ;;  %s6383_s14 = smov [#allocation12]  }
  0x15   : > { %p6491_p3 = pnand %p4913_p0, %p320_p2  ;;  %s358_s30 = sshll.u32 %s6382_s29, 4  ;;  %s6504_s30 = int_to_ptr.vmem [resolvable:$true] %s358_s30 }
  0x16   : > { %s6506_s15 = sshll.u32 %s6383_s14, 4  ;;  %s6100_s17 = scalar_lea.vmem %s333_s26, 1024  ;;  %s397_s15 = int_to_ptr.vmem [resolvable:$true] %s6506_s15 }
  0x17   : > { %s7440_s28 = scalar_select %p6491_p3, 1, 0 }
  0x18   : > { %p5442_p5 = pneg %p6491_p3  ;;  %p6101_p8 = scmp.ne.s32.totalorder %s333_s26, %s6100_s17 }
  0x19   : > { %p6108_p11 = scmp.lt.s32.totalorder %s333_s26, %s333_s26  ;;  %p6109_p12 = scmp.lt.s32.totalorder %s6100_s17, %s6100_s17 }
  0x1a   : > { %p6500_p6 = pnand %p5442_p5, %p7429_p1 }
  0x1b   : > { %p6110_p13 = por %p6109_p12, %p6108_p11 }
  0x1c   : > { %p6510_p7 = pneg %p6500_p6 }
  0x1e   : > { %p6103_p9 = pnand %p6101_p8, %p6510_p7 }
  0x20   : > { %p6104_p10 = pneg %p6103_p9 }
  0x22   : > { %p6111_p0 = pnand %p6110_p13, %p6104_p10 }
  0x24   : > { %6114 = shalt.err (!%p6111_p0)
}
  0x25   : > { %s7423_s18 = smov 256   ;;  %s7425_s19 = smov 16  }
  0x26   : > { %s7443_s1 = sld [smem:[#allocation25_spill]]  ;;  %s6126_s29 = scalar_lea.vmem %s6504_s30, 4096 }
  0x27   : > { %p6127_p2 = scmp.ne.s32.totalorder %s6504_s30, %s6126_s29  ;;  %p6134_p9 = scmp.lt.s32.totalorder %s6504_s30, %s6504_s30 }
  0x28   : > { %p6135_p10 = scmp.lt.s32.totalorder %s6126_s29, %s6126_s29 }
  0x29   : > { %p6129_p5 = pnand %p6127_p2, %p6510_p7 }
  0x2a   : > { %p6136_p11 = por %p6135_p10, %p6134_p9 }
  0x2b   : > { %p6130_p8 = pneg %p6129_p5 }
  0x2c   : > { %5445 = dma.hbm_to_vmem [thread:$0]  (!%p6500_p6), %s7443_s1, 1024, %s333_s26, [#allocation7], %s7423_s18, %s7423_s18, %s7425_s19  }
  0x2d   : > { %p6137_p12 = pnand %p6136_p11, %p6130_p8 }
  0x2f   : > { %6140 = shalt.err (!%p6137_p12)
}
  0x30   : > { %s7427_s14 = smov 128   ;;  %s7428_s17 = smov 8  }
  0x31   : > { %s7444_s3 = sld [smem:[#allocation27_spill]]  ;;  %s6152_s25 = scalar_lea.vmem %s397_s15, 4096 }
  0x32   : > { %p6153_p13 = scmp.ne.s32.totalorder %s397_s15, %s6152_s25  ;;  %p6160_p5 = scmp.lt.s32.totalorder %s397_s15, %s397_s15 }
  0x33   : > { %p6161_p8 = scmp.lt.s32.totalorder %s6152_s25, %s6152_s25 }
  0x34   : > { %p6155_p0 = pnand %p6153_p13, %p6510_p7 }
  0x35   : > { %p6162_p9 = por %p6161_p8, %p6160_p5 }
  0x36   : > { %p6156_p2 = pneg %p6155_p0 }
  0x37   : > { %5451 = dma.hbm_to_vmem [thread:$0]  (!%p6500_p6), %s7444_s3, 4096, %s6504_s30, [#allocation10], %s7427_s14, %s7427_s14, %s7428_s17  }
  0x38   : > { %p6163_p10 = pnand %p6162_p9, %p6156_p2 }
  0x3a   : > { %6166 = shalt.err (!%p6163_p10)
}
  0x3b   : > { %s7445_s9 = sld [smem:[#allocation29_spill]]  ;;  %s6388_s30 = smov [#allocation8]  }
  0x3c   : > { %s345_s26 = sshll.u32 %s6388_s30, 4  ;;  %s6389_s20 = smov [#allocation11]   ;;  %s346_s26 = int_to_ptr.vmem [resolvable:$true] %s345_s26 }
  0x3d   : > { %s383_s19 = sshll.u32 %s6389_s20, 4  ;;  %s6178_s1 = scalar_lea.vmem %s346_s26, 1024  ;;  %s384_s19 = int_to_ptr.vmem [resolvable:$true] %s383_s19 }
  0x3e   : > { %p6179_p11 = scmp.ne.s32.totalorder %s346_s26, %s6178_s1  ;;  %p6186_p0 = scmp.lt.s32.totalorder %s346_s26, %s346_s26 }
  0x3f   : > { %p6187_p2 = scmp.lt.s32.totalorder %s6178_s1, %s6178_s1 }
  0x40   : > { %p6181_p12 = pnand %p6179_p11, %p6510_p7 }
  0x41   : > { %5457 = dma.hbm_to_vmem [thread:$0]  (!%p6500_p6), %s7445_s9, 4096, %s397_s15, [#allocation13], %s7427_s14, %s7427_s14, %s7428_s17  }
  0x42   : > { %p6182_p13 = pneg %p6181_p12  ;;  %p6188_p5 = por %p6187_p2, %p6186_p0 }
  0x44   : > { %p6189_p8 = pnand %p6188_p5, %p6182_p13 }
  0x46   : > { %6192 = shalt.err (!%p6189_p8)
}
  0x47   : > { %s7446_s18 = smov 16   ;;  %s7447_s25 = smov 256  }
  0x48   : > { %s7448_s2 = sld [smem:[#allocation26_spill]]  ;;  %s6204_s30 = scalar_lea.vmem %s384_s19, 12288 }
  0x49   : > { %p6205_p9 = scmp.ne.s32.totalorder %s384_s19, %s6204_s30  ;;  %p6212_p12 = scmp.lt.s32.totalorder %s384_s19, %s384_s19 }
  0x4a   : > { %p6213_p0 = scmp.lt.s32.totalorder %s6204_s30, %s6204_s30 }
  0x4b   : > { %p6207_p10 = pnand %p6205_p9, %p6510_p7 }
  0x4c   : > { %p6214_p13 = por %p6213_p0, %p6212_p12 }
  0x4d   : > { %p6208_p11 = pneg %p6207_p10 }
  0x4e   : > { %5448 = dma.hbm_to_vmem [thread:$0]  (!%p6500_p6), %s7448_s2, 1024, %s346_s26, [#allocation7], %s7447_s25, %s7447_s25, %s7446_s18  }
  0x4f   : > { %p6215_p2 = pnand %p6214_p13, %p6208_p11 }
  0x51   : > { %6218 = shalt.err (!%p6215_p2)
}
  0x52   : > { %s6390_s1 = smov 384   ;;  %s6391_s20 = smov 24  }
  0x53   : > { %s7449_s8 = sld [smem:[#allocation28_spill]]  ;;  %s6392_s26 = smov [#allocation14]  }
  0x54   : > { %s409_s29 = sshll.u32 %s6392_s26, 4  ;;  %s410_s29 = int_to_ptr.vmem [resolvable:$true] %s409_s29 }
  0x55   : > { %s6230_s17 = scalar_lea.vmem %s410_s29, 16384  ;;  %p6238_p10 = scmp.lt.s32.totalorder %s410_s29, %s410_s29 }
  0x56   : > { %p6231_p5 = scmp.ne.s32.totalorder %s410_s29, %s6230_s17  ;;  %p6239_p11 = scmp.lt.s32.totalorder %s6230_s17, %s6230_s17 }
  0x58   : > { %p6233_p8 = pnand %p6231_p5, %p6510_p7  ;;  %p6240_p12 = por %p6239_p11, %p6238_p10 }
  0x59   : > { %5454 = dma.hbm_to_vmem [thread:$0]  (!%p6500_p6), %s7449_s8, 12288, %s384_s19, [#allocation10], %s6390_s1, %s6390_s1, %s6391_s20  }
  0x5a   : > { %p6234_p9 = pneg %p6233_p8 }
  0x5c   : > { %p6241_p0 = pnand %p6240_p12, %p6234_p9 }
  0x5e   : > { %6244 = shalt.err (!%p6241_p0)
}
  0x5f   : > { %s6393_s30 = smov 512   ;;  %s6394_s2 = smov 32  }
  0x60   : > { %s7450_s10 = sld [smem:[#allocation30_spill]]  ;;  %s6395_s1 = smov [#allocation15]  }
  0x61   : > { %s422_s20 = sshll.u32 %s6395_s1, 4  ;;  %s423_s20 = int_to_ptr.vmem [resolvable:$true] %s422_s20 }
  0x62   : > { %s6256_s15 = scalar_lea.vmem %s423_s20, 16384  ;;  %p6264_p8 = scmp.lt.s32.totalorder %s423_s20, %s423_s20 }
  0x63   : > { %p6257_p13 = scmp.ne.s32.totalorder %s423_s20, %s6256_s15  ;;  %p6265_p9 = scmp.lt.s32.totalorder %s6256_s15, %s6256_s15 }
  0x65   : > { %p6259_p2 = pnand %p6257_p13, %p6510_p7  ;;  %p6266_p10 = por %p6265_p9, %p6264_p8 }
  0x66   : > { %5460 = dma.hbm_to_vmem [thread:$0]  (!%p6500_p6), %s7450_s10, 16384, %s410_s29, [#allocation13], %s6393_s30, %s6393_s30, %s6394_s2  }
  0x67   : > { %p6260_p5 = pneg %p6259_p2 }
  0x69   : > { %p6267_p11 = pnand %p6266_p10, %p6260_p5 }
  0x6b   : > { %6270 = shalt.err (!%p6267_p11)
}
  0x6c   : > { %s7451_s17 = smov 8   ;;  %s7452_s26 = smov 128  }
  0x6d   : > { %s7453_s11 = sld [smem:[#allocation31_spill]]  ;;  %s4912_s13 = sadd.s32 4294967294, %s6379_s24  }
  0x6e   : > { %s6586_s16 = sadd.s32 1, %s6379_s24   ;;  %s39_s29 = sadd.s32 1, %s6375_s23 }
  0x6f   : > { %s36_s30 = ssub.s32 %s6379_s24, %s6586_s16  ;;  %p46_p7 = scmp.ne.s32.totalorder %s6375_s23, %s6371_s22 }
  0x70   : > { %p37_p12 = scmp.eq.s32.totalorder %s36_s30, 0  ;;  %p47_p0 = scmp.eq.s32.totalorder %s6379_s24, 0 }
  0x71   : > { %p52_p13 = scmp.ne.s32.totalorder %s6371_s22, %s6367_s21  ;;  %p307_p2 = scmp.eq.s32.totalorder %s6486_s27, 1 }
  0x72   : > { %s6598_s19 = scalar_select %p37_p12, %s6375_s23, %s39_s29  }
  0x73   : > { %5463 = dma.hbm_to_vmem [thread:$0]  (!%p6500_p6), %s7453_s11, 16384, %s423_s20, [#allocation16], %s7452_s26, %s7452_s26, %s7451_s17  }
  0x74   : > { %7454 = sst [smem:[#allocation24_spill]] %s6598_s19  ;;  %p48_p5 = por %p47_p0, %p46_p7 }
  0x75   : > { %p6602_p8 = por %p7429_p1, %p52_p13  ;;  %p6606_p6 = por %p307_p2, %p46_p7 }
  0x76   : > { %p313_p9 = scmp.eq.s32.totalorder %s4912_s13, 1  ;;  %p5479_p10 = scmp.lt.s32.totalorder %s6379_s24, 2 }
  0x77   : > { %s7455_s1 = scalar_select %p6602_p8, 1, 0 }
  0x78   : > { %s7456_s20 = scalar_select %p6606_p6, 1, 0 }
  0x79   : > { %s436_s15 = sand.u32 1, %s6375_s23   ;;  %p6612_p11 = por %p313_p9, %p52_p13 }
  0x7a   : > { %s4922_s26 = sshll.u32 %s436_s15, 6  ;;  %s5360_s14 = sshll.u32 %s6379_s24, 10 }
  0x7b   : > { %s7457_s17 = scalar_select %p6612_p11, 1, 0 }
  0x7c   : > { %s6620_s30 = scalar_lea.hbm %s7410_s0, %s5360_s14  ;;  %s440_s3 = scalar_lea.vmem [#allocation3], %s4922_s26 }
  0x7d   : > { %s447_s8 = sshll.u32 %s440_s3, 4  ;;  %p6622_p7 = pnand %p5479_p10, %p48_p5  ;;  %s6626_s8 = int_to_ptr.vmem [resolvable:$true] %s447_s8 }
  0x7e   : > { %s6628_s9 = scalar_lea.sflag [#allocation4], %s436_s15  ;;  %s6271_s10 = scalar_lea.hbm %s6620_s30, 1024 }
  0x7f   : > { %p6272_p12 = scmp.ne.s32.totalorder %s6620_s30, %s6271_s10  ;;  %p6273_p0 = pneg %p6622_p7 }
  0x80   : > { %s6276_s26 = scalar_lea.hbm %s7410_s0, 2048  ;;  %p6277_p5 = scmp.lt.s32.totalorder %s6620_s30, %s7410_s0 }
  0x81   : > { %p6274_p13 = pnand %p6273_p0, %p6272_p12  ;;  %p6278_p9 = scmp.lt.s32.totalorder %s6276_s26, %s6271_s10 }
  0x83   : > { %p6275_p2 = pneg %p6274_p13  ;;  %p6279_p10 = por %p6278_p9, %p6277_p5 }
  0x85   : > { %p6280_p4 = pnand %p6279_p10, %p6275_p2 }
  0x87   : > { %6283 = shalt.err (!%p6280_p4)
}
  0x88   : > { %s6284_s15 = scalar_lea.vmem %s6626_s8, 1024  ;;  %s6396_s11 = smov [#allocation3]  }
  0x89   : > { %p6285_p1 = scmp.ne.s32.totalorder %s6626_s8, %s6284_s15  ;;  %s6289_s19 = sshll.u32 %s6396_s11, 4  ;;  %s6290_s19 = int_to_ptr.vmem [resolvable:$false] %s6289_s19 }
  0x8a   : > { %s6291_s14 = scalar_lea.vmem %s6290_s19, 2048  ;;  %p6292_p13 = scmp.lt.s32.totalorder %s6626_s8, %s6290_s19 }
  0x8b   : > { %p6287_p11 = pnand %p6285_p1, %p6273_p0  ;;  %p6293_p6 = scmp.lt.s32.totalorder %s6291_s14, %s6284_s15 }
  0x8d   : > { %p6288_p12 = pneg %p6287_p11  ;;  %p6294_p8 = por %p6293_p6, %p6292_p13 }
  0x8f   : > { %p6295_p3 = pnand %p6294_p8, %p6288_p12 }
  0x91   : > { %6298 = shalt.err (!%p6295_p3)
}
  0x92   : > { %5467 = dma.hbm_to_vmem [thread:$0]  (!%p6622_p7), %s6620_s30, 1024, %s6626_s8, %s6628_s9, %s7447_s25, %s7447_s25, %s7446_s18  }
  0x93   : > { %p7459_p1 = scmp.ne.s32.totalorder %s7440_s28, 0 }
  0x94   : > { %s6655_s10 = sand.u32 (!%p7459_p1), 1, %s6371_s22   ;;  %p7460_p3 = scmp.ne.s32.totalorder (!%p7459_p1), %s7455_s1, 0 }
  0x95   : > { %459 = sbr.rel (%p7459_p1) target bundleno = 2687 (0xa7f), region = 68  ;;  %s4926_s11 = sshll.u32 (!%p7459_p1), %s6655_s10, 6 }
  0x96   : > { %s462_s19 = scalar_lea.sflag (!%p7459_p1), [#allocation4], %s6655_s10  ;;  %s6661_s13 = scalar_lea.vmem (!%p7459_p1), [#allocation3], %s4926_s11 }
  0x9a   : > { %6342 = dma.done.wait (%p7460_p3), %s462_s19, 1024  }
  0x9b   : > { %6344 = vsyncadd (%p7460_p3), %s462_s19, 4294966272  ;;  %p7461_p4 = scmp.eq.s32.totalorder %s6486_s27, 0 }
  0x9d   : > { %6346 = dma.done.wait (%p7461_p4), [#allocation7], 2048   ;;  %p7462_p8 = pmov %p7461_p4 }
  0x9e   : > { %p7463_p6 = pmov %p7461_p4 }
  0x9f   : > { %6348 = vsyncadd (%p7462_p8), [#allocation7], 4294965248 }
  0xa0   : > { %6350 = dma.done.wait (%p7463_p6), [#allocation10], 16384   ;;  %p7464_p11 = pmov %p7461_p4 }
  0xa1   : > { %p7465_p7 = pmov %p7461_p4 }
  0xa2   : > { %6352 = vsyncadd (%p7464_p11), [#allocation10], 4294950912 }
  0xa3   : > { %6354 = dma.done.wait (%p7465_p7), [#allocation13], 20480   ;;  %p7466_p0 = pmov %p7461_p4 }
  0xa5   : > { %6356 = vsyncadd (%p7466_p0), [#allocation13], 4294946816  ;;  %p7467_p2 = pmov %p7466_p0 }
  0xa6   : > { %p7468_p5 = pmov %p7466_p0 }
  0xa7   : > { %6358 = dma.done.wait (%p7467_p2), [#allocation16], 16384  }
  0xa8   : > { %6360 = vsyncadd (%p7468_p5), [#allocation16], 4294950912  ;;  %v6684_v0 = vld [vmem:[%s6661_s13] sm:$0xff]  ;;  %v6687_v1 = vld [vmem:[%s6661_s13 + $0x8] sm:$0xff]  ;;  %vm1831_vm1 = vcmask 261120   ;;  %s7343_s26 = scalar_lea.vmem [#allocation17], %s4926_s11 }
  0xa9   : > { %v6690_v2 = vld [vmem:[%s6661_s13 + $0x20] sm:$0xff]  ;;  %v543_v3 = vadd.f32 %v6687_v1, %v6684_v0  ;;  %v6695_v4 = vld [vmem:[%s6661_s13 + $0x28] sm:$0xff]  ;;  %v6698_v5 = vld [vmem:[%s6661_s13 + $0x10] sm:$0xff]  ;;  %s4772_s3 = sshll.u32 %s7343_s26, 4  ;;  %s5361_s29 = sshll.u32 %s6486_s27, 10  ;;  %s7357_s3 = int_to_ptr.vmem [resolvable:$true] %s4772_s3 }
  0xaa   : > { %v6701_v6 = vld [vmem:[%s6661_s13 + $0x18] sm:$0xff]  ;;  %v549_v7 = vadd.f32 %v6695_v4, %v6690_v2  ;;  %v6706_v8 = vld [vmem:[%s6661_s13 + $0x30] sm:$0xff]  ;;  %v5546_v17 = vld [vmem:[#allocation11 + $0x12c] ss:$24 sps:$4 sm:$0xff]   ;;  %s7364_s11 = scalar_lea.hbm %s7422_s12, %s5361_s29  ;;  %s4759_s27 = scalar_lea.sflag [#allocation5], %s6655_s10 }
  0xab   : > { %v6709_v9 = vld [vmem:[%s6661_s13 + $0x38] sm:$0xff]  ;;  %544 = vadd.xlane.f32.xlu0 %v543_v3  ;;  %v546_v10 = vadd.f32 %v6701_v6, %v6698_v5  ;;  %v5537_v12 = vld [vmem:[#allocation11 + $0x154] ss:$24 sps:$4 sm:$0xff]   ;;  %v5539_v13 = vld [vmem:[#allocation11 + $0x150] ss:$24 sps:$4 sm:$0xff]   ;;  %s6299_s19 = scalar_lea.vmem %s7357_s3, 1024 }
  0xac   : > { %550 = vadd.xlane.f32.xlu1 %v549_v7  ;;  %v552_v11 = vadd.f32 %v6709_v9, %v6706_v8  ;;  %v5540_v14 = vld [vmem:[#allocation11 + $0x15c] ss:$24 sps:$4 sm:$0xff]   ;;  %v5542_v15 = vld [vmem:[#allocation11 + $0x158] ss:$24 sps:$4 sm:$0xff]   ;;  %1228 = vmatprep.subr.bf16.mxu0 %v5537_v12  ;;  %v5548_v19 = vld [vmem:[#allocation11 + $0x128] ss:$24 sps:$4 sm:$0xff]   ;;  %p6300_p9 = scmp.ne.s32.totalorder %s7357_s3, %s6299_s19 }
  0xad   : > { %v5543_v16 = vld [vmem:[#allocation11 + $0x124] ss:$24 sps:$4 sm:$0xff]   ;;  %1281 = vmatprep.subr.bf16.mxu1 %v5540_v14  ;;  %1229 = vmatpush1.bf16.msra.mxu0 %v5539_v13  ;;  %v5545_v18 = vld [vmem:[#allocation11 + $0x120] ss:$24 sps:$4 sm:$0xff]   ;;  %v5549_v20 = vld [vmem:[#allocation11 + $0xf4] ss:$24 sps:$4 sm:$0xff]  }
  0xae   : > { %1282 = vmatpush1.bf16.msra.mxu1 %v5542_v15  ;;  %1230 = vmatprep.subr.bf16.mxu0 %v5543_v16  ;;  %v5552_v21 = vld [vmem:[#allocation11 + $0xfc] ss:$24 sps:$4 sm:$0xff]   ;;  %v5551_v22 = vld [vmem:[#allocation11 + $0xf0] ss:$24 sps:$4 sm:$0xff]   ;;  %v5558_v25 = vld [vmem:[#allocation11 + $0xcc] ss:$24 sps:$4 sm:$0xff]  }
  0xaf   : > { %547 = vadd.xlane.f32.xlu0 %v546_v10  ;;  %1283 = vmatprep.subr.bf16.mxu1 %v5546_v17  ;;  %v5554_v23 = vld [vmem:[#allocation11 + $0xf8] ss:$24 sps:$4 sm:$0xff]   ;;  %v5555_v24 = vld [vmem:[#allocation11 + $0xc4] ss:$24 sps:$4 sm:$0xff]   ;;  %v5560_v27 = vld [vmem:[#allocation11 + $0xc8] ss:$24 sps:$4 sm:$0xff]  }
  0xb0   : > { %553 = vadd.xlane.f32.xlu1 %v552_v11  ;;  %v5557_v26 = vld [vmem:[#allocation11 + $0xc0] ss:$24 sps:$4 sm:$0xff]   ;;  %v5561_v28 = vld [vmem:[#allocation11 + $0x94] ss:$24 sps:$4 sm:$0xff]   ;;  %v5563_v30 = vld [vmem:[#allocation11 + $0x90] ss:$24 sps:$4 sm:$0xff]  }
  0xb1   : > { %1231 = vmatpush1.bf16.msra.mxu0 %v5545_v18  ;;  %v5564_v29 = vld [vmem:[#allocation11 + $0x9c] ss:$24 sps:$4 sm:$0xff]   ;;  %v5566_v31 = vld [vmem:[#allocation11 + $0x98] ss:$24 sps:$4 sm:$0xff]   ;;  %v5570_v33 = vld [vmem:[#allocation11 + $0x6c] ss:$24 sps:$4 sm:$0xff]  }
  0xb2   : > { %1284 = vmatpush1.bf16.msra.mxu1 %v5548_v19  ;;  %1232 = vmatprep.subr.bf16.mxu0 %v5549_v20  ;;  %v5567_v32 = vld [vmem:[#allocation11 + $0x64] ss:$24 sps:$4 sm:$0xff]   ;;  %v5569_v34 = vld [vmem:[#allocation11 + $0x60] ss:$24 sps:$4 sm:$0xff]   ;;  %v5573_v36 = vld [vmem:[#allocation11 + $0x34] ss:$24 sps:$4 sm:$0xff]  }
  0xb3   : > { %1285 = vmatprep.subr.bf16.mxu1 %v5552_v21  ;;  %v5572_v35 = vld [vmem:[#allocation11 + $0x68] ss:$24 sps:$4 sm:$0xff]   ;;  %v5576_v37 = vld [vmem:[#allocation11 + $0x3c] ss:$24 sps:$4 sm:$0xff]   ;;  %v5578_v39 = vld [vmem:[#allocation11 + $0x38] ss:$24 sps:$4 sm:$0xff]  }
  0xb4   : > { %v5575_v38 = vld [vmem:[#allocation11 + $0x30] ss:$24 sps:$4 sm:$0xff]   ;;  %v5579_v40 = vld [vmem:[#allocation11 + $0x4] ss:$24 sps:$4 sm:$0xff]   ;;  %v5581_v42 = vld [vmem:[#allocation11] ss:$24 sps:$4 sm:$0xff]  }
  0xb5   : > { %1233 = vmatpush1.bf16.msra.mxu0 %v5551_v22  ;;  %v5582_v41 = vld [vmem:[#allocation11 + $0xc] ss:$24 sps:$4 sm:$0xff]   ;;  %v5584_v43 = vld [vmem:[#allocation11 + $0x8] ss:$24 sps:$4 sm:$0xff]   ;;  %v5588_v45 = vld [vmem:[#allocation11 + $0x2dc] ss:$24 sps:$4 sm:$0xff]  }
  0xb6   : > { %1286 = vmatpush1.bf16.msra.mxu1 %v5554_v23  ;;  %1234 = vmatprep.subr.bf16.mxu0 %v5555_v24  ;;  %v5585_v44 = vld [vmem:[#allocation11 + $0x2d4] ss:$24 sps:$4 sm:$0xff]   ;;  %v5587_v46 = vld [vmem:[#allocation11 + $0x2d0] ss:$24 sps:$4 sm:$0xff]   ;;  %v5591_v12 = vld [vmem:[#allocation11 + $0x2a4] ss:$24 sps:$4 sm:$0xff]  }
  0xb7   : > { %1287 = vmatprep.subr.bf16.mxu1 %v5558_v25  ;;  %v5593_v13 = vld [vmem:[#allocation11 + $0x2a0] ss:$24 sps:$4 sm:$0xff]   ;;  %v5594_v14 = vld [vmem:[#allocation11 + $0x2ac] ss:$24 sps:$4 sm:$0xff]   ;;  %v5599_v17 = vld [vmem:[#allocation11 + $0x270] ss:$24 sps:$4 sm:$0xff]  }
  0xb8   : > { %v5596_v15 = vld [vmem:[#allocation11 + $0x2a8] ss:$24 sps:$4 sm:$0xff]   ;;  %v5597_v16 = vld [vmem:[#allocation11 + $0x274] ss:$24 sps:$4 sm:$0xff]   ;;  %v5602_v19 = vld [vmem:[#allocation11 + $0x278] ss:$24 sps:$4 sm:$0xff]  }
  0xb9   : > { %1235 = vmatpush1.bf16.msra.mxu0 %v5557_v26  ;;  %v5600_v18 = vld [vmem:[#allocation11 + $0x27c] ss:$24 sps:$4 sm:$0xff]   ;;  %v5605_v21 = vld [vmem:[#allocation11 + $0x240] ss:$24 sps:$4 sm:$0xff]   ;;  %v5606_v22 = vld [vmem:[#allocation11 + $0x24c] ss:$24 sps:$4 sm:$0xff]  }
  0xba   : > { %1288 = vmatpush1.bf16.msra.mxu1 %v5560_v27  ;;  %1236 = vmatprep.subr.bf16.mxu0 %v5561_v28  ;;  %v5603_v20 = vld [vmem:[#allocation11 + $0x244] ss:$24 sps:$4 sm:$0xff]   ;;  %v5608_v23 = vld [vmem:[#allocation11 + $0x248] ss:$24 sps:$4 sm:$0xff]   ;;  %v5609_v24 = vld [vmem:[#allocation11 + $0x214] ss:$24 sps:$4 sm:$0xff]  }
  0xbb   : > { %1289 = vmatprep.subr.bf16.mxu1 %v5564_v29  ;;  %v5611_v25 = vld [vmem:[#allocation11 + $0x210] ss:$24 sps:$4 sm:$0xff]   ;;  %v5612_v26 = vld [vmem:[#allocation11 + $0x21c] ss:$24 sps:$4 sm:$0xff]   ;;  %v5618_v29 = vld [vmem:[#allocation11 + $0x1ec] ss:$24 sps:$4 sm:$0xff]  }
  0xbc   : > { %v5614_v27 = vld [vmem:[#allocation11 + $0x218] ss:$24 sps:$4 sm:$0xff]   ;;  %v5615_v28 = vld [vmem:[#allocation11 + $0x1e4] ss:$24 sps:$4 sm:$0xff]   ;;  %p7469_p10 = scmp.ne.s32.totalorder %s7456_s20, 0 }
  0xbd   : > { %1237 = vmatpush1.bf16.msra.mxu0 %v5563_v30  ;;  %v5617_v30 = vld [vmem:[#allocation11 + $0x1e0] ss:$24 sps:$4 sm:$0xff]  }
  0xbe   : > { %1290 = vmatpush1.bf16.msra.mxu1 %v5566_v31  ;;  %1238 = vmatprep.subr.bf16.mxu0 %v5567_v32  ;;  %v5620_v31 = vld [vmem:[#allocation11 + $0x1e8] ss:$24 sps:$4 sm:$0xff]   ;;  %v5621_v32 = vld [vmem:[#allocation11 + $0x1b4] ss:$24 sps:$4 sm:$0xff]   ;;  %p6301_p12 = pnand %p6300_p9, %p7469_p10 }
  0xbf   : > { %1291 = vmatprep.subr.bf16.mxu1 %v5570_v33  ;;  %v5624_v33 = vld [vmem:[#allocation11 + $0x1bc] ss:$24 sps:$4 sm:$0xff]  }
  0xc0   : > { %p6302_p13 = pneg %p6301_p12 }
  0xc1   : > { %1239 = vmatpush1.bf16.msra.mxu0 %v5569_v34  ;;  %v5623_v34 = vld [vmem:[#allocation11 + $0x1b0] ss:$24 sps:$4 sm:$0xff]  }
  0xc2   : > { %1292 = vmatpush1.bf16.msra.mxu1 %v5572_v35  ;;  %1240 = vmatprep.subr.bf16.mxu0 %v5573_v36  ;;  %v5626_v35 = vld [vmem:[#allocation11 + $0x1b8] ss:$24 sps:$4 sm:$0xff]   ;;  %v5627_v36 = vld [vmem:[#allocation11 + $0x184] ss:$24 sps:$4 sm:$0xff]  }
  0xc3   : > { %1293 = vmatprep.subr.bf16.mxu1 %v5576_v37  ;;  %v5630_v37 = vld [vmem:[#allocation11 + $0x18c] ss:$24 sps:$4 sm:$0xff]  }
  0xc5   : > { %1241 = vmatpush1.bf16.msra.mxu0 %v5575_v38  ;;  %v5629_v38 = vld [vmem:[#allocation11 + $0x180] ss:$24 sps:$4 sm:$0xff]  }
  0xc6   : > { %1294 = vmatpush1.bf16.msra.mxu1 %v5578_v39  ;;  %1242 = vmatprep.subr.bf16.mxu0 %v5579_v40  ;;  %v5632_v39 = vld [vmem:[#allocation11 + $0x188] ss:$24 sps:$4 sm:$0xff]   ;;  %v5635_v40 = vld [vmem:[#allocation11 + $0x164] ss:$24 sps:$4 sm:$0xff]  }
  0xc7   : > { %1295 = vmatprep.subr.bf16.mxu1 %v5582_v41  ;;  %v6755_v41 = vld [vmem:[#allocation9 + $0x74] ss:$8 sps:$4 sm:$0xff]  }
  0xc9   : > { %1243 = vmatpush1.bf16.msra.mxu0 %v5581_v42 }
  0xca   : > { %1296 = vmatpush1.bf16.msra.mxu1 %v5584_v43  ;;  %1244 = vmatprep.subr.bf16.mxu0 %v5585_v44 }
  0xcb   : > { %1297 = vmatprep.subr.bf16.mxu1 %v5588_v45 }
  0xcd   : > { %1245 = vmatpush2.bf16.msra.mxu0 %v5587_v46 }
  0xce   : > { %1246 = vmatprep.subr.bf16.mxu0 %v5591_v12 }
  0xd1   : > { %1247 = vmatpush2.bf16.msra.mxu0 %v5593_v13 }
  0xd2   : > { %1248 = vmatprep.subr.bf16.mxu0 %v5597_v16 }
  0xd5   : > { %1249 = vmatpush2.bf16.msra.mxu0 %v5599_v17 }
  0xd6   : > { %1250 = vmatprep.subr.bf16.mxu0 %v5603_v20 }
  0xd9   : > { %1251 = vmatpush2.bf16.msra.mxu0 %v5605_v21 }
  0xda   : > { %1252 = vmatprep.subr.bf16.mxu0 %v5609_v24 }
  0xdd   : > { %1253 = vmatpush2.bf16.msra.mxu0 %v5611_v25 }
  0xde   : > { %1254 = vmatprep.subr.bf16.mxu0 %v5615_v28 }
  0xe1   : > { %1255 = vmatpush2.bf16.msra.mxu0 %v5617_v30 }
  0xe2   : > { %1256 = vmatprep.subr.bf16.mxu0 %v5621_v32 }
  0xe5   : > { %1257 = vmatpush2.bf16.msra.mxu0 %v5623_v34  ;;  %v6796_v34 = vld [vmem:[#allocation9 + $0x60] ss:$8 sps:$4 sm:$0xff]  }
  0xe6   : > { %1258 = vmatprep.subr.bf16.mxu0 %v5627_v36 }
  0xe9   : > { %1259 = vmatpush2.bf16.msra.mxu0 %v5629_v38 }
  0xea   : > { %1334 = vmatprep.subr.bf16.mxu0 %v5635_v40 }
 0x134   : > { %v545_v47 = vpop.xlane.xlu0 %544 }
 0x135   : > { %v556_v48 = vmul.f32 0.00390625, %v545_v47  ;;  %v551_v49 = vpop.xlane.xlu1 %550 }
 0x136   : > { %v558_v50 = vmul.f32 0.00390625, %v551_v49  ;;  %v610_v49 = vlaneseq }
 0x137   : > { %v6716_v51 = vsub.f32 %v6684_v0, %v556_v48  ;;  %v6719_v52 = vsub.f32 %v6687_v1, %v556_v48 }
 0x138   : > { %v6722_v53 = vsub.f32 %v6690_v2, %v558_v50  ;;  %v6725_v54 = vsub.f32 %v6695_v4, %v558_v50  ;;  %v548_v55 = vpop.xlane.xlu0 %547 }
 0x139   : > { %v557_v56 = vmul.f32 0.00390625, %v548_v55  ;;  %v554_v57 = vpop.xlane.xlu1 %553  ;;  %v568_v58 = vmul.f32 %v6716_v51, %v6716_v51  ;;  %v569_v59 = vmul.f32 %v6719_v52, %v6719_v52 }
 0x13a   : > { %v559_v60 = vmul.f32 0.00390625, %v554_v57  ;;  %v572_v61 = vmul.f32 %v6722_v53, %v6722_v53  ;;  %v573_v62 = vmul.f32 %v6725_v54, %v6725_v54 }
 0x13b   : > { %v6736_v63 = vsub.f32 %v6698_v5, %v557_v56  ;;  %v6739_v0 = vsub.f32 %v6701_v6, %v557_v56  ;;  %v576_v1 = vadd.f32 %v569_v59, %v568_v58  ;;  %v6759_v58 = vshrl.u32 %v610_v49, 7 }
 0x13c   : > { %v6742_v2 = vsub.f32 %v6706_v8, %v559_v60  ;;  %v6745_v3 = vsub.f32 %v6709_v9, %v559_v60  ;;  %v582_v4 = vadd.f32 %v573_v62, %v572_v61  ;;  %v5590_v9 = vld [vmem:[#allocation11 + $0x2d8] ss:$24 sps:$4 sm:$0xff]   ;;  %v608_v62 = vld [vmem:[%s7414_s4] sm:$0x3] }
 0x13d   : > { %577 = vadd.xlane.f32.xlu0 %v576_v1  ;;  %v570_v7 = vmul.f32 %v6736_v63, %v6736_v63  ;;  %v571_v10 = vmul.f32 %v6739_v0, %v6739_v0  ;;  %1298 = vmatpush2.bf16.msra.mxu1 %v5590_v9  ;;  %v6762_v60 = vsub.s32 1, %v6759_v58  ;;  %v6765_v61 = vsub.s32 0, %v6759_v58 }
 0x13e   : > { %v574_v5 = vmul.f32 %v6742_v2, %v6742_v2  ;;  %v575_v6 = vmul.f32 %v6745_v3, %v6745_v3  ;;  %1299 = vmatprep.subr.bf16.mxu1 %v5594_v14 }
 0x13f   : > { %v579_v11 = vadd.f32 %v571_v10, %v570_v7  ;;  %v613_v7 = vrot.slane %v608_v62, %v6765_v61 }
 0x140   : > { %v585_v8 = vadd.f32 %v575_v6, %v574_v5  ;;  %v628_v5 = vld [vmem:[%s7415_s5] sm:$0x3] }
 0x141   : > { %583 = vadd.xlane.f32.xlu0 %v582_v4  ;;  %580 = vadd.xlane.f32.xlu1 %v579_v11  ;;  %v617_v4 = vrot.slane %v608_v62, %v6762_v60  ;;  %v637_v9 = vrot.slane %v628_v5, %v6762_v60  ;;  %v633_v13 = vrot.slane %v628_v5, %v6765_v61  ;;  %v5653_v62 = vld [vmem:[#allocation11 + $0x44] ss:$24 sps:$4 sm:$0xff]   ;;  %v6832_v5 = vld [vmem:[#allocation9 + $0x10] ss:$8 sps:$4 sm:$0xff]  }
 0x142   : > { %1300 = vmatpush2.bf16.msra.mxu1 %v5596_v15 }
 0x143   : > { %1301 = vmatprep.subr.bf16.mxu1 %v5600_v18 }
 0x145   : > { %586 = vadd.xlane.f32.xlu1 %v585_v8 }
 0x146   : > { %1302 = vmatpush2.bf16.msra.mxu1 %v5602_v19 }
 0x147   : > { %1303 = vmatprep.subr.bf16.mxu1 %v5606_v22 }
 0x14a   : > { %1304 = vmatpush2.bf16.msra.mxu1 %v5608_v23 }
 0x14b   : > { %1305 = vmatprep.subr.bf16.mxu1 %v5612_v26 }
 0x14e   : > { %1306 = vmatpush2.bf16.msra.mxu1 %v5614_v27 }
 0x14f   : > { %1307 = vmatprep.subr.bf16.mxu1 %v5618_v29  ;;  %v5638_v29 = vld [vmem:[#allocation11 + $0x134] ss:$24 sps:$4 sm:$0xff]  }
 0x152   : > { %1308 = vmatpush2.bf16.msra.mxu1 %v5620_v31  ;;  %v6789_v31 = vld [vmem:[#allocation9 + $0x64] ss:$8 sps:$4 sm:$0xff]  }
 0x153   : > { %1309 = vmatprep.subr.bf16.mxu1 %v5624_v33 }
 0x156   : > { %1310 = vmatpush2.bf16.msra.mxu1 %v5626_v35  ;;  %v5641_v35 = vld [vmem:[#allocation11 + $0x104] ss:$24 sps:$4 sm:$0xff]  }
 0x157   : > { %1311 = vmatprep.subr.bf16.mxu1 %v5630_v37  ;;  %v6799_v37 = vld [vmem:[#allocation9 + $0x54] ss:$8 sps:$4 sm:$0xff]  }
 0x15a   : > { %1312 = vmatpush2.bf16.msra.mxu1 %v5632_v39  ;;  %v5639_v39 = vld [vmem:[#allocation11 + $0x100] ss:$24 sps:$4 sm:$0xff]  }
 0x15b   : > { %1599 = vmatprep.subr.bf16.mxu1 %v6755_v41 }
 0x1c6   : > { %v578_v42 = vpop.xlane.xlu0 %577 }
 0x1c7   : > { %v588_v43 = vmul.f32 0.00390625, %v578_v42  ;;  %v5644_v42 = vld [vmem:[#allocation11 + $0xd4] ss:$24 sps:$4 sm:$0xff]  }
 0x1c9   : > { %v592_v44 = vadd.f32 1e-05, %v588_v43  ;;  %v6806_v43 = vld [vmem:[#allocation9 + $0x50] ss:$8 sps:$4 sm:$0xff]  }
 0x1ca   : > { %v581_v45 = vpop.xlane.xlu1 %580  ;;  %v584_v46 = vpop.xlane.xlu0 %583 }
 0x1cb   : > { %5969 = vrsqrt.f32 %v592_v44  ;;  %v589_v47 = vmul.f32 0.00390625, %v581_v45  ;;  %v590_v48 = vmul.f32 0.00390625, %v584_v46  ;;  %v6809_v44 = vld [vmem:[#allocation9 + $0x44] ss:$8 sps:$4 sm:$0xff]   ;;  %v5642_v45 = vld [vmem:[#allocation11 + $0xd0] ss:$24 sps:$4 sm:$0xff]  }
 0x1cc   : > { %v5647_v46 = vld [vmem:[#allocation11 + $0xa4] ss:$24 sps:$4 sm:$0xff]  }
 0x1cd   : > { %v593_v50 = vadd.f32 1e-05, %v589_v47  ;;  %v594_v55 = vadd.f32 1e-05, %v590_v48  ;;  %v6814_v47 = vld [vmem:[#allocation9 + $0x40] ss:$8 sps:$4 sm:$0xff]  }
 0x1ce   : > { %v587_v56 = vpop.xlane.xlu1 %586  ;;  %v6817_v48 = vld [vmem:[#allocation9 + $0x34] ss:$8 sps:$4 sm:$0xff]  }
 0x1cf   : > { %5971 = vrsqrt.f32 %v593_v50  ;;  %v591_v57 = vmul.f32 0.00390625, %v587_v56  ;;  %v5645_v50 = vld [vmem:[#allocation11 + $0xa0] ss:$24 sps:$4 sm:$0xff]  }
 0x1d0   : > { %5973 = vrsqrt.f32 %v594_v55  ;;  %v5650_v55 = vld [vmem:[#allocation11 + $0x74] ss:$24 sps:$4 sm:$0xff]   ;;  %v6820_v56 = vld [vmem:[#allocation9 + $0x30] ss:$8 sps:$4 sm:$0xff]  }
 0x1d1   : > { %v595_v59 = vadd.f32 1e-05, %v591_v57  ;;  %v6823_v57 = vld [vmem:[#allocation9 + $0x24] ss:$8 sps:$4 sm:$0xff]  }
 0x1d3   : > { %5975 = vrsqrt.f32 %v595_v59  ;;  %v5648_v59 = vld [vmem:[#allocation11 + $0x70] ss:$24 sps:$4 sm:$0xff]  }
 0x1d8   : > { %v5970_v1 = vpop.eup %5969 }
 0x1d9   : > { %v601_v10 = vmul.f32 %v5970_v1, %v6719_v52  ;;  %v600_v6 = vmul.f32 %v5970_v1, %v6716_v51  ;;  %v6826_v1 = vld [vmem:[#allocation9 + $0x20] ss:$8 sps:$4 sm:$0xff]  }
 0x1db   : > { %v621_v8 = vmul.f32 %v617_v4, %v601_v10  ;;  %v620_v12 = vmul.f32 %v613_v7, %v600_v6  ;;  %v5656_v10 = vld [vmem:[#allocation11 + $0x14] ss:$24 sps:$4 sm:$0xff]  }
 0x1dc   : > { %v5972_v11 = vpop.eup %5971  ;;  %v6835_v6 = vld [vmem:[#allocation9 + $0x4] ss:$8 sps:$4 sm:$0xff]  }
 0x1dd   : > { %v5974_v14 = vpop.eup %5973  ;;  %v603_v15 = vmul.f32 %v5972_v11, %v6739_v0  ;;  %v602_v16 = vmul.f32 %v5972_v11, %v6736_v63  ;;  %v641_v20 = vadd.f32 %v637_v9, %v621_v8  ;;  %v640_v21 = vadd.f32 %v633_v13, %v620_v12  ;;  %v5633_v0 = vld [vmem:[#allocation11 + $0x160] ss:$24 sps:$4 sm:$0xff]   ;;  %v5654_v11 = vld [vmem:[#allocation11 + $0x10] ss:$24 sps:$4 sm:$0xff]   ;;  %v5659_v8 = vld [vmem:[#allocation11 + $0x2e4] ss:$24 sps:$4 sm:$0xff]  }
 0x1de   : > { %v605_v52 = vmul.f32 %v5974_v14, %v6725_v54  ;;  %v604_v26 = vmul.f32 %v5974_v14, %v6722_v53  ;;  %v6787_v54 = vld [vmem:[#allocation9 + $0x70] ss:$8 sps:$4 sm:$0xff]   ;;  %v6841_v12 = vld [vmem:[#allocation9 + $0xf4] ss:$8 sps:$4 sm:$0xff]  }
 0x1df   : > { %v623_v17 = vmul.f32 %v617_v4, %v603_v15  ;;  %v622_v18 = vmul.f32 %v613_v7, %v602_v16  ;;  %v5662_v14 = vld [vmem:[#allocation11 + $0x2b4] ss:$24 sps:$4 sm:$0xff]   ;;  %v6844_v15 = vld [vmem:[#allocation9 + $0xf0] ss:$8 sps:$4 sm:$0xff]  }
 0x1e0   : > { %v5976_v19 = vpop.eup %5975  ;;  %v625_v51 = vmul.f32 %v617_v4, %v605_v52  ;;  %v624_v53 = vmul.f32 %v613_v7, %v604_v26  ;;  %v6847_v16 = vld [vmem:[#allocation9 + $0xe4] ss:$8 sps:$4 sm:$0xff]   ;;  %v5660_v52 = vld [vmem:[#allocation11 + $0x2b0] ss:$24 sps:$4 sm:$0xff]   ;;  %v5719_v26 = vld [vmem:[#allocation9 + $0xb4] ss:$8 sps:$4 sm:$0xff]  }
 0x1e1   : > { %v643_v22 = vadd.f32 %v637_v9, %v623_v17  ;;  %v642_v23 = vadd.f32 %v633_v13, %v622_v18  ;;  %v607_v24 = vmul.f32 %v5976_v19, %v6745_v3  ;;  %v606_v25 = vmul.f32 %v5976_v19, %v6742_v2  ;;  %v5636_v3 = vld [vmem:[#allocation11 + $0x130] ss:$24 sps:$4 sm:$0xff]   ;;  %v5665_v17 = vld [vmem:[#allocation11 + $0x284] ss:$24 sps:$4 sm:$0xff]  }
 0x1e2   : > { %v645_v32 = vadd.f32 %v637_v9, %v625_v51  ;;  %v644_v38 = vadd.f32 %v633_v13, %v624_v53  ;;  %v6850_v18 = vld [vmem:[#allocation9 + $0xe0] ss:$8 sps:$4 sm:$0xff]   ;;  %v6853_v19 = vld [vmem:[#allocation9 + $0xd4] ss:$8 sps:$4 sm:$0xff]   ;;  %v6856_v51 = vld [vmem:[#allocation9 + $0xd0] ss:$8 sps:$4 sm:$0xff]  }
 0x1e3   : > { %v649_v27 = vpack.c.bf16 %v643_v22, %v641_v20  ;;  %v6785_v28 = vpack.c.bf16 %v642_v23, %v640_v21  ;;  %v627_v63 = vmul.f32 %v617_v4, %v607_v24  ;;  %v626_v30 = vmul.f32 %v613_v7, %v606_v25  ;;  %v6829_v4 = vld [vmem:[#allocation9 + $0x14] ss:$8 sps:$4 sm:$0xff]   ;;  %v5651_v7 = vld [vmem:[#allocation11 + $0x40] ss:$24 sps:$4 sm:$0xff]   ;;  %v6859_v22 = vld [vmem:[#allocation9 + $0xc4] ss:$8 sps:$4 sm:$0xff]  }
 0x1e4   : > { %v5663_v20 = vld [vmem:[#allocation11 + $0x280] ss:$24 sps:$4 sm:$0xff]   ;;  %v5668_v21 = vld [vmem:[#allocation11 + $0x254] ss:$24 sps:$4 sm:$0xff]   ;;  %v5666_v23 = vld [vmem:[#allocation11 + $0x250] ss:$24 sps:$4 sm:$0xff]  }
 0x1e5   : > { %1260 = vmatprep.mubr.bf16.mxu0 %v649_v27  ;;  %1313 = vmatprep.mubr.bf16.mxu1 %v649_v27  ;;  %v647_v33 = vadd.f32 %v637_v9, %v627_v63  ;;  %v646_v36 = vadd.f32 %v633_v13, %v626_v30  ;;  %v6838_v9 = vld [vmem:[#allocation9] ss:$8 sps:$4 sm:$0xff]   ;;  %v5671_v24 = vld [vmem:[#allocation11 + $0x224] ss:$24 sps:$4 sm:$0xff]   ;;  %v5717_v63 = vld [vmem:[#allocation9 + $0xb0] ss:$8 sps:$4 sm:$0xff]  }
 0x1e6   : > { %1261 = vmatmul.mubr.bf16.vlgmr.msra.gmra.mxu0 %v6785_v28  ;;  %1314 = vmatmul.mubr.bf16.vlgmr.msra.gmra.mxu1 %v6785_v28  ;;  %v5657_v13 = vld [vmem:[#allocation11 + $0x2e0] ss:$24 sps:$4 sm:$0xff]   ;;  %v5672_v30 = vld [vmem:[#allocation11 + $0x1f0] ss:$24 sps:$4 sm:$0xff]  }
 0x1e7   : > { %1335 = vmatpush1.bf16.msra.mxu0 %v5633_v0  ;;  %v6793_v2 = vpack.c.bf16 %v647_v33, %v645_v32  ;;  %1600 = vmatpush1.bf16.msra.mxu1 %v6787_v54  ;;  %v6804_v40 = vpack.c.bf16 %v646_v36, %v644_v38  ;;  %v5714_v25 = vld [vmem:[#allocation9 + $0xc0] ss:$8 sps:$4 sm:$0xff]   ;;  %v5674_v0 = vld [vmem:[#allocation11 + $0x1f4] ss:$24 sps:$4 sm:$0xff]   ;;  %v5677_v32 = vld [vmem:[#allocation11 + $0x1c4] ss:$24 sps:$4 sm:$0xff]  }
 0x1e8   : > { %1336 = vmatprep.subr.bf16.mxu0 %v5638_v29  ;;  %1601 = vmatprep.subr.bf16.mxu1 %v6789_v31  ;;  %v5722_v29 = vld [vmem:[#allocation9 + $0xa4] ss:$8 sps:$4 sm:$0xff]   ;;  %v5720_v33 = vld [vmem:[#allocation9 + $0xa0] ss:$8 sps:$4 sm:$0xff]   ;;  %v5725_v36 = vld [vmem:[#allocation9 + $0x94] ss:$8 sps:$4 sm:$0xff]  }
 0x1e9   : > { %1270 = vmatprep.mubr.bf16.mxu0 %v6793_v2  ;;  %1323 = vmatprep.mubr.bf16.mxu1 %v6793_v2  ;;  %v5675_v53 = vld [vmem:[#allocation11 + $0x1c0] ss:$24 sps:$4 sm:$0xff]  }
 0x1ea   : > { %v5723_v38 = vld [vmem:[#allocation9 + $0x90] ss:$8 sps:$4 sm:$0xff]  }
 0x1eb   : > { %1337 = vmatpush1.bf16.msra.mxu0 %v5636_v3  ;;  %1602 = vmatpush1.bf16.msra.mxu1 %v6796_v34  ;;  %v5680_v3 = vld [vmem:[#allocation11 + $0x194] ss:$24 sps:$4 sm:$0xff]  }
 0x1ec   : > { %1338 = vmatprep.subr.bf16.mxu0 %v5641_v35  ;;  %1603 = vmatprep.subr.bf16.mxu1 %v6799_v37  ;;  %v5678_v35 = vld [vmem:[#allocation11 + $0x190] ss:$24 sps:$4 sm:$0xff]  }
 0x1ee   : > { %1271 = vmatmul.mubr.bf16.gmra.mxu0 %v6804_v40  ;;  %1324 = vmatmul.mubr.bf16.gmra.mxu1 %v6804_v40 }
 0x1ef   : > { %1339 = vmatpush1.bf16.msra.mxu0 %v5639_v39  ;;  %1366 = vmatprep.mubr.bf16.mxu0 %v649_v27  ;;  %v5669_v27 = vld [vmem:[#allocation11 + $0x220] ss:$24 sps:$4 sm:$0xff]   ;;  %v5728_v39 = vld [vmem:[#allocation9 + $0x84] ss:$8 sps:$4 sm:$0xff]  }
 0x1f0   : > { %1340 = vmatprep.subr.bf16.mxu0 %v5644_v42  ;;  %1604 = vmatpush1.bf16.msra.mxu1 %v6806_v43  ;;  %v5726_v42 = vld [vmem:[#allocation9 + $0x80] ss:$8 sps:$4 sm:$0xff]  }
 0x1f1   : > { %1605 = vmatprep.subr.bf16.mxu1 %v6809_v44 }
 0x1f3   : > { %1341 = vmatpush1.bf16.msra.mxu0 %v5642_v45 }
 0x1f4   : > { %1342 = vmatprep.subr.bf16.mxu0 %v5647_v46  ;;  %1606 = vmatpush1.bf16.msra.mxu1 %v6814_v47 }
 0x1f5   : > { %1607 = vmatprep.subr.bf16.mxu1 %v6817_v48 }
 0x1f7   : > { %1343 = vmatpush1.bf16.msra.mxu0 %v5645_v50 }
 0x1f8   : > { %1344 = vmatprep.subr.bf16.mxu0 %v5650_v55  ;;  %1608 = vmatpush1.bf16.msra.mxu1 %v6820_v56 }
 0x1f9   : > { %1609 = vmatprep.subr.bf16.mxu1 %v6823_v57 }
 0x1fb   : > { %1345 = vmatpush1.bf16.msra.mxu0 %v5648_v59 }
 0x1fc   : > { %1346 = vmatprep.subr.bf16.mxu0 %v5653_v62  ;;  %1610 = vmatpush1.bf16.msra.mxu1 %v6826_v1 }
 0x1fd   : > { %1611 = vmatprep.subr.bf16.mxu1 %v6829_v4 }
 0x1ff   : > { %1347 = vmatpush1.bf16.msra.mxu0 %v5651_v7 }
 0x200   : > { %1348 = vmatprep.subr.bf16.mxu0 %v5656_v10  ;;  %1612 = vmatpush1.bf16.msra.mxu1 %v6832_v5 }
 0x201   : > { %1613 = vmatprep.subr.bf16.mxu1 %v6835_v6 }
 0x203   : > { %1349 = vmatpush1.bf16.msra.mxu0 %v5654_v11 }
 0x204   : > { %1350 = vmatprep.subr.bf16.mxu0 %v5659_v8  ;;  %1614 = vmatpush1.bf16.msra.mxu1 %v6838_v9 }
 0x205   : > { %1615 = vmatprep.subr.bf16.mxu1 %v6841_v12 }
 0x207   : > { %1351 = vmatpush2.bf16.msra.mxu0 %v5657_v13 }
 0x208   : > { %1352 = vmatprep.subr.bf16.mxu0 %v5662_v14  ;;  %1616 = vmatpush2.bf16.msra.mxu1 %v6844_v15 }
 0x209   : > { %1617 = vmatprep.subr.bf16.mxu1 %v6847_v16 }
 0x20b   : > { %1353 = vmatpush2.bf16.msra.mxu0 %v5660_v52 }
 0x20c   : > { %1354 = vmatprep.subr.bf16.mxu0 %v5665_v17  ;;  %1618 = vmatpush2.bf16.msra.mxu1 %v6850_v18  ;;  %v1389_v17 = vld [vmem:[#allocation6 + $0x10] sm:$0xff] }
 0x20d   : > { %1619 = vmatprep.subr.bf16.mxu1 %v6853_v19 }
 0x20f   : > { %1355 = vmatpush2.bf16.msra.mxu0 %v5663_v20 }
 0x210   : > { %1356 = vmatprep.subr.bf16.mxu0 %v5668_v21  ;;  %1620 = vmatpush2.bf16.msra.mxu1 %v6856_v51 }
 0x211   : > { %1621 = vmatprep.subr.bf16.mxu1 %v6859_v22 }
 0x213   : > { %1357 = vmatpush2.bf16.msra.mxu0 %v5666_v23 }
 0x214   : > { %1358 = vmatprep.subr.bf16.mxu0 %v5671_v24  ;;  %1622 = vmatpush2.bf16.msra.mxu1 %v5714_v25  ;;  %v1388_v24 = vld [vmem:[#allocation6 + $0x8] sm:$0xff] }
 0x215   : > { %1623 = vmatprep.subr.bf16.mxu1 %v5719_v26 }
 0x217   : > { %1359 = vmatpush2.bf16.msra.mxu0 %v5669_v27 }
 0x218   : > { %1360 = vmatprep.subr.bf16.mxu0 %v5674_v0  ;;  %1624 = vmatpush2.bf16.msra.mxu1 %v5717_v63 }
 0x219   : > { %1625 = vmatprep.subr.bf16.mxu1 %v5722_v29 }
 0x21b   : > { %1361 = vmatpush2.bf16.msra.mxu0 %v5672_v30 }
 0x21c   : > { %1362 = vmatprep.subr.bf16.mxu0 %v5677_v32  ;;  %1626 = vmatpush2.bf16.msra.mxu1 %v5720_v33  ;;  %v1398_v32 = vld [vmem:[#allocation8 + $0x18] sm:$0xff] }
 0x21d   : > { %1627 = vmatprep.subr.bf16.mxu1 %v5725_v36 }
 0x21f   : > { %1363 = vmatpush2.bf16.msra.mxu0 %v5675_v53 }
 0x220   : > { %1364 = vmatprep.subr.bf16.mxu0 %v5680_v3  ;;  %1628 = vmatpush2.bf16.msra.mxu1 %v5723_v38 }
 0x221   : > { %1629 = vmatprep.subr.bf16.mxu1 %v5728_v39 }
 0x223   : > { %1365 = vmatpush2.bf16.msra.mxu0 %v5678_v35 }
 0x224   : > { %1680 = vmatprep.subr.bf16.mxu0 %v6755_v41  ;;  %1630 = vmatpush2.bf16.msra.mxu1 %v5726_v42 }
 0x226   : > { %1367 = vmatmul.mubr.bf16.vlgmr.msra.gmra.mxu0 %v6785_v28 }
 0x227   : > { %1376 = vmatprep.mubr.bf16.mxu0 %v6793_v2  ;;  %1681 = vmatpush1.bf16.msra.mxu0 %v6787_v54 }
 0x228   : > { %1682 = vmatprep.subr.bf16.mxu0 %v6789_v31 }
 0x22b   : > { %1683 = vmatpush1.bf16.msra.mxu0 %v6796_v34 }
 0x22c   : > { %1684 = vmatprep.subr.bf16.mxu0 %v6799_v37 }
 0x22e   : > { %1377 = vmatmul.mubr.bf16.gmra.mxu0 %v6804_v40 }
 0x22f   : > { %1685 = vmatpush1.bf16.msra.mxu0 %v6806_v43 }
 0x230   : > { %1686 = vmatprep.subr.bf16.mxu0 %v6809_v44 }
 0x233   : > { %1687 = vmatpush1.bf16.msra.mxu0 %v6814_v47 }
 0x234   : > { %1688 = vmatprep.subr.bf16.mxu0 %v6817_v48 }
 0x237   : > { %1689 = vmatpush1.bf16.msra.mxu0 %v6820_v56 }
 0x238   : > { %1690 = vmatprep.subr.bf16.mxu0 %v6823_v57 }
 0x23b   : > { %1691 = vmatpush1.bf16.msra.mxu0 %v6826_v1 }
 0x23c   : > { %1692 = vmatprep.subr.bf16.mxu0 %v6829_v4 }
 0x23f   : > { %1693 = vmatpush1.bf16.msra.mxu0 %v6832_v5 }
 0x240   : > { %1694 = vmatprep.subr.bf16.mxu0 %v6835_v6 }
 0x243   : > { %1695 = vmatpush1.bf16.msra.mxu0 %v6838_v9 }
 0x244   : > { %1696 = vmatprep.subr.bf16.mxu0 %v6841_v12 }
 0x247   : > { %1697 = vmatpush2.bf16.msra.mxu0 %v6844_v15  ;;  %v1387_v15 = vld [vmem:[#allocation6] sm:$0xff] }
 0x248   : > { %1698 = vmatprep.subr.bf16.mxu0 %v6847_v16 }
 0x24b   : > { %1699 = vmatpush2.bf16.msra.mxu0 %v6850_v18  ;;  %v1395_v18 = vld [vmem:[#allocation8] sm:$0xff] }
 0x24c   : > { %1700 = vmatprep.subr.bf16.mxu0 %v6853_v19  ;;  %v1396_v19 = vld [vmem:[#allocation8 + $0x8] sm:$0xff] }
 0x24f   : > { %1701 = vmatpush2.bf16.msra.mxu0 %v6856_v51  ;;  %v1397_v51 = vld [vmem:[#allocation8 + $0x10] sm:$0xff] }
 0x250   : > { %1702 = vmatprep.subr.bf16.mxu0 %v6859_v22 }
 0x253   : > { %1703 = vmatpush2.bf16.msra.mxu0 %v5714_v25  ;;  %v1390_v25 = vld [vmem:[#allocation6 + $0x18] sm:$0xff] }
 0x254   : > { %1704 = vmatprep.subr.bf16.mxu0 %v5719_v26 }
 0x257   : > { %1705 = vmatpush2.bf16.msra.mxu0 %v5717_v63 }
 0x258   : > { %1706 = vmatprep.subr.bf16.mxu0 %v5722_v29 }
 0x25b   : > { %1707 = vmatpush2.bf16.msra.mxu0 %v5720_v33 }
 0x25c   : > { %1708 = vmatprep.subr.bf16.mxu0 %v5725_v36 }
 0x25f   : > { %1709 = vmatpush2.bf16.msra.mxu0 %v5723_v38 }
 0x260   : > { %1710 = vmatprep.subr.bf16.mxu0 %v5728_v39 }
 0x263   : > { %1711 = vmatpush2.bf16.msra.mxu0 %v5726_v42 }
 0x2a6   : > { %v1262_v41 = vpop.f32.mrf.mxu0  ;;  %v1315_v28 = vpop.f32.mrf.mxu1 }
 0x2a7   : > { %v1652_v22 = vmul.f32 %v1387_v15, %v1262_v41  ;;  %v1733_v23 = vmul.f32 %v1387_v15, %v1315_v28 }
 0x2a8   : > { %v1264_v54 = vpop.f32.mrf.mxu0  ;;  %v1317_v31 = vpop.f32.mrf.mxu1 }
 0x2a9   : > { %v1653_v36 = vmul.f32 %v1388_v24, %v1264_v54  ;;  %v1734_v38 = vmul.f32 %v1388_v24, %v1317_v31 }
 0x2aa   : > { %v1266_v2 = vpop.f32.mrf.mxu0  ;;  %v1319_v34 = vpop.f32.mrf.mxu1 }
 0x2ab   : > { %v1435_v45 = vpack.c.bf16 %v1266_v2, %v1262_v41  ;;  %v1676_v46 = vpack.c.bf16 %v1319_v34, %v1315_v28  ;;  %v1654_v26 = vmul.f32 %v1389_v17, %v1266_v2  ;;  %v1735_v27 = vmul.f32 %v1389_v17, %v1319_v34  ;;  %v1399_v34 = vld [vmem:[#allocation8 + $0x20] sm:$0xff] }
 0x2ac   : > { %v1268_v37 = vpop.f32.mrf.mxu0  ;;  %v1321_v40 = vpop.f32.mrf.mxu1 }
 0x2ad   : > { %v1436_v43 = vpack.c.bf16 %v1268_v37, %v1264_v54  ;;  %v1677_v44 = vpack.c.bf16 %v1321_v40, %v1317_v31  ;;  %v1655_v39 = vmul.f32 %v1390_v25, %v1268_v37  ;;  %v1736_v42 = vmul.f32 %v1390_v25, %v1321_v40  ;;  %v1400_v31 = vld [vmem:[#allocation8 + $0x28] sm:$0xff]  ;;  %v1393_v37 = vld [vmem:[#allocation6 + $0x30] sm:$0xff] }
 0x2ae   : > { %v6889_v47 = vpop.f32.mrf.mxu0  ;;  %v6891_v48 = vpop.f32.mrf.mxu1 }
 0x2af   : > { %1631 = vmatprep.mubr.bf16.mxu1 %v1436_v43  ;;  %1712 = vmatprep.mubr.bf16.mxu0 %v1677_v44 }
 0x2b0   : > { %v6893_v50 = vpop.f32.mrf.mxu0  ;;  %v6895_v55 = vpop.f32.mrf.mxu1  ;;  %1632 = vmatmul.mubr.bf16.vlgmr.msra.gmra.mxu1 %v1435_v45  ;;  %1713 = vmatmul.mubr.bf16.vlgmr.msra.gmra.mxu0 %v1676_v46  ;;  %v1391_v46 = vld [vmem:[#allocation6 + $0x20] sm:$0xff] }
 0x2b1   : > { %v1656_v25 = vmul.f32 %v1391_v46, %v6889_v47 }
 0x2b2   : > { %v6897_v56 = vpop.f32.mrf.mxu0  ;;  %v6899_v57 = vpop.f32.mrf.mxu1 }
 0x2b3   : > { %v1437_v7 = vpack.c.bf16 %v6897_v56, %v6889_v47  ;;  %v1678_v10 = vpack.c.bf16 %v6899_v57, %v6891_v48 }
 0x2b4   : > { %v6901_v59 = vpop.f32.mrf.mxu0  ;;  %v6903_v62 = vpop.f32.mrf.mxu1 }
 0x2b5   : > { %v1438_v1 = vpack.c.bf16 %v6901_v59, %v6893_v50  ;;  %v1679_v4 = vpack.c.bf16 %v6903_v62, %v6895_v55 }
 0x2b7   : > { %1641 = vmatprep.mubr.bf16.mxu1 %v1438_v1  ;;  %1722 = vmatprep.mubr.bf16.mxu0 %v1679_v4  ;;  %v1392_v1 = vld [vmem:[#allocation6 + $0x28] sm:$0xff] }
 0x2b8   : > { %1642 = vmatmul.mubr.bf16.gmra.mxu1 %v1437_v7  ;;  %1723 = vmatmul.mubr.bf16.gmra.mxu0 %v1678_v10 }
 0x2e6   : > { %v6913_v5 = vpop.f32.mrf.mxu0 }
 0x2e8   : > { %v6915_v6 = vpop.f32.mrf.mxu0 }
 0x2ea   : > { %v6917_v11 = vpop.f32.mrf.mxu0 }
 0x2ec   : > { %v6919_v8 = vpop.f32.mrf.mxu0 }
 0x2ee   : > { %v6921_v9 = vpop.f32.mrf.mxu0 }
 0x2f0   : > { %v6923_v12 = vpop.f32.mrf.mxu0 }
 0x2f2   : > { %v6925_v13 = vpop.f32.mrf.mxu0 }
 0x2f4   : > { %v6927_v14 = vpop.f32.mrf.mxu0 }
 0x370   : > { %v1633_v16 = vpop.f32.mrf.mxu1  ;;  %v1714_v52 = vpop.f32.mrf.mxu0 }
 0x371   : > { %v1660_v0 = vmul.f32 %v1633_v16, %v1395_v18  ;;  %v1741_v63 = vmul.f32 %v1714_v52, %v1395_v18 }
 0x372   : > { %v1635_v20 = vpop.f32.mrf.mxu1  ;;  %v1716_v21 = vpop.f32.mrf.mxu0 }
 0x373   : > { %v1661_v33 = vmul.f32 %v1635_v20, %v1396_v19  ;;  %v1742_v53 = vmul.f32 %v1716_v21, %v1396_v19  ;;  %v1668_v4 = vadd.f32 %v1660_v0, %v1652_v22  ;;  %v1749_v7 = vadd.f32 %v1741_v63, %v1733_v23 }
 0x374   : > { %v1637_v29 = vpop.f32.mrf.mxu1  ;;  %v1718_v30 = vpop.f32.mrf.mxu0  ;;  %v1737_v22 = vmul.f32 %v1391_v46, %v6891_v48  ;;  %v1657_v23 = vmul.f32 %v1392_v1, %v6893_v50 }
 0x375   : > { %v1662_v3 = vmul.f32 %v1637_v29, %v1397_v51  ;;  %v1743_v35 = vmul.f32 %v1718_v30, %v1397_v51  ;;  %v1669_v16 = vadd.f32 %v1661_v33, %v1653_v36  ;;  %v1750_v52 = vadd.f32 %v1742_v53, %v1734_v38  ;;  %v1401_v51 = vld [vmem:[#allocation8 + $0x30] sm:$0xff]  ;;  %v1402_v33 = vld [vmem:[#allocation8 + $0x38] sm:$0xff] }
 0x376   : > { %v1639_v43 = vpop.f32.mrf.mxu1  ;;  %v1720_v41 = vpop.f32.mrf.mxu0 }
 0x377   : > { %v1670_v28 = vadd.f32 %v1662_v3, %v1654_v26  ;;  %v1751_v44 = vadd.f32 %v1743_v35, %v1735_v27  ;;  %v1663_v45 = vmul.f32 %v1639_v43, %v1398_v32  ;;  %v1744_v2 = vmul.f32 %v1720_v41, %v1398_v32  ;;  %v1394_v27 = vld [vmem:[#allocation6 + $0x38] sm:$0xff] }
 0x378   : > { %v1643_v10 = vpop.f32.mrf.mxu1  ;;  %v1724_v15 = vpop.f32.mrf.mxu0  ;;  %v1738_v26 = vmul.f32 %v1392_v1, %v6895_v55  ;;  %v1658_v3 = vmul.f32 %v1393_v37, %v6897_v56  ;;  %v1739_v35 = vmul.f32 %v1393_v37, %v6899_v57  ;;  %v1659_v48 = vmul.f32 %v1394_v27, %v6901_v59 }
 0x379   : > { %v1671_v17 = vadd.f32 %v1663_v45, %v1655_v39  ;;  %v1752_v54 = vadd.f32 %v1744_v2, %v1736_v42  ;;  %v1664_v40 = vmul.f32 %v1643_v10, %v1399_v34  ;;  %v1745_v18 = vmul.f32 %v1724_v15, %v1399_v34 }
 0x37a   : > { %v1645_v19 = vpop.f32.mrf.mxu1  ;;  %v1726_v20 = vpop.f32.mrf.mxu0  ;;  %v1768_v21 = vpack.c.bf16 %v1670_v28, %v1668_v4  ;;  %v1770_v24 = vpack.c.bf16 %v1751_v44, %v1749_v7  ;;  %v1740_v50 = vmul.f32 %v1394_v27, %v6903_v62  ;;  %v1773_v62 = vpack.c.bf16 %v6925_v13, %v6921_v9 }
 0x37b   : > { %v1665_v0 = vmul.f32 %v1645_v19, %v1400_v31  ;;  %v1746_v63 = vmul.f32 %v1726_v20, %v1400_v31  ;;  %v1937_v32 = vpack.c.bf16 %v1671_v17, %v1669_v16  ;;  %v1939_v53 = vpack.c.bf16 %v1752_v54, %v1750_v52 }
 0x37c   : > { %5382 = vmatprep.mubr.bf16.mxu1 %v1768_v21  ;;  %v1647_v29 = vpop.f32.mrf.mxu1  ;;  %v1728_v30 = vpop.f32.mrf.mxu0  ;;  %v1672_v55 = vadd.f32 %v1664_v40, %v1656_v25  ;;  %v1753_v38 = vadd.f32 %v1745_v18, %v1737_v22  ;;  %v1942_v4 = vpack.c.bf16 %v6927_v14, %v6923_v12  ;;  %v1772_v7 = vpack.c.bf16 %v6917_v11, %v6913_v5 }
 0x37d   : > { %v1666_v47 = vmul.f32 %v1647_v29, %v1401_v51  ;;  %v1747_v36 = vmul.f32 %v1728_v30, %v1401_v51  ;;  %5398 = vmatprep.mubr.bf16.mxu0 %v1937_v32  ;;  %v1673_v45 = vadd.f32 %v1665_v0, %v1657_v23  ;;  %v1754_v2 = vadd.f32 %v1746_v63, %v1738_v26 }
 0x37e   : > { %v1649_v39 = vpop.f32.mrf.mxu1  ;;  %v1730_v42 = vpop.f32.mrf.mxu0  ;;  %v1941_v10 = vpack.c.bf16 %v6919_v8, %v6915_v6  ;;  %v1763_v12 = vand.u32 127, %v610_v49  ;;  %v1760_v13 = vadd.s32 16, %v6759_v58  ;;  %v1759_v5 = vadd.s32 8, %v6759_v58 }
 0x37f   : > { %v1674_v43 = vadd.f32 %v1666_v47, %v1658_v3  ;;  %v1755_v41 = vadd.f32 %v1747_v36, %v1739_v35  ;;  %v1667_v28 = vmul.f32 %v1649_v39, %v1402_v33  ;;  %v1748_v44 = vmul.f32 %v1730_v42, %v1402_v33 }
 0x380   : > { %vm1764_vm0 = vcmp.ge.s32.totalorder %v6759_v58, %v1763_v12  ;;  %vm1766_vm2 = vcmp.ge.s32.totalorder %v1760_v13, %v1763_v12  ;;  %vm1765_vm3 = vcmp.ge.s32.totalorder %v1759_v5, %v1763_v12  ;;  %v1761_v37 = vadd.s32 24, %v6759_v58 }
 0x381   : > { %v1769_v56 = vpack.c.bf16 %v1674_v43, %v1672_v55  ;;  %v1675_v34 = vadd.f32 %v1667_v28, %v1659_v48  ;;  %v1756_v57 = vadd.f32 %v1748_v44, %v1740_v50  ;;  %v1771_v46 = vpack.c.bf16 %v1755_v41, %v1753_v38 }
 0x382   : > { %vm1767_vm4 = vcmp.ge.s32.totalorder %v1761_v37, %v1763_v12 }
 0x383   : > { %v1938_v1 = vpack.c.bf16 %v1675_v34, %v1673_v45  ;;  %5378 = vmatprep.subr.bf16.mxu1 %v1771_v46  ;;  %v1940_v59 = vpack.c.bf16 %v1756_v57, %v1754_v2 }
 0x384   : > { %5379 = vmatpush3.bf16.xpose.msra.mxu1 %v1771_v46 }
 0x385   : > { %5380 = vmatprep.subr.bf16.mxu1 %v1770_v24  ;;  %5394 = vmatprep.subr.bf16.mxu0 %v1940_v59 }
 0x386   : > { %5395 = vmatpush3.bf16.xpose.msra.mxu0 %v1940_v59 }
 0x387   : > { %5396 = vmatprep.subr.bf16.mxu0 %v1939_v53 }
 0x38c   : > { %5381 = vmatpush3.bf16.xpose.msra.mxu1 %v1770_v24 }
 0x38d   : > { %5386 = vmatprep.subr.bf16.mxu1 %v1773_v62 }
 0x38e   : > { %5397 = vmatpush3.bf16.xpose.msra.mxu0 %v1939_v53 }
 0x38f   : > { %5402 = vmatprep.subr.bf16.mxu0 %v1942_v4 }
 0x393   : > { %5383 = vmatmul.mubr.bf16.vlgmr.msra.gmra.mxu1 %v1769_v56 }
 0x394   : > { %5387 = vmatpush3.bf16.msra.mxu1 %v1773_v62 }
 0x395   : > { %5388 = vmatprep.subr.bf16.mxu1 %v1772_v7  ;;  %5399 = vmatmul.mubr.bf16.vlgmr.msra.gmra.mxu0 %v1938_v1 }
 0x396   : > { %5403 = vmatpush3.bf16.msra.mxu0 %v1942_v4 }
 0x397   : > { %5404 = vmatprep.subr.bf16.mxu0 %v1941_v10 }
 0x398   : > { %5389 = vmatpush3.bf16.msra.mxu1 %v1772_v7 }
 0x39a   : > { %5405 = vmatpush3.bf16.msra.mxu0 %v1941_v10 }
 0x453   : > { %v5384_v9 = vpop.f32.mrf.mxu1 }
 0x454   : > { %v1825_v51 = vmul.f32 0.088388346, %v5384_v9 }
 0x455   : > { %v1808_v14 = vpop.f32.mrf.mxu1  ;;  %v5400_v15 = vpop.f32.mrf.mxu0 }
 0x456   : > { %v1823_v11 = vmul.f32 0.088388346, %v1808_v14  ;;  %v1994_v16 = vmul.f32 0.088388346, %v5400_v15  ;;  %v1829_v29 = vsel %vm1766_vm2, %v1825_v51, -1e+30 }
 0x457   : > { %v5385_v6 = vpop.f32.mrf.mxu1  ;;  %v1977_v8 = vpop.f32.mrf.mxu0  ;;  %v1838_v32 = vsel %vm1831_vm1, %v1829_v29, -inf }
 0x458   : > { %v1827_v52 = vsel %vm1764_vm0, %v1823_v11, -1e+30  ;;  %v1992_v17 = vmul.f32 0.088388346, %v1977_v8  ;;  %v1998_v19 = vsel %vm1766_vm2, %v1994_v16, -1e+30 }
 0x459   : > { %v1811_v54 = vpop.f32.mrf.mxu1  ;;  %v5401_v49 = vpop.f32.mrf.mxu0  ;;  %v1832_v31 = vsel %vm1831_vm1, %v1827_v52, -inf  ;;  %v2006_v25 = vsel %vm1831_vm1, %v1998_v19, -inf  ;;  %v1826_v63 = vmul.f32 0.088388346, %v5385_v6 }
 0x45a   : > { %v1824_v40 = vmul.f32 0.088388346, %v1811_v54  ;;  %v1995_v18 = vmul.f32 0.088388346, %v5401_v49  ;;  %1833 = vmax.xlane.f32.xlu0 %v1832_v31  ;;  %v1996_v23 = vsel %vm1764_vm0, %v1992_v17, -1e+30 }
 0x45b   : > { %v1980_v20 = vpop.f32.mrf.mxu0  ;;  %v2000_v27 = vsel %vm1831_vm1, %v1996_v23, -inf  ;;  %v1830_v58 = vsel %vm1767_vm4, %v1826_v63, -1e+30  ;;  %v5731_v31 = vld [vmem:[#allocation12 + $0x74] ss:$8 sps:$4 sm:$0xff]  }
 0x45c   : > { %v1828_v21 = vsel %vm1765_vm3, %v1824_v40, -1e+30  ;;  %v1993_v22 = vmul.f32 0.088388346, %v1980_v20  ;;  %v1999_v26 = vsel %vm1767_vm4, %v1995_v18, -1e+30  ;;  %2309 = vmatprep.subr.bf16.mxu1 %v5731_v31 }
 0x45d   : > { %v1835_v24 = vsel %vm1831_vm1, %v1828_v21, -inf  ;;  %v2009_v0 = vsel %vm1831_vm1, %v1999_v26, -inf  ;;  %v1841_v53 = vsel %vm1831_vm1, %v1830_v58, -inf }
 0x45e   : > { %1836 = vmax.xlane.f32.xlu1 %v1835_v24  ;;  %2007 = vmax.xlane.f32.xlu0 %v2006_v25  ;;  %v1997_v30 = vsel %vm1765_vm3, %v1993_v22, -1e+30 }
 0x45f   : > { %v2003_v33 = vsel %vm1831_vm1, %v1997_v30, -inf }
 0x462   : > { %2001 = vmax.xlane.f32.xlu0 %v2000_v27  ;;  %2010 = vmax.xlane.f32.xlu1 %v2009_v0 }
 0x466   : > { %1839 = vmax.xlane.f32.xlu0 %v1838_v32  ;;  %2004 = vmax.xlane.f32.xlu1 %v2003_v33 }
 0x46a   : > { %1842 = vmax.xlane.f32.xlu1 %v1841_v53 }
 0x4e3   : > { %v1834_v3 = vpop.xlane.xlu0 %1833 }
 0x4e4   : > { %v1844_v35 = vsub.f32 %v1827_v52, %v1834_v3 }
 0x4e6   : > { %v1848_v47 = vmul.f32 1.442695, %v1844_v35 }
 0x4e7   : > { %v1837_v36 = vpop.xlane.xlu1 %1836  ;;  %v2008_v48 = vpop.xlane.xlu0 %2007 }
 0x4e8   : > { %5977 = vpow2.f32 %v1848_v47  ;;  %v1845_v50 = vsub.f32 %v1828_v21, %v1837_v36  ;;  %v2014_v55 = vsub.f32 %v1998_v19, %v2008_v48 }
 0x4ea   : > { %v1850_v38 = vmul.f32 1.442695, %v1845_v50  ;;  %v2020_v39 = vmul.f32 1.442695, %v2014_v55  ;;  %v5729_v55 = vld [vmem:[#allocation12 + $0x70] ss:$8 sps:$4 sm:$0xff]  }
 0x4eb   : > { %v2002_v42 = vpop.xlane.xlu0 %2001  ;;  %v2011_v43 = vpop.xlane.xlu1 %2010 }
 0x4ec   : > { %5979 = vpow2.f32 %v1850_v38  ;;  %v2012_v41 = vsub.f32 %v1996_v23, %v2002_v42  ;;  %v2015_v28 = vsub.f32 %v1999_v26, %v2011_v43  ;;  %v5732_v42 = vld [vmem:[#allocation12 + $0x60] ss:$8 sps:$4 sm:$0xff]   ;;  %v5737_v43 = vld [vmem:[#allocation12 + $0x54] ss:$8 sps:$4 sm:$0xff]  }
 0x4ed   : > { %5981 = vpow2.f32 %v2020_v39  ;;  %v5734_v39 = vld [vmem:[#allocation12 + $0x64] ss:$8 sps:$4 sm:$0xff]  }
 0x4ee   : > { %v2016_v44 = vmul.f32 1.442695, %v2012_v41  ;;  %v2022_v45 = vmul.f32 1.442695, %v2015_v28  ;;  %v5735_v41 = vld [vmem:[#allocation12 + $0x50] ss:$8 sps:$4 sm:$0xff]  }
 0x4ef   : > { %v1840_v2 = vpop.xlane.xlu0 %1839  ;;  %v2005_v56 = vpop.xlane.xlu1 %2004  ;;  %v5740_v28 = vld [vmem:[#allocation12 + $0x44] ss:$8 sps:$4 sm:$0xff]  }
 0x4f0   : > { %5983 = vpow2.f32 %v2016_v44  ;;  %v1846_v34 = vsub.f32 %v1829_v29, %v1840_v2  ;;  %v2013_v57 = vsub.f32 %v1997_v30, %v2005_v56  ;;  %v5738_v44 = vld [vmem:[#allocation12 + $0x40] ss:$8 sps:$4 sm:$0xff]   ;;  %v5741_v2 = vld [vmem:[#allocation12 + $0x30] ss:$8 sps:$4 sm:$0xff]   ;;  %v5746_v56 = vld [vmem:[#allocation12 + $0x24] ss:$8 sps:$4 sm:$0xff]  }
 0x4f1   : > { %5985 = vpow2.f32 %v2022_v45  ;;  %v5743_v45 = vld [vmem:[#allocation12 + $0x34] ss:$8 sps:$4 sm:$0xff]  }
 0x4f2   : > { %v1852_v46 = vmul.f32 1.442695, %v1846_v34  ;;  %v2018_v1 = vmul.f32 1.442695, %v2013_v57  ;;  %v5744_v34 = vld [vmem:[#allocation12 + $0x20] ss:$8 sps:$4 sm:$0xff]  }
 0x4f3   : > { %v1843_v59 = vpop.xlane.xlu1 %1842  ;;  %v5749_v57 = vld [vmem:[#allocation12 + $0x14] ss:$8 sps:$4 sm:$0xff]  }
 0x4f4   : > { %5987 = vpow2.f32 %v1852_v46  ;;  %v1847_v62 = vsub.f32 %v1830_v58, %v1843_v59  ;;  %v5747_v46 = vld [vmem:[#allocation12 + $0x10] ss:$8 sps:$4 sm:$0xff]   ;;  %v5750_v59 = vld [vmem:[#allocation12] ss:$8 sps:$4 sm:$0xff]  }
 0x4f5   : > { %v5978_v4 = vpop.eup %5977  ;;  %5989 = vpow2.f32 %v2018_v1  ;;  %v5752_v1 = vld [vmem:[#allocation12 + $0x4] ss:$8 sps:$4 sm:$0xff]  }
 0x4f6   : > { %v1854_v7 = vmul.f32 1.442695, %v1847_v62  ;;  %v1856_v10 = vsel %vm1831_vm1, %v5978_v4, 0.0  ;;  %v5755_v62 = vld [vmem:[#allocation12 + $0xf4] ss:$8 sps:$4 sm:$0xff]  }
 0x4f7   : > { %1857 = vadd.xlane.f32.xlu0 %v1856_v10  ;;  %v5756_v10 = vld [vmem:[#allocation12 + $0xe0] ss:$8 sps:$4 sm:$0xff]  }
 0x4f8   : > { %5991 = vpow2.f32 %v1854_v7  ;;  %v5758_v7 = vld [vmem:[#allocation12 + $0xe4] ss:$8 sps:$4 sm:$0xff]  }
 0x4f9   : > { %v5980_v9 = vpop.eup %5979 }
 0x4fa   : > { %v5982_v12 = vpop.eup %5981  ;;  %v1859_v13 = vsel %vm1831_vm1, %v5980_v9, 0.0 }
 0x4fb   : > { %v2030_v14 = vsel %vm1831_vm1, %v5982_v12, 0.0  ;;  %1860 = vadd.xlane.f32.xlu1 %v1859_v13  ;;  %v5764_v13 = vld [vmem:[#allocation12 + $0xc4] ss:$8 sps:$4 sm:$0xff]  }
 0x4fc   : > { %2031 = vadd.xlane.f32.xlu0 %v2030_v14  ;;  %v5762_v14 = vld [vmem:[#allocation12 + $0xc0] ss:$8 sps:$4 sm:$0xff]  }
 0x4fd   : > { %v5984_v15 = vpop.eup %5983 }
 0x4fe   : > { %v5986_v5 = vpop.eup %5985  ;;  %v2024_v11 = vsel %vm1831_vm1, %v5984_v15, 0.0 }
 0x4ff   : > { %v2033_v16 = vsel %vm1831_vm1, %v5986_v5, 0.0 }
 0x500   : > { %2025 = vadd.xlane.f32.xlu0 %v2024_v11  ;;  %2034 = vadd.xlane.f32.xlu1 %v2033_v16  ;;  %v5770_v11 = vld [vmem:[#allocation12 + $0xa4] ss:$8 sps:$4 sm:$0xff]   ;;  %v5768_v16 = vld [vmem:[#allocation12 + $0xa0] ss:$8 sps:$4 sm:$0xff]  }
 0x501   : > { %v5988_v6 = vpop.eup %5987 }
 0x502   : > { %v5990_v8 = vpop.eup %5989  ;;  %v1862_v52 = vsel %vm1831_vm1, %v5988_v6, 0.0 }
 0x503   : > { %v2027_v17 = vsel %vm1831_vm1, %v5990_v8, 0.0 }
 0x504   : > { %1863 = vadd.xlane.f32.xlu0 %v1862_v52  ;;  %2028 = vadd.xlane.f32.xlu1 %v2027_v17  ;;  %v5776_v52 = vld [vmem:[#allocation12 + $0x84] ss:$8 sps:$4 sm:$0xff]   ;;  %v5774_v17 = vld [vmem:[#allocation12 + $0x80] ss:$8 sps:$4 sm:$0xff]  }
 0x505   : > { %v5992_v54 = vpop.eup %5991 }
 0x506   : > { %v1865_v49 = vsel %vm1831_vm1, %v5992_v54, 0.0 }
 0x508   : > { %1866 = vadd.xlane.f32.xlu1 %v1865_v49 }
 0x580   : > { %v1858_v37 = vpop.xlane.xlu0 %1857 }
 0x581   : > { %5993 = vrcp.f32 %v1858_v37 }
 0x584   : > { %v1861_v40 = vpop.xlane.xlu1 %1860 }
 0x585   : > { %v2032_v18 = vpop.xlane.xlu0 %2031  ;;  %5995 = vrcp.f32 %v1861_v40 }
 0x589   : > { %v2026_v19 = vpop.xlane.xlu0 %2025  ;;  %v2035_v20 = vpop.xlane.xlu1 %2034 }
 0x58a   : > { %5997 = vrcp.f32 %v2035_v20 }
 0x58b   : > { %5999 = vrcp.f32 %v2026_v19 }
 0x58c   : > { %6001 = vrcp.f32 %v2032_v18 }
 0x58d   : > { %v1864_v21 = vpop.xlane.xlu0 %1863  ;;  %v2029_v51 = vpop.xlane.xlu1 %2028 }
 0x58e   : > { %6003 = vrcp.f32 %v2029_v51  ;;  %v5994_v24 = vpop.eup %5993 }
 0x58f   : > { %6005 = vrcp.f32 %v1864_v21  ;;  %v1872_v23 = vmul.f32 %v5994_v24, %v5978_v4  ;;  %v5753_v4 = vld [vmem:[#allocation12 + $0xf0] ss:$8 sps:$4 sm:$0xff]  }
 0x591   : > { %v1867_v25 = vpop.xlane.xlu1 %1866 }
 0x592   : > { %v5996_v22 = vpop.eup %5995  ;;  %6007 = vrcp.f32 %v1867_v25 }
 0x593   : > { %v1873_v26 = vmul.f32 %v5996_v22, %v5980_v9  ;;  %v5761_v9 = vld [vmem:[#allocation12 + $0xd4] ss:$8 sps:$4 sm:$0xff]  }
 0x595   : > { %v1876_v27 = vpack.c.bf16 %v1873_v26, %v1872_v23  ;;  %v6081_v26 = vld [vmem:[%s6661_s13] sm:$0xff] }
 0x597   : > { %5390 = vmatprep.mubr.msk.bf16.mxu1 %vm1831_vm1, %v1876_v27  ;;  %v5998_v0 = vpop.eup %5997 }
 0x598   : > { %v6000_v63 = vpop.eup %5999  ;;  %v2043_v32 = vmul.f32 %v5998_v0, %v5986_v5  ;;  %v5765_v5 = vld [vmem:[#allocation12 + $0xb0] ss:$8 sps:$4 sm:$0xff]   ;;  %v6082_v0 = vld [vmem:[%s6661_s13 + $0x8] sm:$0xff] }
 0x599   : > { %v6002_v29 = vpop.eup %6001  ;;  %v2040_v58 = vmul.f32 %v6000_v63, %v5984_v15  ;;  %v5767_v15 = vld [vmem:[#allocation12 + $0xb4] ss:$8 sps:$4 sm:$0xff]  }
 0x59a   : > { %v2042_v3 = vmul.f32 %v6002_v29, %v5982_v12  ;;  %v5759_v12 = vld [vmem:[#allocation12 + $0xd0] ss:$8 sps:$4 sm:$0xff]  }
 0x59b   : > { %v6004_v30 = vpop.eup %6003 }
 0x59c   : > { %v6006_v33 = vpop.eup %6005  ;;  %v2041_v53 = vmul.f32 %v6004_v30, %v5990_v8  ;;  %v2045_v36 = vpack.c.bf16 %v2043_v32, %v2042_v3  ;;  %v5771_v8 = vld [vmem:[#allocation12 + $0x90] ss:$8 sps:$4 sm:$0xff]  }
 0x59d   : > { %v1874_v48 = vmul.f32 %v6006_v33, %v5988_v6  ;;  %v5773_v6 = vld [vmem:[#allocation12 + $0x94] ss:$8 sps:$4 sm:$0xff]  }
 0x59e   : > { %v2044_v47 = vpack.c.bf16 %v2041_v53, %v2040_v58  ;;  %v6083_v33 = vld [vmem:[%s6661_s13 + $0x10] sm:$0xff]  ;;  %v6084_v53 = vld [vmem:[%s6661_s13 + $0x18] sm:$0xff] }
 0x59f   : > { %v6008_v35 = vpop.eup %6007 }
 0x5a0   : > { %v1875_v50 = vmul.f32 %v6008_v35, %v5992_v54  ;;  %5406 = vmatprep.mubr.msk.bf16.mxu0 %vm1831_vm1, %v2044_v47 }
 0x5a1   : > { %5407 = vmatmul.mubr.msk.bf16.vlgmr.msra.gmra.mxu0 %vm1831_vm1, %v2045_v36 }
 0x5a2   : > { %v1877_v38 = vpack.c.bf16 %v1875_v50, %v1874_v48  ;;  %v6085_v48 = vld [vmem:[%s6661_s13 + $0x20] sm:$0xff] }
 0x5a4   : > { %5391 = vmatmul.mubr.msk.bf16.vlgmr.msra.gmra.mxu1 %vm1831_vm1, %v1877_v38 }
 0x5a5   : > { %2310 = vmatpush1.bf16.msra.mxu1 %v5729_v55  ;;  %v6086_v55 = vld [vmem:[%s6661_s13 + $0x28] sm:$0xff] }
 0x5a6   : > { %2311 = vmatprep.subr.bf16.mxu1 %v5734_v39 }
 0x5a9   : > { %2312 = vmatpush1.bf16.msra.mxu1 %v5732_v42 }
 0x5aa   : > { %2313 = vmatprep.subr.bf16.mxu1 %v5737_v43 }
 0x5ad   : > { %2314 = vmatpush1.bf16.msra.mxu1 %v5735_v41  ;;  %v6087_v41 = vld [vmem:[%s6661_s13 + $0x30] sm:$0xff] }
 0x5ae   : > { %2315 = vmatprep.subr.bf16.mxu1 %v5740_v28 }
 0x5b1   : > { %2316 = vmatpush1.bf16.msra.mxu1 %v5738_v44  ;;  %v6088_v44 = vld [vmem:[%s6661_s13 + $0x38] sm:$0xff]  ;;  %s6397_s13 = smov [#allocation17]  }
 0x5b2   : > { %2317 = vmatprep.subr.bf16.mxu1 %v5743_v45  ;;  %s6303_s8 = sshll.u32 %s6397_s13, 4  ;;  %s6304_s8 = int_to_ptr.vmem [resolvable:$false] %s6303_s8 }
 0x5b3   : > { %s6305_s9 = scalar_lea.vmem %s6304_s8, 2048  ;;  %p6306_p1 = scmp.lt.s32.totalorder %s7357_s3, %s6304_s8 }
 0x5b4   : > { %p6307_p3 = scmp.lt.s32.totalorder %s6305_s9, %s6299_s19 }
 0x5b5   : > { %2318 = vmatpush1.bf16.msra.mxu1 %v5741_v2 }
 0x5b6   : > { %2319 = vmatprep.subr.bf16.mxu1 %v5746_v56  ;;  %v2534_v56 = vld [vmem:[#allocation14 + $0x1c0] sm:$0xff]  ;;  %p6308_p4 = por %p6307_p3, %p6306_p1 }
 0x5b8   : > { %p6309_p8 = pnand %p6308_p4, %p6302_p13 }
 0x5b9   : > { %2320 = vmatpush1.bf16.msra.mxu1 %v5744_v34  ;;  %v2538_v34 = vld [vmem:[#allocation14 + $0x1e0] sm:$0xff] }
 0x5ba   : > { %2321 = vmatprep.subr.bf16.mxu1 %v5749_v57  ;;  %v2535_v57 = vld [vmem:[#allocation14 + $0x1c8] sm:$0xff] }
 0x5bd   : > { %2322 = vmatpush1.bf16.msra.mxu1 %v5747_v46  ;;  %v5155_v46 = vcombine.low %v2534_v56, %v2538_v34 }
 0x5be   : > { %2323 = vmatprep.subr.bf16.mxu1 %v5752_v1  ;;  %v5156_v1 = vcombine.high %v2534_v56, %v2538_v34  ;;  %v2478_v56 = vld [vmem:[#allocation14] sm:$0xff] }
 0x5bf   : > { %v2482_v34 = vld [vmem:[#allocation14 + $0x20] sm:$0xff] }
 0x5c0   : > { %3246 = vmatprep.subr.bf16.mxu0 %v5156_v1 }
 0x5c1   : > { %2324 = vmatpush1.bf16.msra.mxu1 %v5750_v59  ;;  %v2539_v59 = vld [vmem:[#allocation14 + $0x1e8] sm:$0xff]  ;;  %3247 = vmatpush1.bf16.msra.mxu0 %v5155_v46 }
 0x5c2   : > { %2325 = vmatprep.subr.bf16.mxu1 %v5755_v62  ;;  %v2526_v62 = vld [vmem:[#allocation14 + $0x180] sm:$0xff]  ;;  %v2483_v46 = vld [vmem:[#allocation14 + $0x28] sm:$0xff] }
 0x5c5   : > { %2326 = vmatpush2.bf16.msra.mxu1 %v5753_v4  ;;  %v2530_v4 = vld [vmem:[#allocation14 + $0x1a0] sm:$0xff] }
 0x5c6   : > { %2327 = vmatprep.subr.bf16.mxu1 %v5758_v7  ;;  %v5157_v7 = vcombine.low %v2535_v57, %v2539_v59 }
 0x5c9   : > { %2328 = vmatpush2.bf16.msra.mxu1 %v5756_v10  ;;  %v5158_v10 = vcombine.high %v2535_v57, %v2539_v59  ;;  %v2479_v57 = vld [vmem:[#allocation14 + $0x8] sm:$0xff] }
 0x5ca   : > { %2329 = vmatprep.subr.bf16.mxu1 %v5761_v9  ;;  %v5148_v9 = vcombine.high %v2526_v62, %v2530_v4 }
 0x5cc   : > { %3248 = vmatprep.subr.bf16.mxu0 %v5148_v9  ;;  %v2599_v9 = vld [vmem:[#allocation14 + $0x3c8] sm:$0xff] }
 0x5cd   : > { %2330 = vmatpush2.bf16.msra.mxu1 %v5759_v12  ;;  %v2527_v12 = vld [vmem:[#allocation14 + $0x188] sm:$0xff] }
 0x5ce   : > { %2331 = vmatprep.subr.bf16.mxu1 %v5764_v13  ;;  %v2531_v13 = vld [vmem:[#allocation14 + $0x1a8] sm:$0xff] }
 0x5d1   : > { %2332 = vmatpush2.bf16.msra.mxu1 %v5762_v14  ;;  %v2518_v14 = vld [vmem:[#allocation14 + $0x140] sm:$0xff] }
 0x5d2   : > { %2333 = vmatprep.subr.bf16.mxu1 %v5767_v15  ;;  %v5150_v15 = vcombine.high %v2527_v12, %v2531_v13 }
 0x5d5   : > { %2334 = vmatpush2.bf16.msra.mxu1 %v5765_v5  ;;  %v2522_v5 = vld [vmem:[#allocation14 + $0x160] sm:$0xff] }
 0x5d6   : > { %2335 = vmatprep.subr.bf16.mxu1 %v5770_v11  ;;  %v2519_v11 = vld [vmem:[#allocation14 + $0x148] sm:$0xff] }
 0x5d9   : > { %2336 = vmatpush2.bf16.msra.mxu1 %v5768_v16  ;;  %v2523_v16 = vld [vmem:[#allocation14 + $0x168] sm:$0xff] }
 0x5da   : > { %2337 = vmatprep.subr.bf16.mxu1 %v5773_v6  ;;  %v5147_v6 = vcombine.low %v2526_v62, %v2530_v4  ;;  %v5100_v62 = vcombine.high %v2478_v56, %v2482_v34  ;;  %v5102_v4 = vcombine.high %v2479_v57, %v2483_v46 }
 0x5dc   : > { %3249 = vmatpush1.bf16.msra.mxu0 %v5147_v6 }
 0x5dd   : > { %2338 = vmatpush2.bf16.msra.mxu1 %v5771_v8  ;;  %v5149_v8 = vcombine.low %v2527_v12, %v2531_v13  ;;  %v2603_v12 = vld [vmem:[#allocation14 + $0x3e8] sm:$0xff]  ;;  %v5099_v13 = vcombine.low %v2478_v56, %v2482_v34  ;;  %v2582_v56 = vld [vmem:[#allocation14 + $0x340] sm:$0xff] }
 0x5de   : > { %2339 = vmatprep.subr.bf16.mxu1 %v5776_v52  ;;  %v5140_v52 = vcombine.high %v2518_v14, %v2522_v5  ;;  %v2586_v34 = vld [vmem:[#allocation14 + $0x360] sm:$0xff] }
 0x5e0   : > { %3250 = vmatprep.subr.bf16.mxu0 %v5140_v52 }
 0x5e1   : > { %2340 = vmatpush2.bf16.msra.mxu1 %v5774_v17  ;;  %v5142_v17 = vcombine.high %v2519_v11, %v2523_v16 }
 0x5e2   : > { %3299 = vmatprep.subr.bf16.mxu1 %v5158_v10  ;;  %v2602_v10 = vld [vmem:[#allocation14 + $0x3e0] sm:$0xff] }
 0x661   : > { %v5408_v54 = vpop.f32.mrf.mxu0 }
 0x663   : > { %v2086_v49 = vpop.f32.mrf.mxu0 }
 0x664   : > { %v5392_v31 = vpop.f32.mrf.mxu1 }
 0x665   : > { %v5409_v37 = vpop.f32.mrf.mxu0 }
 0x666   : > { %v1918_v40 = vpop.f32.mrf.mxu1  ;;  %v2116_v24 = vpack.c.bf16 %v5409_v37, %v5408_v54  ;;  %v2510_v54 = vld [vmem:[#allocation14 + $0x100] sm:$0xff]  ;;  %v2515_v37 = vld [vmem:[#allocation14 + $0x128] sm:$0xff] }
 0x667   : > { %v2089_v18 = vpop.f32.mrf.mxu0 }
 0x668   : > { %v5393_v19 = vpop.f32.mrf.mxu1  ;;  %v2114_v20 = vpack.c.bf16 %v2089_v18, %v2086_v49  ;;  %v2514_v49 = vld [vmem:[#allocation14 + $0x120] sm:$0xff]  ;;  %v5141_v18 = vcombine.low %v2519_v11, %v2523_v16  ;;  %v5221_v16 = vcombine.low %v2599_v9, %v2603_v12 }
 0x669   : > { %v2115_v25 = vpack.c.bf16 %v5393_v19, %v5392_v31  ;;  %v2511_v31 = vld [vmem:[#allocation14 + $0x108] sm:$0xff]  ;;  %v5132_v19 = vcombine.high %v2510_v54, %v2514_v49 }
 0x66a   : > { %v1921_v21 = vpop.f32.mrf.mxu1  ;;  %2341 = vmatprep.mubr.bf16.mxu1 %v2114_v20  ;;  %v5134_v20 = vcombine.high %v2511_v31, %v2515_v37 }
 0x66b   : > { %v2113_v51 = vpack.c.bf16 %v1921_v21, %v1918_v40  ;;  %v5139_v40 = vcombine.low %v2518_v14, %v2522_v5  ;;  %v2502_v21 = vld [vmem:[#allocation14 + $0xc0] sm:$0xff]  ;;  %v5101_v14 = vcombine.low %v2479_v57, %v2483_v46  ;;  %v5222_v5 = vcombine.high %v2599_v9, %v2603_v12  ;;  %v2583_v57 = vld [vmem:[#allocation14 + $0x348] sm:$0xff] }
 0x66c   : > { %v5204_v46 = vcombine.high %v2582_v56, %v2586_v34  ;;  %v2575_v9 = vld [vmem:[#allocation14 + $0x308] sm:$0xff] }
 0x66d   : > { %2342 = vmatmul.mubr.bf16.vlgmr.msra.gmra.mxu1 %v2113_v51  ;;  %v2506_v51 = vld [vmem:[#allocation14 + $0xe0] sm:$0xff]  ;;  %3251 = vmatpush1.bf16.msra.mxu0 %v5139_v40 }
 0x66e   : > { %2351 = vmatprep.mubr.bf16.mxu1 %v2116_v24  ;;  %3300 = vmatpush1.bf16.msra.mxu1 %v5157_v7  ;;  %v2503_v24 = vld [vmem:[#allocation14 + $0xc8] sm:$0xff]  ;;  %v2598_v7 = vld [vmem:[#allocation14 + $0x3c0] sm:$0xff] }
 0x66f   : > { %3301 = vmatprep.subr.bf16.mxu1 %v5150_v15  ;;  %3252 = vmatprep.subr.bf16.mxu0 %v5132_v19  ;;  %v5220_v15 = vcombine.high %v2598_v7, %v2602_v10  ;;  %v5219_v11 = vcombine.low %v2598_v7, %v2602_v10  ;;  %v2574_v7 = vld [vmem:[#allocation14 + $0x300] sm:$0xff] }
 0x670   : > { %v2578_v10 = vld [vmem:[#allocation14 + $0x320] sm:$0xff] }
 0x671   : > { %v5196_v12 = vcombine.high %v2574_v7, %v2578_v10 }
 0x672   : > { %3302 = vmatpush1.bf16.msra.mxu1 %v5149_v8 }
 0x673   : > { %3303 = vmatprep.subr.bf16.mxu1 %v5142_v17 }
 0x675   : > { %2352 = vmatmul.mubr.bf16.gmra.mxu1 %v2115_v25  ;;  %v2507_v25 = vld [vmem:[#allocation14 + $0xe8] sm:$0xff] }
 0x676   : > { %3304 = vmatpush1.bf16.msra.mxu1 %v5141_v18 }
 0x677   : > { %3305 = vmatprep.subr.bf16.mxu1 %v5134_v20 }
 0x72d   : > { %v2343_v22 = vpop.f32.mrf.mxu1 }
 0x72e   : > { %v6981_v27 = vadd.f32 %v6081_v26, %v2343_v22  ;;  %v5131_v22 = vcombine.low %v2510_v54, %v2514_v49  ;;  %v5124_v26 = vcombine.high %v2502_v21, %v2506_v51 }
 0x72f   : > { %v2345_v23 = vpop.f32.mrf.mxu1 }
 0x730   : > { %v6984_v63 = vadd.f32 %v6082_v0, %v2345_v23  ;;  %v5133_v23 = vcombine.low %v2511_v31, %v2515_v37  ;;  %v5126_v0 = vcombine.high %v2503_v24, %v2507_v25  ;;  %3253 = vmatpush1.bf16.msra.mxu0 %v5131_v22 }
 0x731   : > { %v2347_v29 = vpop.f32.mrf.mxu1  ;;  %3254 = vmatprep.subr.bf16.mxu0 %v5124_v26 }
 0x732   : > { %v2370_v30 = vadd.f32 %v6984_v63, %v6981_v27  ;;  %v6989_v58 = vadd.f32 %v6083_v33, %v2347_v29  ;;  %v2494_v29 = vld [vmem:[#allocation14 + $0x80] sm:$0xff]  ;;  %v2499_v33 = vld [vmem:[#allocation14 + $0xa8] sm:$0xff]  ;;  %3306 = vmatpush1.bf16.msra.mxu1 %v5133_v23 }
 0x733   : > { %v2349_v32 = vpop.f32.mrf.mxu1  ;;  %3307 = vmatprep.subr.bf16.mxu1 %v5126_v0 }
 0x734   : > { %v6992_v3 = vadd.f32 %v6084_v53, %v2349_v32  ;;  %2371 = vadd.xlane.f32.xlu0 %v2370_v30  ;;  %v2498_v30 = vld [vmem:[#allocation14 + $0xa0] sm:$0xff]  ;;  %v2495_v32 = vld [vmem:[#allocation14 + $0x88] sm:$0xff]  ;;  %v5123_v53 = vcombine.low %v2502_v21, %v2506_v51 }
 0x735   : > { %v2353_v35 = vpop.f32.mrf.mxu1 }
 0x736   : > { %v2373_v47 = vadd.f32 %v6992_v3, %v6989_v58  ;;  %v6997_v50 = vadd.f32 %v6085_v48, %v2353_v35  ;;  %v5125_v35 = vcombine.low %v2503_v24, %v2507_v25  ;;  %v2486_v48 = vld [vmem:[#allocation14 + $0x40] sm:$0xff]  ;;  %3255 = vmatpush1.bf16.msra.mxu0 %v5123_v53 }
 0x737   : > { %v2355_v36 = vpop.f32.mrf.mxu1 }
 0x738   : > { %v7000_v38 = vadd.f32 %v6086_v55, %v2355_v36  ;;  %2374 = vadd.xlane.f32.xlu1 %v2373_v47  ;;  %v5116_v47 = vcombine.high %v2494_v29, %v2498_v30  ;;  %v5118_v36 = vcombine.high %v2495_v32, %v2499_v33  ;;  %v2490_v55 = vld [vmem:[#allocation14 + $0x60] sm:$0xff]  ;;  %3308 = vmatpush1.bf16.msra.mxu1 %v5125_v35 }
 0x739   : > { %v2357_v39 = vpop.f32.mrf.mxu1  ;;  %v5107_v1 = vcombine.low %v2486_v48, %v2490_v55 }
 0x73a   : > { %v2376_v42 = vadd.f32 %v7000_v38, %v6997_v50  ;;  %v7005_v28 = vadd.f32 %v6087_v41, %v2357_v39  ;;  %v2487_v39 = vld [vmem:[#allocation14 + $0x48] sm:$0xff]  ;;  %3256 = vmatprep.subr.bf16.mxu0 %v5116_v47  ;;  %v5117_v41 = vcombine.low %v2495_v32, %v2499_v33  ;;  %3309 = vmatprep.subr.bf16.mxu1 %v5118_v36 }
 0x73b   : > { %v2359_v43 = vpop.f32.mrf.mxu1 }
 0x73c   : > { %v7008_v45 = vadd.f32 %v6088_v44, %v2359_v43  ;;  %2377 = vadd.xlane.f32.xlu0 %v2376_v42  ;;  %v2491_v42 = vld [vmem:[#allocation14 + $0x68] sm:$0xff]  ;;  %v5115_v43 = vcombine.low %v2494_v29, %v2498_v30  ;;  %v5108_v44 = vcombine.high %v2486_v48, %v2490_v55  ;;  %3310 = vmatpush1.bf16.msra.mxu1 %v5117_v41  ;;  %v2590_v48 = vld [vmem:[#allocation14 + $0x380] sm:$0xff] }
 0x73d   : > { %v5109_v59 = vcombine.low %v2487_v39, %v2491_v42  ;;  %v2594_v55 = vld [vmem:[#allocation14 + $0x3a0] sm:$0xff] }
 0x73e   : > { %v2379_v2 = vadd.f32 %v7008_v45, %v7005_v28  ;;  %3257 = vmatpush1.bf16.msra.mxu0 %v5115_v43  ;;  %v2595_v43 = vld [vmem:[#allocation14 + $0x3a8] sm:$0xff]  ;;  %v5211_v41 = vcombine.low %v2590_v48, %v2594_v55 }
 0x73f   : > { %3258 = vmatprep.subr.bf16.mxu0 %v5108_v44 }
 0x740   : > { %2380 = vadd.xlane.f32.xlu1 %v2379_v2  ;;  %v5110_v2 = vcombine.high %v2487_v39, %v2491_v42  ;;  %v2591_v39 = vld [vmem:[#allocation14 + $0x388] sm:$0xff]  ;;  %v5212_v42 = vcombine.high %v2590_v48, %v2594_v55  ;;  %v2546_v55 = vld [vmem:[#allocation14 + $0x220] sm:$0xff] }
 0x741   : > { %v5213_v44 = vcombine.low %v2591_v39, %v2595_v43 }
 0x742   : > { %3311 = vmatprep.subr.bf16.mxu1 %v5110_v2  ;;  %3259 = vmatpush1.bf16.msra.mxu0 %v5107_v1  ;;  %v5214_v2 = vcombine.high %v2591_v39, %v2595_v43  ;;  %v2587_v1 = vld [vmem:[#allocation14 + $0x368] sm:$0xff] }
 0x743   : > { %3312 = vmatpush1.bf16.msra.mxu1 %v5109_v59  ;;  %3260 = vmatprep.subr.bf16.mxu0 %v5100_v62  ;;  %v5203_v59 = vcombine.low %v2582_v56, %v2586_v34  ;;  %v5205_v62 = vcombine.low %v2583_v57, %v2587_v1  ;;  %v2543_v39 = vld [vmem:[#allocation14 + $0x208] sm:$0xff] }
 0x744   : > { %3313 = vmatprep.subr.bf16.mxu1 %v5102_v4  ;;  %v5206_v4 = vcombine.high %v2583_v57, %v2587_v1  ;;  %v7052_v57 = vld [vmem:[#allocation14 + $0x1d0] sm:$0xff]  ;;  %v7056_v1 = vld [vmem:[#allocation14 + $0x1d8] sm:$0xff] }
 0x746   : > { %3261 = vmatpush1.bf16.msra.mxu0 %v5099_v13  ;;  %v2579_v13 = vld [vmem:[#allocation14 + $0x328] sm:$0xff] }
 0x747   : > { %3314 = vmatpush1.bf16.msra.mxu1 %v5101_v14  ;;  %3262 = vmatprep.subr.bf16.mxu0 %v5220_v15  ;;  %v5195_v14 = vcombine.low %v2574_v7, %v2578_v10  ;;  %v5197_v15 = vcombine.low %v2575_v9, %v2579_v13 }
 0x748   : > { %3315 = vmatprep.subr.bf16.mxu1 %v5222_v5  ;;  %v5198_v5 = vcombine.high %v2575_v9, %v2579_v13 }
 0x74a   : > { %3263 = vmatpush2.bf16.msra.mxu0 %v5219_v11  ;;  %v2566_v11 = vld [vmem:[#allocation14 + $0x2c0] sm:$0xff] }
 0x74b   : > { %3316 = vmatpush2.bf16.msra.mxu1 %v5221_v16  ;;  %3264 = vmatprep.subr.bf16.mxu0 %v5212_v42  ;;  %v2570_v16 = vld [vmem:[#allocation14 + $0x2e0] sm:$0xff]  ;;  %v2547_v42 = vld [vmem:[#allocation14 + $0x228] sm:$0xff] }
 0x74c   : > { %3317 = vmatprep.subr.bf16.mxu1 %v5214_v2  ;;  %v5166_v2 = vcombine.high %v2543_v39, %v2547_v42  ;;  %v5165_v34 = vcombine.low %v2543_v39, %v2547_v42  ;;  %v2528_v39 = vld [vmem:[#allocation14 + $0x190] sm:$0xff] }
 0x74e   : > { %3265 = vmatpush2.bf16.msra.mxu0 %v5211_v41 }
 0x74f   : > { %3318 = vmatpush2.bf16.msra.mxu1 %v5213_v44  ;;  %3266 = vmatprep.subr.bf16.mxu0 %v5204_v46  ;;  %v7054_v46 = vld [vmem:[#allocation14 + $0x1f0] sm:$0xff] }
 0x750   : > { %3319 = vmatprep.subr.bf16.mxu1 %v5206_v4  ;;  %v5159_v4 = vcombine.low %v7052_v57, %v7054_v46 }
 0x752   : > { %3267 = vmatpush2.bf16.msra.mxu0 %v5203_v59  ;;  %v5160_v59 = vcombine.high %v7052_v57, %v7054_v46  ;;  %v2513_v57 = vld [vmem:[#allocation14 + $0x118] sm:$0xff] }
 0x753   : > { %3320 = vmatpush2.bf16.msra.mxu1 %v5205_v62  ;;  %3268 = vmatprep.subr.bf16.mxu0 %v5196_v12  ;;  %v7060_v62 = vld [vmem:[#allocation14 + $0x1f8] sm:$0xff] }
 0x754   : > { %3321 = vmatprep.subr.bf16.mxu1 %v5198_v5  ;;  %v5161_v7 = vcombine.low %v7056_v1, %v7060_v62  ;;  %v5162_v10 = vcombine.high %v7056_v1, %v7060_v62  ;;  %v2517_v46 = vld [vmem:[#allocation14 + $0x138] sm:$0xff] }
 0x756   : > { %3269 = vmatpush2.bf16.msra.mxu0 %v5195_v14 }
 0x757   : > { %3322 = vmatpush2.bf16.msra.mxu1 %v5197_v15 }
 0x7bd   : > { %v2372_v6 = vpop.xlane.xlu0 %2371 }
 0x7be   : > { %v2382_v8 = vmul.f32 0.00390625, %v2372_v6  ;;  %v2567_v6 = vld [vmem:[#allocation14 + $0x2c8] sm:$0xff] }
 0x7c0   : > { %v7013_v52 = vsub.f32 %v6981_v27, %v2382_v8  ;;  %v7016_v17 = vsub.f32 %v6984_v63, %v2382_v8  ;;  %v5188_v8 = vcombine.high %v2566_v11, %v2570_v16 }
 0x7c1   : > { %v2375_v54 = vpop.xlane.xlu1 %2374 }
 0x7c2   : > { %v2383_v49 = vmul.f32 0.00390625, %v2375_v54  ;;  %v2394_v31 = vmul.f32 %v7013_v52, %v7013_v52  ;;  %v2395_v37 = vmul.f32 %v7016_v17, %v7016_v17  ;;  %v2571_v54 = vld [vmem:[#allocation14 + $0x2e8] sm:$0xff]  ;;  %3270 = vmatprep.subr.bf16.mxu0 %v5188_v8 }
 0x7c4   : > { %v7023_v40 = vsub.f32 %v6989_v58, %v2383_v49  ;;  %v7026_v18 = vsub.f32 %v6992_v3, %v2383_v49  ;;  %v2402_v19 = vadd.f32 %v2395_v37, %v2394_v31  ;;  %v5187_v49 = vcombine.low %v2566_v11, %v2570_v16 }
 0x7c5   : > { %v2378_v20 = vpop.xlane.xlu0 %2377  ;;  %v5189_v31 = vcombine.low %v2567_v6, %v2571_v54  ;;  %v5190_v37 = vcombine.high %v2567_v6, %v2571_v54 }
 0x7c6   : > { %v2384_v21 = vmul.f32 0.00390625, %v2378_v20  ;;  %2403 = vadd.xlane.f32.xlu0 %v2402_v19  ;;  %v2396_v51 = vmul.f32 %v7023_v40, %v7023_v40  ;;  %v2397_v24 = vmul.f32 %v7026_v18, %v7026_v18  ;;  %3271 = vmatpush2.bf16.msra.mxu0 %v5187_v49  ;;  %v2558_v19 = vld [vmem:[#allocation14 + $0x280] sm:$0xff] }
 0x7c7   : > { %3323 = vmatprep.subr.bf16.mxu1 %v5190_v37  ;;  %v2562_v20 = vld [vmem:[#allocation14 + $0x2a0] sm:$0xff] }
 0x7c8   : > { %v7033_v25 = vsub.f32 %v6997_v50, %v2384_v21  ;;  %v7036_v22 = vsub.f32 %v7000_v38, %v2384_v21  ;;  %v2405_v23 = vadd.f32 %v2397_v24, %v2396_v51  ;;  %v2559_v21 = vld [vmem:[#allocation14 + $0x288] sm:$0xff]  ;;  %3324 = vmatpush2.bf16.msra.mxu1 %v5189_v31  ;;  %v5179_v51 = vcombine.low %v2558_v19, %v2562_v20  ;;  %v2434_v31 = vld [vmem:[%s7416_s6] sm:$0x3] }
 0x7c9   : > { %v2381_v26 = vpop.xlane.xlu1 %2380  ;;  %v5180_v24 = vcombine.high %v2558_v19, %v2562_v20  ;;  %v2443_v19 = vrot.slane %v2434_v31, %v6762_v60  ;;  %v2439_v20 = vrot.slane %v2434_v31, %v6765_v61  ;;  %v2512_v31 = vld [vmem:[#allocation14 + $0x110] sm:$0xff] }
 0x7ca   : > { %v2385_v0 = vmul.f32 0.00390625, %v2381_v26  ;;  %2406 = vadd.xlane.f32.xlu1 %v2405_v23  ;;  %v2398_v29 = vmul.f32 %v7033_v25, %v7033_v25  ;;  %v2399_v30 = vmul.f32 %v7036_v22, %v7036_v22  ;;  %v2563_v23 = vld [vmem:[#allocation14 + $0x2a8] sm:$0xff]  ;;  %v2550_v26 = vld [vmem:[#allocation14 + $0x240] sm:$0xff] }
 0x7cb   : > { %3272 = vmatprep.subr.bf16.mxu0 %v5180_v24 }
 0x7cc   : > { %v7043_v32 = vsub.f32 %v7005_v28, %v2385_v0  ;;  %v7046_v33 = vsub.f32 %v7008_v45, %v2385_v0  ;;  %v2408_v53 = vadd.f32 %v2399_v30, %v2398_v29  ;;  %v2554_v0 = vld [vmem:[#allocation14 + $0x260] sm:$0xff]  ;;  %v5181_v29 = vcombine.low %v2559_v21, %v2563_v23  ;;  %3273 = vmatpush2.bf16.msra.mxu0 %v5179_v51 }
 0x7cd   : > { %v5182_v30 = vcombine.high %v2559_v21, %v2563_v23  ;;  %v5171_v43 = vcombine.low %v2550_v26, %v2554_v0  ;;  %v2454_v51 = vld [vmem:[%s7417_s7] sm:$0x3] }
 0x7ce   : > { %2409 = vadd.xlane.f32.xlu0 %v2408_v53  ;;  %v2400_v35 = vmul.f32 %v7043_v32, %v7043_v32  ;;  %v2401_v47 = vmul.f32 %v7046_v33, %v7046_v33  ;;  %v5172_v53 = vcombine.high %v2550_v26, %v2554_v0  ;;  %v2463_v0 = vrot.slane %v2454_v51, %v6762_v60 }
 0x7cf   : > { %3325 = vmatprep.subr.bf16.mxu1 %v5182_v30  ;;  %v2459_v30 = vrot.slane %v2454_v51, %v6765_v61  ;;  %v2508_v51 = vld [vmem:[#allocation14 + $0xf0] sm:$0xff] }
 0x7d0   : > { %v2411_v36 = vadd.f32 %v2401_v47, %v2400_v35  ;;  %v2551_v35 = vld [vmem:[#allocation14 + $0x248] sm:$0xff]  ;;  %3326 = vmatpush2.bf16.msra.mxu1 %v5181_v29  ;;  %3274 = vmatprep.subr.bf16.mxu0 %v5172_v53 }
 0x7d1   : > { %v2555_v47 = vld [vmem:[#allocation14 + $0x268] sm:$0xff]  ;;  %3275 = vmatpush2.bf16.msra.mxu0 %v5171_v43 }
 0x7d2   : > { %2412 = vadd.xlane.f32.xlu1 %v2411_v36  ;;  %v2542_v36 = vld [vmem:[#allocation14 + $0x200] sm:$0xff]  ;;  %v5174_v48 = vcombine.high %v2551_v35, %v2555_v47  ;;  %v5173_v41 = vcombine.low %v2551_v35, %v2555_v47 }
 0x7d3   : > { %v5164_v44 = vcombine.high %v2542_v36, %v2546_v55  ;;  %v5163_v56 = vcombine.low %v2542_v36, %v2546_v55 }
 0x7d4   : > { %3327 = vmatprep.subr.bf16.mxu1 %v5174_v48 }
 0x7d5   : > { %3328 = vmatpush2.bf16.msra.mxu1 %v5173_v41  ;;  %3276 = vmatprep.subr.bf16.mxu0 %v5164_v44  ;;  %v2529_v41 = vld [vmem:[#allocation14 + $0x198] sm:$0xff] }
 0x7d6   : > { %3329 = vmatprep.subr.bf16.mxu1 %v5166_v2  ;;  %3277 = vmatpush2.bf16.msra.mxu0 %v5163_v56  ;;  %v2533_v44 = vld [vmem:[#allocation14 + $0x1b8] sm:$0xff] }
 0x7d7   : > { %3352 = vmatprep.subr.bf16.mxu0 %v5160_v59 }
 0x7d9   : > { %3330 = vmatpush2.bf16.msra.mxu1 %v5165_v34  ;;  %v5154_v34 = vcombine.high %v2529_v41, %v2533_v44 }
 0x7da   : > { %3405 = vmatprep.subr.bf16.mxu1 %v5162_v10  ;;  %v2520_v10 = vld [vmem:[#allocation14 + $0x150] sm:$0xff] }
 0x84f   : > { %v2404_v9 = vpop.xlane.xlu0 %2403 }
 0x850   : > { %v2414_v12 = vmul.f32 0.00390625, %v2404_v9 }
 0x852   : > { %v2418_v13 = vadd.f32 1e-05, %v2414_v12  ;;  %v2524_v12 = vld [vmem:[#allocation14 + $0x170] sm:$0xff] }
 0x853   : > { %v2407_v14 = vpop.xlane.xlu1 %2406 }
 0x854   : > { %6009 = vrsqrt.f32 %v2418_v13  ;;  %v2415_v15 = vmul.f32 0.00390625, %v2407_v14  ;;  %v2521_v13 = vld [vmem:[#allocation14 + $0x158] sm:$0xff] }
 0x855   : > { %v2525_v14 = vld [vmem:[#allocation14 + $0x178] sm:$0xff] }
 0x856   : > { %v2419_v5 = vadd.f32 1e-05, %v2415_v15  ;;  %v5145_v62 = vcombine.low %v2521_v13, %v2525_v14 }
 0x857   : > { %v2410_v11 = vpop.xlane.xlu0 %2409 }
 0x858   : > { %6011 = vrsqrt.f32 %v2419_v5  ;;  %v2416_v16 = vmul.f32 0.00390625, %v2410_v11 }
 0x85a   : > { %v2420_v6 = vadd.f32 1e-05, %v2416_v16  ;;  %v5146_v16 = vcombine.high %v2521_v13, %v2525_v14  ;;  %v2600_v14 = vld [vmem:[#allocation14 + $0x3d0] sm:$0xff] }
 0x85b   : > { %v2413_v8 = vpop.xlane.xlu1 %2412 }
 0x85c   : > { %6013 = vrsqrt.f32 %v2420_v6  ;;  %v2417_v54 = vmul.f32 0.00390625, %v2413_v8 }
 0x85e   : > { %v2421_v49 = vadd.f32 1e-05, %v2417_v54 }
 0x860   : > { %6015 = vrsqrt.f32 %v2421_v49 }
 0x861   : > { %v6010_v37 = vpop.eup %6009 }
 0x862   : > { %v2427_v21 = vmul.f32 %v6010_v37, %v7016_v17  ;;  %v2426_v24 = vmul.f32 %v6010_v37, %v7013_v52  ;;  %v2532_v52 = vld [vmem:[#allocation14 + $0x1b0] sm:$0xff]  ;;  %v5143_v37 = vcombine.low %v2520_v10, %v2524_v12 }
 0x864   : > { %v2447_v26 = vmul.f32 %v2443_v19, %v2427_v21  ;;  %v2446_v29 = vmul.f32 %v2439_v20, %v2426_v24  ;;  %v2516_v21 = vld [vmem:[#allocation14 + $0x130] sm:$0xff]  ;;  %v2505_v24 = vld [vmem:[#allocation14 + $0xd8] sm:$0xff] }
 0x865   : > { %v6012_v23 = vpop.eup %6011 }
 0x866   : > { %v2429_v53 = vmul.f32 %v6012_v23, %v7026_v18  ;;  %v2428_v35 = vmul.f32 %v6012_v23, %v7023_v40  ;;  %v2467_v48 = vadd.f32 %v2463_v0, %v2447_v26  ;;  %v2466_v55 = vadd.f32 %v2459_v30, %v2446_v29  ;;  %v2509_v23 = vld [vmem:[#allocation14 + $0xf8] sm:$0xff] }
 0x867   : > { %v5152_v40 = vcombine.high %v2528_v39, %v2532_v52  ;;  %v5135_v26 = vcombine.low %v2512_v31, %v2516_v21 }
 0x868   : > { %v2449_v47 = vmul.f32 %v2443_v19, %v2429_v53  ;;  %v2448_v36 = vmul.f32 %v2439_v20, %v2428_v35  ;;  %v2496_v53 = vld [vmem:[#allocation14 + $0x90] sm:$0xff] }
 0x869   : > { %v6014_v17 = vpop.eup %6013  ;;  %v2500_v35 = vld [vmem:[#allocation14 + $0xb0] sm:$0xff] }
 0x86a   : > { %v2469_v42 = vadd.f32 %v2463_v0, %v2449_v47  ;;  %v2468_v43 = vadd.f32 %v2459_v30, %v2448_v36  ;;  %v2431_v60 = vmul.f32 %v6014_v17, %v7036_v22  ;;  %v2430_v2 = vmul.f32 %v6014_v17, %v7033_v25  ;;  %v2497_v47 = vld [vmem:[#allocation14 + $0x98] sm:$0xff] }
 0x86b   : > { %v5151_v25 = vcombine.low %v2528_v39, %v2532_v52  ;;  %v2501_v36 = vld [vmem:[#allocation14 + $0xb8] sm:$0xff] }
 0x86c   : > { %v2475_v61 = vpack.c.bf16 %v2469_v42, %v2467_v48  ;;  %v7084_v56 = vpack.c.bf16 %v2468_v43, %v2466_v55  ;;  %v2451_v59 = vmul.f32 %v2443_v19, %v2431_v60  ;;  %v2450_v22 = vmul.f32 %v2439_v20, %v2430_v2  ;;  %v2488_v42 = vld [vmem:[#allocation14 + $0x50] sm:$0xff]  ;;  %v2489_v52 = vld [vmem:[#allocation14 + $0x58] sm:$0xff] }
 0x86d   : > { %v6016_v18 = vpop.eup %6015  ;;  %v5129_v48 = vcombine.low %v2505_v24, %v2509_v23  ;;  %v5120_v55 = vcombine.high %v2496_v53, %v2500_v35  ;;  %v5122_v39 = vcombine.high %v2497_v47, %v2501_v36  ;;  %v2492_v43 = vld [vmem:[#allocation14 + $0x70] sm:$0xff]  ;;  %v5121_v60 = vcombine.low %v2497_v47, %v2501_v36 }
 0x86e   : > { %3278 = vmatprep.mubr.bf16.mxu0 %v2475_v61  ;;  %3331 = vmatprep.mubr.bf16.mxu1 %v2475_v61  ;;  %v2433_v9 = vmul.f32 %v6016_v18, %v7046_v33  ;;  %v2432_v15 = vmul.f32 %v6016_v18, %v7043_v32  ;;  %v5153_v33 = vcombine.low %v2529_v41, %v2533_v44  ;;  %v2493_v41 = vld [vmem:[#allocation14 + $0x78] sm:$0xff]  ;;  %v2480_v18 = vld [vmem:[#allocation14 + $0x10] sm:$0xff] }
 0x86f   : > { %3279 = vmatmul.mubr.bf16.vlgmr.msra.gmra.mxu0 %v7084_v56  ;;  %3332 = vmatmul.mubr.bf16.vlgmr.msra.gmra.mxu1 %v7084_v56  ;;  %v5144_v32 = vcombine.high %v2520_v10, %v2524_v12  ;;  %v2471_v6 = vadd.f32 %v2463_v0, %v2451_v59  ;;  %v2470_v54 = vadd.f32 %v2459_v30, %v2450_v22  ;;  %v2485_v59 = vld [vmem:[#allocation14 + $0x38] sm:$0xff]  ;;  %v2568_v36 = vld [vmem:[#allocation14 + $0x2d0] sm:$0xff] }
 0x870   : > { %3353 = vmatpush1.bf16.msra.mxu0 %v5159_v4  ;;  %3406 = vmatpush1.bf16.msra.mxu1 %v5161_v7  ;;  %v2453_v5 = vmul.f32 %v2443_v19, %v2433_v9  ;;  %v2452_v11 = vmul.f32 %v2439_v20, %v2432_v15  ;;  %v2504_v7 = vld [vmem:[#allocation14 + $0xd0] sm:$0xff]  ;;  %v5136_v19 = vcombine.high %v2512_v31, %v2516_v21  ;;  %v2601_v22 = vld [vmem:[#allocation14 + $0x3d8] sm:$0xff] }
 0x871   : > { %3354 = vmatprep.subr.bf16.mxu0 %v5152_v40  ;;  %3407 = vmatprep.subr.bf16.mxu1 %v5154_v34  ;;  %v5138_v20 = vcombine.high %v2513_v57, %v2517_v46  ;;  %v5128_v29 = vcombine.high %v2504_v7, %v2508_v51  ;;  %v5127_v17 = vcombine.low %v2504_v7, %v2508_v51  ;;  %v2484_v40 = vld [vmem:[#allocation14 + $0x30] sm:$0xff]  ;;  %v2481_v34 = vld [vmem:[#allocation14 + $0x18] sm:$0xff] }
 0x872   : > { %v2473_v8 = vadd.f32 %v2463_v0, %v2453_v5  ;;  %v2472_v49 = vadd.f32 %v2459_v30, %v2452_v11  ;;  %v5137_v0 = vcombine.low %v2513_v57, %v2517_v46  ;;  %v5130_v30 = vcombine.high %v2505_v24, %v2509_v23  ;;  %v2604_v15 = vld [vmem:[#allocation14 + $0x3f0] sm:$0xff]  ;;  %v2589_v7 = vld [vmem:[#allocation14 + $0x378] sm:$0xff] }
 0x873   : > { %v5119_v44 = vcombine.low %v2496_v53, %v2500_v35  ;;  %v5112_v2 = vcombine.high %v2488_v42, %v2492_v43  ;;  %v5111_v10 = vcombine.low %v2488_v42, %v2492_v43  ;;  %v5113_v9 = vcombine.low %v2489_v52, %v2493_v41  ;;  %v2584_v57 = vld [vmem:[#allocation14 + $0x350] sm:$0xff] }
 0x874   : > { %3355 = vmatpush1.bf16.msra.mxu0 %v5151_v25  ;;  %3408 = vmatpush1.bf16.msra.mxu1 %v5153_v33  ;;  %v7096_v1 = vpack.c.bf16 %v2473_v8, %v2471_v6  ;;  %v7098_v4 = vpack.c.bf16 %v2472_v49, %v2470_v54  ;;  %v5104_v12 = vcombine.high %v2480_v18, %v2484_v40  ;;  %v2605_v25 = vld [vmem:[#allocation14 + $0x3f8] sm:$0xff]  ;;  %v2596_v6 = vld [vmem:[#allocation14 + $0x3b0] sm:$0xff] }
 0x875   : > { %3356 = vmatprep.subr.bf16.mxu0 %v5144_v32  ;;  %3409 = vmatprep.subr.bf16.mxu1 %v5146_v16  ;;  %v5106_v13 = vcombine.high %v2481_v34, %v2485_v59  ;;  %v5103_v33 = vcombine.low %v2480_v18, %v2484_v40  ;;  %v5105_v5 = vcombine.low %v2481_v34, %v2485_v59  ;;  %v2592_v16 = vld [vmem:[#allocation14 + $0x390] sm:$0xff]  ;;  %v2593_v8 = vld [vmem:[#allocation14 + $0x398] sm:$0xff] }
 0x876   : > { %3288 = vmatprep.mubr.bf16.mxu0 %v7096_v1  ;;  %3341 = vmatprep.mubr.bf16.mxu1 %v7096_v1  ;;  %v5224_v11 = vcombine.high %v2600_v14, %v2604_v15  ;;  %v5226_v32 = vcombine.high %v2601_v22, %v2605_v25  ;;  %v2597_v54 = vld [vmem:[#allocation14 + $0x3b8] sm:$0xff]  ;;  %v5223_v49 = vcombine.low %v2600_v14, %v2604_v15  ;;  %v2588_v46 = vld [vmem:[#allocation14 + $0x370] sm:$0xff] }
 0x877   : > { %3289 = vmatmul.mubr.bf16.gmra.mxu0 %v7098_v4  ;;  %3342 = vmatmul.mubr.bf16.gmra.mxu1 %v7098_v4  ;;  %v5225_v31 = vcombine.low %v2601_v22, %v2605_v25  ;;  %v5218_v21 = vcombine.high %v2593_v8, %v2597_v54  ;;  %v5208_v51 = vcombine.high %v2584_v57, %v2588_v46  ;;  %v2576_v23 = vld [vmem:[#allocation14 + $0x310] sm:$0xff] }
 0x878   : > { %3357 = vmatpush1.bf16.msra.mxu0 %v5143_v37  ;;  %3410 = vmatpush1.bf16.msra.mxu1 %v5145_v62  ;;  %v5216_v37 = vcombine.high %v2592_v16, %v2596_v6  ;;  %v2585_v62 = vld [vmem:[#allocation14 + $0x358] sm:$0xff]  ;;  %v2552_v59 = vld [vmem:[#allocation14 + $0x250] sm:$0xff] }
 0x879   : > { %3384 = vmatprep.mubr.bf16.mxu0 %v2475_v61  ;;  %3437 = vmatprep.mubr.bf16.mxu1 %v2475_v61  ;;  %v5114_v61 = vcombine.high %v2489_v52, %v2493_v41  ;;  %v5210_v24 = vcombine.high %v2585_v62, %v2589_v7  ;;  %v5209_v53 = vcombine.low %v2585_v62, %v2589_v7  ;;  %v2560_v41 = vld [vmem:[#allocation14 + $0x290] sm:$0xff]  ;;  %v5788_v62 = vld [vmem:[#allocation15 + $0x164] ss:$8 sps:$4 sm:$0xff]   ;;  %v5783_v7 = vld [vmem:[#allocation15 + $0x60] ss:$8 sps:$4 sm:$0xff]  }
 0x87a   : > { %3358 = vmatprep.subr.bf16.mxu0 %v5136_v19  ;;  %3411 = vmatprep.subr.bf16.mxu1 %v5138_v20  ;;  %v5215_v19 = vcombine.low %v2592_v16, %v2596_v6  ;;  %v5217_v20 = vcombine.low %v2593_v8, %v2597_v54  ;;  %v2544_v25 = vld [vmem:[#allocation14 + $0x210] sm:$0xff] }
 0x87c   : > { %3359 = vmatpush1.bf16.msra.mxu0 %v5135_v26  ;;  %3412 = vmatpush1.bf16.msra.mxu1 %v5137_v0  ;;  %v2580_v26 = vld [vmem:[#allocation14 + $0x330] sm:$0xff]  ;;  %v2577_v0 = vld [vmem:[#allocation14 + $0x318] sm:$0xff] }
 0x87d   : > { %3360 = vmatprep.subr.bf16.mxu0 %v5128_v29  ;;  %3413 = vmatprep.subr.bf16.mxu1 %v5130_v30  ;;  %v2581_v29 = vld [vmem:[#allocation14 + $0x338] sm:$0xff]  ;;  %v5207_v30 = vcombine.low %v2584_v57, %v2588_v46  ;;  %v5200_v35 = vcombine.high %v2576_v23, %v2580_v26  ;;  %v5785_v46 = vld [vmem:[#allocation15 + $0x64] ss:$8 sps:$4 sm:$0xff]  }
 0x87e   : > { %v5202_v47 = vcombine.high %v2577_v0, %v2581_v29  ;;  %v5201_v42 = vcombine.low %v2577_v0, %v2581_v29  ;;  %v5780_v57 = vld [vmem:[#allocation15 + $0x170] ss:$8 sps:$4 sm:$0xff]   ;;  %v5798_v0 = vld [vmem:[#allocation15 + $0x140] ss:$8 sps:$4 sm:$0xff]   ;;  %v5803_v29 = vld [vmem:[#allocation15 + $0x34] ss:$8 sps:$4 sm:$0xff]  }
 0x880   : > { %3361 = vmatpush1.bf16.msra.mxu0 %v5127_v17  ;;  %3414 = vmatpush1.bf16.msra.mxu1 %v5129_v48  ;;  %v2572_v17 = vld [vmem:[#allocation14 + $0x2f0] sm:$0xff]  ;;  %v2569_v48 = vld [vmem:[#allocation14 + $0x2d8] sm:$0xff] }
 0x881   : > { %3362 = vmatprep.subr.bf16.mxu0 %v5120_v55  ;;  %3415 = vmatprep.subr.bf16.mxu1 %v5122_v39  ;;  %v2573_v55 = vld [vmem:[#allocation14 + $0x2f8] sm:$0xff]  ;;  %v5199_v39 = vcombine.low %v2576_v23, %v2580_v26  ;;  %v5192_v43 = vcombine.high %v2568_v36, %v2572_v17  ;;  %v5797_v26 = vld [vmem:[#allocation15 + $0x44] ss:$8 sps:$4 sm:$0xff]  }
 0x882   : > { %v5194_v52 = vcombine.high %v2569_v48, %v2573_v55  ;;  %v5193_v18 = vcombine.low %v2569_v48, %v2573_v55  ;;  %v5792_v23 = vld [vmem:[#allocation15 + $0x150] ss:$8 sps:$4 sm:$0xff]   ;;  %v5815_v48 = vld [vmem:[#allocation15 + $0x14] ss:$8 sps:$4 sm:$0xff]  }
 0x883   : > { %v5818_v55 = vld [vmem:[#allocation15 + $0x114] ss:$8 sps:$4 sm:$0xff]  }
 0x884   : > { %3363 = vmatpush1.bf16.msra.mxu0 %v5119_v44  ;;  %3416 = vmatpush1.bf16.msra.mxu1 %v5121_v60  ;;  %v2564_v44 = vld [vmem:[#allocation14 + $0x2b0] sm:$0xff]  ;;  %v2561_v60 = vld [vmem:[#allocation14 + $0x298] sm:$0xff] }
 0x885   : > { %3364 = vmatprep.subr.bf16.mxu0 %v5112_v2  ;;  %3417 = vmatprep.subr.bf16.mxu1 %v5114_v61  ;;  %v2565_v2 = vld [vmem:[#allocation14 + $0x2b8] sm:$0xff]  ;;  %v5191_v61 = vcombine.low %v2568_v36, %v2572_v17  ;;  %v5184_v40 = vcombine.high %v2560_v41, %v2564_v44  ;;  %v5812_v36 = vld [vmem:[#allocation15 + $0x124] ss:$8 sps:$4 sm:$0xff]   ;;  %v5807_v17 = vld [vmem:[#allocation15 + $0x20] ss:$8 sps:$4 sm:$0xff]  }
 0x886   : > { %v5186_v34 = vcombine.high %v2561_v60, %v2565_v2  ;;  %v5185_v14 = vcombine.low %v2561_v60, %v2565_v2  ;;  %v5827_v60 = vld [vmem:[#allocation15 + $0xf4] ss:$8 sps:$4 sm:$0xff]  }
 0x887   : > { %v5830_v2 = vld [vmem:[#allocation15 + $0x1f4] ss:$8 sps:$4 sm:$0xff]  }
 0x888   : > { %3365 = vmatpush1.bf16.msra.mxu0 %v5111_v10  ;;  %3418 = vmatpush1.bf16.msra.mxu1 %v5113_v9  ;;  %v2556_v10 = vld [vmem:[#allocation14 + $0x270] sm:$0xff]  ;;  %v2553_v9 = vld [vmem:[#allocation14 + $0x258] sm:$0xff] }
 0x889   : > { %3366 = vmatprep.subr.bf16.mxu0 %v5104_v12  ;;  %3419 = vmatprep.subr.bf16.mxu1 %v5106_v13  ;;  %v2557_v12 = vld [vmem:[#allocation14 + $0x278] sm:$0xff]  ;;  %v5183_v13 = vcombine.low %v2560_v41, %v2564_v44  ;;  %v5176_v15 = vcombine.high %v2552_v59, %v2556_v10  ;;  %v5819_v41 = vld [vmem:[#allocation15] ss:$8 sps:$4 sm:$0xff]  }
 0x88a   : > { %v5178_v22 = vcombine.high %v2553_v9, %v2557_v12  ;;  %v5177_v16 = vcombine.low %v2553_v9, %v2557_v12  ;;  %v5822_v44 = vld [vmem:[#allocation15 + $0x100] ss:$8 sps:$4 sm:$0xff]   ;;  %v5839_v9 = vld [vmem:[#allocation15 + $0xd4] ss:$8 sps:$4 sm:$0xff]  }
 0x88b   : > { %v5842_v12 = vld [vmem:[#allocation15 + $0x1d4] ss:$8 sps:$4 sm:$0xff]  }
 0x88c   : > { %3367 = vmatpush1.bf16.msra.mxu0 %v5103_v33  ;;  %3420 = vmatpush1.bf16.msra.mxu1 %v5105_v5  ;;  %v2548_v33 = vld [vmem:[#allocation14 + $0x230] sm:$0xff]  ;;  %v2545_v5 = vld [vmem:[#allocation14 + $0x218] sm:$0xff] }
 0x88d   : > { %3368 = vmatprep.subr.bf16.mxu0 %v5224_v11  ;;  %3421 = vmatprep.subr.bf16.mxu1 %v5226_v32  ;;  %v2549_v11 = vld [vmem:[#allocation14 + $0x238] sm:$0xff]  ;;  %v5175_v32 = vcombine.low %v2552_v59, %v2556_v10  ;;  %v5168_v6 = vcombine.high %v2544_v25, %v2548_v33  ;;  %v5167_v54 = vcombine.low %v2544_v25, %v2548_v33  ;;  %v5831_v59 = vld [vmem:[#allocation15 + $0xe0] ss:$8 sps:$4 sm:$0xff]  }
 0x88e   : > { %v5170_v8 = vcombine.high %v2545_v5, %v2549_v11  ;;  %v5834_v10 = vld [vmem:[#allocation15 + $0x1e0] ss:$8 sps:$4 sm:$0xff]  }
 0x88f   : > { %v5843_v25 = vld [vmem:[#allocation15 + $0xc0] ss:$8 sps:$4 sm:$0xff]  }
 0x890   : > { %3369 = vmatpush2.bf16.msra.mxu0 %v5223_v49  ;;  %3422 = vmatpush2.bf16.msra.mxu1 %v5225_v31  ;;  %v5169_v49 = vcombine.low %v2545_v5, %v2549_v11  ;;  %v5779_v31 = vld [vmem:[#allocation15 + $0x74] ss:$8 sps:$4 sm:$0xff]   ;;  %v5846_v33 = vld [vmem:[#allocation15 + $0x1c0] ss:$8 sps:$4 sm:$0xff]  }
 0x891   : > { %3370 = vmatprep.subr.bf16.mxu0 %v5216_v37  ;;  %3423 = vmatprep.subr.bf16.mxu1 %v5218_v21  ;;  %v5782_v37 = vld [vmem:[#allocation15 + $0x174] ss:$8 sps:$4 sm:$0xff]   ;;  %v5777_v21 = vld [vmem:[#allocation15 + $0x70] ss:$8 sps:$4 sm:$0xff]  }
 0x892   : > { %v5851_v5 = vld [vmem:[#allocation15 + $0xb4] ss:$8 sps:$4 sm:$0xff]  }
 0x893   : > { %v5854_v11 = vld [vmem:[#allocation15 + $0x1b4] ss:$8 sps:$4 sm:$0xff]  }
 0x894   : > { %3371 = vmatpush2.bf16.msra.mxu0 %v5215_v19  ;;  %3424 = vmatpush2.bf16.msra.mxu1 %v5217_v20  ;;  %v5786_v19 = vld [vmem:[#allocation15 + $0x160] ss:$8 sps:$4 sm:$0xff]   ;;  %v5791_v20 = vld [vmem:[#allocation15 + $0x54] ss:$8 sps:$4 sm:$0xff]  }
 0x895   : > { %3372 = vmatprep.subr.bf16.mxu0 %v5208_v51  ;;  %3425 = vmatprep.subr.bf16.mxu1 %v5210_v24  ;;  %v5794_v51 = vld [vmem:[#allocation15 + $0x154] ss:$8 sps:$4 sm:$0xff]   ;;  %v5789_v24 = vld [vmem:[#allocation15 + $0x50] ss:$8 sps:$4 sm:$0xff]  }
 0x898   : > { %3373 = vmatpush2.bf16.msra.mxu0 %v5207_v30  ;;  %3426 = vmatpush2.bf16.msra.mxu1 %v5209_v53  ;;  %v5806_v30 = vld [vmem:[#allocation15 + $0x134] ss:$8 sps:$4 sm:$0xff]   ;;  %v5801_v53 = vld [vmem:[#allocation15 + $0x30] ss:$8 sps:$4 sm:$0xff]  }
 0x899   : > { %3374 = vmatprep.subr.bf16.mxu0 %v5200_v35  ;;  %3427 = vmatprep.subr.bf16.mxu1 %v5202_v47  ;;  %v5804_v35 = vld [vmem:[#allocation15 + $0x130] ss:$8 sps:$4 sm:$0xff]   ;;  %v5809_v47 = vld [vmem:[#allocation15 + $0x24] ss:$8 sps:$4 sm:$0xff]  }
 0x89c   : > { %3375 = vmatpush2.bf16.msra.mxu0 %v5199_v39  ;;  %3428 = vmatpush2.bf16.msra.mxu1 %v5201_v42  ;;  %v5813_v39 = vld [vmem:[#allocation15 + $0x10] ss:$8 sps:$4 sm:$0xff]  }
 0x89d   : > { %3376 = vmatprep.subr.bf16.mxu0 %v5192_v43  ;;  %3429 = vmatprep.subr.bf16.mxu1 %v5194_v52  ;;  %v5816_v42 = vld [vmem:[#allocation15 + $0x110] ss:$8 sps:$4 sm:$0xff]   ;;  %v5821_v43 = vld [vmem:[#allocation15 + $0x4] ss:$8 sps:$4 sm:$0xff]  }
 0x89e   : > { %v5824_v52 = vld [vmem:[#allocation15 + $0x104] ss:$8 sps:$4 sm:$0xff]  }
 0x8a0   : > { %3377 = vmatpush2.bf16.msra.mxu0 %v5191_v61  ;;  %3430 = vmatpush2.bf16.msra.mxu1 %v5193_v18  ;;  %v5825_v61 = vld [vmem:[#allocation15 + $0xf0] ss:$8 sps:$4 sm:$0xff]  }
 0x8a1   : > { %3378 = vmatprep.subr.bf16.mxu0 %v5184_v40  ;;  %3431 = vmatprep.subr.bf16.mxu1 %v5186_v34  ;;  %v5828_v18 = vld [vmem:[#allocation15 + $0x1f0] ss:$8 sps:$4 sm:$0xff]   ;;  %v5833_v40 = vld [vmem:[#allocation15 + $0xe4] ss:$8 sps:$4 sm:$0xff]  }
 0x8a2   : > { %v5836_v34 = vld [vmem:[#allocation15 + $0x1e4] ss:$8 sps:$4 sm:$0xff]  }
 0x8a4   : > { %3379 = vmatpush2.bf16.msra.mxu0 %v5183_v13  ;;  %3432 = vmatpush2.bf16.msra.mxu1 %v5185_v14  ;;  %v5837_v13 = vld [vmem:[#allocation15 + $0xd0] ss:$8 sps:$4 sm:$0xff]  }
 0x8a5   : > { %3380 = vmatprep.subr.bf16.mxu0 %v5176_v15  ;;  %3433 = vmatprep.subr.bf16.mxu1 %v5178_v22  ;;  %v5840_v14 = vld [vmem:[#allocation15 + $0x1d0] ss:$8 sps:$4 sm:$0xff]   ;;  %v5845_v15 = vld [vmem:[#allocation15 + $0xc4] ss:$8 sps:$4 sm:$0xff]  }
 0x8a6   : > { %v5848_v22 = vld [vmem:[#allocation15 + $0x1c4] ss:$8 sps:$4 sm:$0xff]  }
 0x8a8   : > { %3381 = vmatpush2.bf16.msra.mxu0 %v5175_v32  ;;  %3434 = vmatpush2.bf16.msra.mxu1 %v5177_v16  ;;  %v5849_v32 = vld [vmem:[#allocation15 + $0xb0] ss:$8 sps:$4 sm:$0xff]  }
 0x8a9   : > { %3382 = vmatprep.subr.bf16.mxu0 %v5168_v6  ;;  %3435 = vmatprep.subr.bf16.mxu1 %v5170_v8  ;;  %v5852_v16 = vld [vmem:[#allocation15 + $0x1b0] ss:$8 sps:$4 sm:$0xff]   ;;  %v5857_v6 = vld [vmem:[#allocation15 + $0xa4] ss:$8 sps:$4 sm:$0xff]  }
 0x8aa   : > { %v5860_v8 = vld [vmem:[#allocation15 + $0x1a4] ss:$8 sps:$4 sm:$0xff]  }
 0x8ac   : > { %3383 = vmatpush2.bf16.msra.mxu0 %v5167_v54  ;;  %3436 = vmatpush2.bf16.msra.mxu1 %v5169_v49  ;;  %v5855_v54 = vld [vmem:[#allocation15 + $0xa0] ss:$8 sps:$4 sm:$0xff]  }
 0x8ad   : > { %4530 = vmatprep.subr.bf16.mxu0 %v5779_v31  ;;  %4583 = vmatprep.subr.bf16.mxu1 %v5782_v37  ;;  %v5858_v49 = vld [vmem:[#allocation15 + $0x1a0] ss:$8 sps:$4 sm:$0xff]   ;;  %v5863_v31 = vld [vmem:[#allocation15 + $0x94] ss:$8 sps:$4 sm:$0xff]  }
 0x8ae   : > { %v5866_v37 = vld [vmem:[#allocation15 + $0x194] ss:$8 sps:$4 sm:$0xff]  }
 0x8af   : > { %3385 = vmatmul.mubr.bf16.vlgmr.msra.gmra.mxu0 %v7084_v56  ;;  %3438 = vmatmul.mubr.bf16.vlgmr.msra.gmra.mxu1 %v7084_v56  ;;  %v5800_v56 = vld [vmem:[#allocation15 + $0x144] ss:$8 sps:$4 sm:$0xff]  }
 0x8b0   : > { %3394 = vmatprep.mubr.bf16.mxu0 %v7096_v1  ;;  %3447 = vmatprep.mubr.bf16.mxu1 %v7096_v1  ;;  %v5795_v1 = vld [vmem:[#allocation15 + $0x40] ss:$8 sps:$4 sm:$0xff]  }
 0x8b1   : > { %4531 = vmatpush1.bf16.msra.mxu0 %v5777_v21  ;;  %4584 = vmatpush1.bf16.msra.mxu1 %v5780_v57  ;;  %v5861_v21 = vld [vmem:[#allocation15 + $0x90] ss:$8 sps:$4 sm:$0xff]  }
 0x8b2   : > { %4532 = vmatprep.subr.bf16.mxu0 %v5785_v46  ;;  %4585 = vmatprep.subr.bf16.mxu1 %v5788_v62  ;;  %v5864_v57 = vld [vmem:[#allocation15 + $0x190] ss:$8 sps:$4 sm:$0xff]   ;;  %v5869_v46 = vld [vmem:[#allocation15 + $0x84] ss:$8 sps:$4 sm:$0xff]  }
 0x8b3   : > { %v5872_v62 = vld [vmem:[#allocation15 + $0x184] ss:$8 sps:$4 sm:$0xff]  }
 0x8b5   : > { %4533 = vmatpush1.bf16.msra.mxu0 %v5783_v7  ;;  %4586 = vmatpush1.bf16.msra.mxu1 %v5786_v19  ;;  %v5867_v7 = vld [vmem:[#allocation15 + $0x80] ss:$8 sps:$4 sm:$0xff]  }
 0x8b6   : > { %4534 = vmatprep.subr.bf16.mxu0 %v5791_v20  ;;  %4587 = vmatprep.subr.bf16.mxu1 %v5794_v51  ;;  %v5870_v19 = vld [vmem:[#allocation15 + $0x180] ss:$8 sps:$4 sm:$0xff]   ;;  %v5875_v20 = vld [vmem:[#allocation15 + $0x274] ss:$8 sps:$4 sm:$0xff]  }
 0x8b7   : > { %3395 = vmatmul.mubr.bf16.gmra.mxu0 %v7098_v4  ;;  %3448 = vmatmul.mubr.bf16.gmra.mxu1 %v7098_v4  ;;  %v5810_v4 = vld [vmem:[#allocation15 + $0x120] ss:$8 sps:$4 sm:$0xff]   ;;  %v5878_v51 = vld [vmem:[#allocation15 + $0x374] ss:$8 sps:$4 sm:$0xff]  }
 0x8b9   : > { %4535 = vmatpush1.bf16.msra.mxu0 %v5789_v24  ;;  %4588 = vmatpush1.bf16.msra.mxu1 %v5792_v23 }
 0x8ba   : > { %4536 = vmatprep.subr.bf16.mxu0 %v5797_v26  ;;  %4589 = vmatprep.subr.bf16.mxu1 %v5800_v56 }
 0x8bd   : > { %4537 = vmatpush1.bf16.msra.mxu0 %v5795_v1  ;;  %4590 = vmatpush1.bf16.msra.mxu1 %v5798_v0 }
 0x8be   : > { %4538 = vmatprep.subr.bf16.mxu0 %v5803_v29  ;;  %4591 = vmatprep.subr.bf16.mxu1 %v5806_v30 }
 0x8c1   : > { %4539 = vmatpush1.bf16.msra.mxu0 %v5801_v53  ;;  %4592 = vmatpush1.bf16.msra.mxu1 %v5804_v35 }
 0x8c2   : > { %4540 = vmatprep.subr.bf16.mxu0 %v5809_v47  ;;  %4593 = vmatprep.subr.bf16.mxu1 %v5812_v36 }
 0x8c5   : > { %4541 = vmatpush1.bf16.msra.mxu0 %v5807_v17  ;;  %4594 = vmatpush1.bf16.msra.mxu1 %v5810_v4 }
 0x8c6   : > { %4542 = vmatprep.subr.bf16.mxu0 %v5815_v48  ;;  %4595 = vmatprep.subr.bf16.mxu1 %v5818_v55 }
 0x8c9   : > { %4543 = vmatpush1.bf16.msra.mxu0 %v5813_v39  ;;  %4596 = vmatpush1.bf16.msra.mxu1 %v5816_v42 }
 0x8ca   : > { %4544 = vmatprep.subr.bf16.mxu0 %v5821_v43  ;;  %4597 = vmatprep.subr.bf16.mxu1 %v5824_v52 }
 0x8cd   : > { %4545 = vmatpush1.bf16.msra.mxu0 %v5819_v41  ;;  %4598 = vmatpush1.bf16.msra.mxu1 %v5822_v44 }
 0x8ce   : > { %4546 = vmatprep.subr.bf16.mxu0 %v5827_v60  ;;  %4599 = vmatprep.subr.bf16.mxu1 %v5830_v2 }
 0x8d1   : > { %4547 = vmatpush2.bf16.msra.mxu0 %v5825_v61  ;;  %4600 = vmatpush2.bf16.msra.mxu1 %v5828_v18 }
 0x8d2   : > { %4548 = vmatprep.subr.bf16.mxu0 %v5833_v40  ;;  %4601 = vmatprep.subr.bf16.mxu1 %v5836_v34 }
 0x8d5   : > { %4549 = vmatpush2.bf16.msra.mxu0 %v5831_v59  ;;  %4602 = vmatpush2.bf16.msra.mxu1 %v5834_v10 }
 0x8d6   : > { %4550 = vmatprep.subr.bf16.mxu0 %v5839_v9  ;;  %4603 = vmatprep.subr.bf16.mxu1 %v5842_v12 }
 0x8d9   : > { %4551 = vmatpush2.bf16.msra.mxu0 %v5837_v13  ;;  %4604 = vmatpush2.bf16.msra.mxu1 %v5840_v14 }
 0x8da   : > { %4552 = vmatprep.subr.bf16.mxu0 %v5845_v15  ;;  %4605 = vmatprep.subr.bf16.mxu1 %v5848_v22 }
 0x8dd   : > { %4553 = vmatpush2.bf16.msra.mxu0 %v5843_v25  ;;  %4606 = vmatpush2.bf16.msra.mxu1 %v5846_v33 }
 0x8de   : > { %4554 = vmatprep.subr.bf16.mxu0 %v5851_v5  ;;  %4607 = vmatprep.subr.bf16.mxu1 %v5854_v11 }
 0x8e1   : > { %4555 = vmatpush2.bf16.msra.mxu0 %v5849_v32  ;;  %4608 = vmatpush2.bf16.msra.mxu1 %v5852_v16 }
 0x8e2   : > { %4556 = vmatprep.subr.bf16.mxu0 %v5857_v6  ;;  %4609 = vmatprep.subr.bf16.mxu1 %v5860_v8 }
 0x8e5   : > { %4557 = vmatpush2.bf16.msra.mxu0 %v5855_v54  ;;  %4610 = vmatpush2.bf16.msra.mxu1 %v5858_v49 }
 0x8e6   : > { %4558 = vmatprep.subr.bf16.mxu0 %v5863_v31  ;;  %4611 = vmatprep.subr.bf16.mxu1 %v5866_v37 }
 0x8e9   : > { %4559 = vmatpush2.bf16.msra.mxu0 %v5861_v21  ;;  %4612 = vmatpush2.bf16.msra.mxu1 %v5864_v57 }
 0x8ea   : > { %4560 = vmatprep.subr.bf16.mxu0 %v5869_v46  ;;  %4613 = vmatprep.subr.bf16.mxu1 %v5872_v62 }
 0x8ed   : > { %4561 = vmatpush2.bf16.msra.mxu0 %v5867_v7  ;;  %4614 = vmatpush2.bf16.msra.mxu1 %v5870_v19 }
 0x8ee   : > { %4636 = vmatprep.subr.bf16.mxu0 %v5875_v20  ;;  %4689 = vmatprep.subr.bf16.mxu1 %v5878_v51 }
 0x92f   : > { %v7110_v24 = vpop.f32.mrf.mxu0  ;;  %v7112_v23 = vpop.f32.mrf.mxu1 }
 0x930   : > { %v3490_v26 = vmul.f32 %v7110_v24, %v7110_v24  ;;  %v3492_v56 = vmul.f32 %v7112_v23, %v7112_v23 }
 0x931   : > { %v7118_v1 = vpop.f32.mrf.mxu0  ;;  %v7120_v0 = vpop.f32.mrf.mxu1 }
 0x932   : > { %v3522_v29 = vmul.f32 %v3490_v26, %v7110_v24  ;;  %v3524_v30 = vmul.f32 %v3492_v56, %v7112_v23  ;;  %v3491_v53 = vmul.f32 %v7118_v1, %v7118_v1  ;;  %v3493_v35 = vmul.f32 %v7120_v0, %v7120_v0 }
 0x933   : > { %v7128_v47 = vpop.f32.mrf.mxu0  ;;  %v7130_v36 = vpop.f32.mrf.mxu1 }
 0x934   : > { %v3554_v17 = vmul.f32 0.044715, %v3522_v29  ;;  %v3556_v4 = vmul.f32 0.044715, %v3524_v30  ;;  %v3523_v48 = vmul.f32 %v3491_v53, %v7118_v1  ;;  %v3525_v55 = vmul.f32 %v3493_v35, %v7120_v0 }
 0x935   : > { %v3498_v39 = vmul.f32 %v7128_v47, %v7128_v47  ;;  %v3500_v42 = vmul.f32 %v7130_v36, %v7130_v36  ;;  %v7138_v43 = vpop.f32.mrf.mxu0  ;;  %v7140_v52 = vpop.f32.mrf.mxu1 }
 0x936   : > { %v3586_v41 = vadd.f32 %v3554_v17, %v7110_v24  ;;  %v3555_v44 = vmul.f32 0.044715, %v3523_v48  ;;  %v3557_v60 = vmul.f32 0.044715, %v3525_v55  ;;  %v3499_v18 = vmul.f32 %v7138_v43, %v7138_v43 }
 0x937   : > { %v3530_v2 = vmul.f32 %v3498_v39, %v7128_v47  ;;  %v3532_v61 = vmul.f32 %v3500_v42, %v7130_v36  ;;  %v7147_v40 = vpop.f32.mrf.mxu0  ;;  %v3588_v59 = vadd.f32 %v3556_v4, %v7112_v23  ;;  %v7153_v15 = vpop.f32.mrf.mxu1  ;;  %v3501_v25 = vmul.f32 %v7140_v52, %v7140_v52 }
 0x938   : > { %v3618_v34 = vmul.f32 0.7978846, %v3586_v41  ;;  %v3587_v10 = vadd.f32 %v3555_v44, %v7118_v1  ;;  %v3589_v9 = vadd.f32 %v3557_v60, %v7120_v0  ;;  %v3531_v14 = vmul.f32 %v3499_v18, %v7138_v43 }
 0x939   : > { %v3562_v12 = vmul.f32 0.044715, %v3530_v2  ;;  %v3564_v13 = vmul.f32 0.044715, %v3532_v61  ;;  %v7159_v32 = vpop.f32.mrf.mxu0  ;;  %v3533_v6 = vmul.f32 %v3501_v25, %v7140_v52  ;;  %v3506_v8 = vmul.f32 %v7147_v40, %v7147_v40  ;;  %v7164_v37 = vpop.f32.mrf.mxu1 }
 0x93a   : > { %v3619_v22 = vmul.f32 0.7978846, %v3587_v10  ;;  %6017 = vtanh.f32 %v3618_v34  ;;  %v3621_v33 = vmul.f32 0.7978846, %v3589_v9  ;;  %v3563_v16 = vmul.f32 0.044715, %v3531_v14 }
 0x93b   : > { %v3594_v5 = vadd.f32 %v3562_v12, %v7128_v47  ;;  %v3596_v11 = vadd.f32 %v3564_v13, %v7130_v36  ;;  %v3620_v54 = vmul.f32 0.7978846, %v3588_v59  ;;  %v3565_v57 = vmul.f32 0.044715, %v3533_v6  ;;  %v7172_v19 = vpop.f32.mrf.mxu0  ;;  %v7179_v53 = vpop.f32.mrf.mxu1 }
 0x93c   : > { %6019 = vtanh.f32 %v3619_v22  ;;  %v3595_v21 = vadd.f32 %v3563_v16, %v7138_v43  ;;  %v3538_v46 = vmul.f32 %v3506_v8, %v7147_v40  ;;  %v3508_v62 = vmul.f32 %v7153_v15, %v7153_v15 }
 0x93d   : > { %6021 = vtanh.f32 %v3621_v33  ;;  %v3626_v49 = vmul.f32 0.7978846, %v3594_v5  ;;  %v3628_v31 = vmul.f32 0.7978846, %v3596_v11  ;;  %v3507_v7 = vmul.f32 %v7159_v32, %v7159_v32  ;;  %v7185_v39 = vpop.f32.mrf.mxu0  ;;  %v7194_v59 = vpop.f32.mrf.mxu1 }
 0x93e   : > { %v3627_v20 = vmul.f32 0.7978846, %v3595_v21  ;;  %v3597_v51 = vadd.f32 %v3565_v57, %v7140_v52  ;;  %v3570_v26 = vmul.f32 0.044715, %v3538_v46  ;;  %v3540_v56 = vmul.f32 %v3508_v62, %v7153_v15 }
 0x93f   : > { %6023 = vtanh.f32 %v3626_v49  ;;  %v3539_v29 = vmul.f32 %v3507_v7, %v7159_v32  ;;  %v3509_v30 = vmul.f32 %v7164_v37, %v7164_v37  ;;  %v3514_v17 = vmul.f32 %v7172_v19, %v7172_v19 }
 0x940   : > { %6025 = vtanh.f32 %v3628_v31  ;;  %v3629_v35 = vmul.f32 0.7978846, %v3597_v51  ;;  %v3602_v4 = vadd.f32 %v3570_v26, %v7147_v40  ;;  %v3572_v42 = vmul.f32 0.044715, %v3540_v56 }
 0x941   : > { %6027 = vtanh.f32 %v3620_v54  ;;  %v3571_v48 = vmul.f32 0.044715, %v3539_v29  ;;  %v3541_v55 = vmul.f32 %v3509_v30, %v7164_v37  ;;  %v3546_v41 = vmul.f32 %v3514_v17, %v7172_v19 }
 0x942   : > { %6029 = vtanh.f32 %v3627_v20  ;;  %v3516_v44 = vmul.f32 %v7179_v53, %v7179_v53  ;;  %v3515_v34 = vmul.f32 %v7185_v39, %v7185_v39  ;;  %v3634_v10 = vmul.f32 0.7978846, %v3602_v4 }
 0x943   : > { %6031 = vtanh.f32 %v3629_v35  ;;  %v3603_v60 = vadd.f32 %v3571_v48, %v7159_v32  ;;  %v3573_v2 = vmul.f32 0.044715, %v3541_v55  ;;  %v3578_v61 = vmul.f32 0.044715, %v3546_v41 }
 0x944   : > { %v3548_v18 = vmul.f32 %v3516_v44, %v7179_v53  ;;  %v3604_v13 = vadd.f32 %v3572_v42, %v7153_v15  ;;  %v3547_v25 = vmul.f32 %v3515_v34, %v7185_v39  ;;  %v3458_v5 = vmul.f32 0.5, %v7110_v24 }
 0x945   : > { %v3605_v9 = vadd.f32 %v3573_v2, %v7164_v37  ;;  %v3610_v14 = vadd.f32 %v3578_v61, %v7172_v19  ;;  %v3635_v11 = vmul.f32 0.7978846, %v3603_v60  ;;  %v3517_v16 = vmul.f32 %v7194_v59, %v7194_v59 }
 0x946   : > { %v3580_v22 = vmul.f32 0.044715, %v3548_v18  ;;  %v3459_v8 = vmul.f32 0.5, %v7118_v1  ;;  %v3461_v54 = vmul.f32 0.5, %v7120_v0  ;;  %6033 = vtanh.f32 %v3634_v10 }
 0x947   : > { %v6018_v12 = vpop.eup %6017  ;;  %v3642_v49 = vmul.f32 0.7978846, %v3610_v14  ;;  %v3637_v21 = vmul.f32 0.7978846, %v3605_v9  ;;  %v3579_v57 = vmul.f32 0.044715, %v3547_v25  ;;  %v3549_v46 = vmul.f32 %v3517_v16, %v7194_v59 }
 0x948   : > { %v3612_v31 = vadd.f32 %v3580_v22, %v7179_v53  ;;  %v3466_v24 = vmul.f32 0.5, %v7128_v47  ;;  %v3636_v7 = vmul.f32 0.7978846, %v3604_v13  ;;  %v3682_v29 = vadd.f32 1.0, %v6018_v12  ;;  %v5873_v25 = vld [vmem:[#allocation15 + $0x270] ss:$8 sps:$4 sm:$0xff]  }
 0x949   : > { %v6020_v33 = vpop.eup %6019  ;;  %6035 = vtanh.f32 %v3642_v49  ;;  %v3611_v1 = vadd.f32 %v3579_v57, %v7185_v39  ;;  %v3581_v0 = vmul.f32 0.044715, %v3549_v46  ;;  %v3468_v30 = vmul.f32 0.5, %v7130_v36  ;;  %v5881_v16 = vld [vmem:[#allocation15 + $0x264] ss:$8 sps:$4 sm:$0xff]  }
 0x94a   : > { %v6022_v6 = vpop.eup %6021  ;;  %v3644_v20 = vmul.f32 0.7978846, %v3612_v31  ;;  %6037 = vtanh.f32 %v3635_v11  ;;  %v3683_v35 = vadd.f32 1.0, %v6020_v33  ;;  %v3467_v55 = vmul.f32 0.5, %v7138_v43  ;;  %v5876_v49 = vld [vmem:[#allocation15 + $0x370] ss:$8 sps:$4 sm:$0xff]  }
 0x94b   : > { %v3643_v48 = vmul.f32 0.7978846, %v3611_v1  ;;  %v3613_v47 = vadd.f32 %v3581_v0, %v7194_v59  ;;  %v3685_v41 = vadd.f32 1.0, %v6022_v6  ;;  %v3469_v36 = vmul.f32 0.5, %v7140_v52  ;;  %v5884_v52 = vld [vmem:[#allocation15 + $0x364] ss:$8 sps:$4 sm:$0xff]  }
 0x94c   : > { %v6024_v62 = vpop.eup %6023  ;;  %6039 = vtanh.f32 %v3644_v20  ;;  %v3715_v18 = vmul.f32 %v3683_v35, %v3459_v8  ;;  %v3714_v9 = vmul.f32 %v3682_v29, %v3458_v5  ;;  %v3460_v12 = vmul.f32 0.5, %v7112_v23  ;;  %v5879_v5 = vld [vmem:[#allocation15 + $0x260] ss:$8 sps:$4 sm:$0xff]   ;;  %v5893_v1 = vld [vmem:[#allocation15 + $0x244] ss:$8 sps:$4 sm:$0xff]  }
 0x94d   : > { %v6026_v51 = vpop.eup %6025  ;;  %v3690_v26 = vadd.f32 1.0, %v6024_v62  ;;  %6041 = vtanh.f32 %v3637_v21  ;;  %v3645_v61 = vmul.f32 0.7978846, %v3613_v47  ;;  %v3717_v43 = vmul.f32 %v3685_v41, %v3461_v54  ;;  %v5887_v21 = vld [vmem:[#allocation15 + $0x254] ss:$8 sps:$4 sm:$0xff]  }
 0x94e   : > { %v6028_v56 = vpop.eup %6027  ;;  %v3692_v4 = vadd.f32 1.0, %v6026_v51  ;;  %6043 = vtanh.f32 %v3636_v7  ;;  %v5882_v57 = vld [vmem:[#allocation15 + $0x360] ss:$8 sps:$4 sm:$0xff]   ;;  %v5890_v62 = vld [vmem:[#allocation15 + $0x354] ss:$8 sps:$4 sm:$0xff]   ;;  %v3482_v29 = vmul.f32 0.5, %v7172_v19 }
 0x94f   : > { %v6030_v17 = vpop.eup %6029  ;;  %v3684_v60 = vadd.f32 1.0, %v6028_v56  ;;  %v3722_v2 = vmul.f32 %v3690_v26, %v3466_v24  ;;  %6045 = vtanh.f32 %v3643_v48  ;;  %v5885_v7 = vld [vmem:[#allocation15 + $0x250] ss:$8 sps:$4 sm:$0xff]   ;;  %v3474_v56 = vmul.f32 0.5, %v7147_v40  ;;  %v5891_v19 = vld [vmem:[#allocation15 + $0x240] ss:$8 sps:$4 sm:$0xff]  }
 0x950   : > { %v3691_v42 = vadd.f32 1.0, %v6030_v17  ;;  %v6032_v44 = vpop.eup %6031  ;;  %v3724_v13 = vmul.f32 %v3692_v4, %v3468_v30  ;;  %6047 = vtanh.f32 %v3645_v61  ;;  %v5888_v30 = vld [vmem:[#allocation15 + $0x350] ss:$8 sps:$4 sm:$0xff]   ;;  %v3475_v4 = vmul.f32 0.5, %v7159_v32 }
 0x951   : > { %v3693_v10 = vadd.f32 1.0, %v6032_v44  ;;  %v3716_v33 = vmul.f32 %v3684_v60, %v3460_v12  ;;  %v3746_v11 = vpack.c.bf16 %v3722_v2, %v3714_v9  ;;  %v3483_v48 = vmul.f32 0.5, %v7185_v39  ;;  %v5899_v39 = vld [vmem:[#allocation15 + $0x234] ss:$8 sps:$4 sm:$0xff]   ;;  %v5894_v12 = vld [vmem:[#allocation15 + $0x340] ss:$8 sps:$4 sm:$0xff]  }
 0x952   : > { %v3723_v34 = vmul.f32 %v3691_v42, %v3467_v55  ;;  %v5896_v42 = vld [vmem:[#allocation15 + $0x344] ss:$8 sps:$4 sm:$0xff]   ;;  %v3477_v44 = vmul.f32 0.5, %v7164_v37  ;;  %v3484_v60 = vmul.f32 0.5, %v7179_v53  ;;  %v3485_v61 = vmul.f32 0.5, %v7194_v59 }
 0x953   : > { %v3725_v22 = vmul.f32 %v3693_v10, %v3469_v36  ;;  %v3748_v31 = vpack.c.bf16 %v3724_v13, %v3716_v33  ;;  %v6034_v8 = vpop.eup %6033  ;;  %v5897_v59 = vld [vmem:[#allocation15 + $0x230] ss:$8 sps:$4 sm:$0xff]   ;;  %v5905_v33 = vld [vmem:[#allocation15 + $0x224] ss:$8 sps:$4 sm:$0xff]  }
 0x954   : > { %v3747_v14 = vpack.c.bf16 %v3723_v34, %v3715_v18  ;;  %v3698_v35 = vadd.f32 1.0, %v6034_v8  ;;  %v3476_v34 = vmul.f32 0.5, %v7153_v15  ;;  %v5900_v15 = vld [vmem:[#allocation15 + $0x330] ss:$8 sps:$4 sm:$0xff]  }
 0x955   : > { %v3749_v6 = vpack.c.bf16 %v3725_v22, %v3717_v43  ;;  %v5909_v8 = vld [vmem:[#allocation15 + $0x210] ss:$8 sps:$4 sm:$0xff]  }
 0x956   : > { %4562 = vmatprep.mubr.bf16.mxu0 %v3747_v14  ;;  %v6036_v23 = vpop.eup %6035  ;;  %v3730_v10 = vmul.f32 %v3698_v35, %v3474_v56  ;;  %v5902_v14 = vld [vmem:[#allocation15 + $0x334] ss:$8 sps:$4 sm:$0xff]   ;;  %v5918_v56 = vld [vmem:[#allocation15 + $0x300] ss:$8 sps:$4 sm:$0xff]  }
 0x957   : > { %4563 = vmatmul.mubr.bf16.vlgmr.msra.gmra.mxu0 %v3746_v11  ;;  %4615 = vmatprep.mubr.bf16.mxu1 %v3749_v6  ;;  %v6038_v54 = vpop.eup %6037  ;;  %v3706_v20 = vadd.f32 1.0, %v6036_v23  ;;  %v5903_v6 = vld [vmem:[#allocation15 + $0x220] ss:$8 sps:$4 sm:$0xff]   ;;  %v5912_v23 = vld [vmem:[#allocation15 + $0x310] ss:$8 sps:$4 sm:$0xff]  }
 0x958   : > { %4637 = vmatpush1.bf16.msra.mxu0 %v5873_v25  ;;  %4616 = vmatmul.mubr.bf16.vlgmr.msra.gmra.mxu1 %v3748_v31  ;;  %v3699_v26 = vadd.f32 1.0, %v6038_v54  ;;  %v5906_v31 = vld [vmem:[#allocation15 + $0x320] ss:$8 sps:$4 sm:$0xff]  }
 0x959   : > { %4638 = vmatprep.subr.bf16.mxu0 %v5881_v16  ;;  %4690 = vmatpush1.bf16.msra.mxu1 %v5876_v49  ;;  %v6040_v46 = vpop.eup %6039  ;;  %v3738_v40 = vmul.f32 %v3706_v20, %v3482_v29  ;;  %v5908_v16 = vld [vmem:[#allocation15 + $0x324] ss:$8 sps:$4 sm:$0xff]   ;;  %v5911_v49 = vld [vmem:[#allocation15 + $0x214] ss:$8 sps:$4 sm:$0xff]  }
 0x95a   : > { %4691 = vmatprep.subr.bf16.mxu1 %v5884_v52  ;;  %v6042_v24 = vpop.eup %6041  ;;  %v3708_v17 = vadd.f32 1.0, %v6040_v46  ;;  %v3731_v36 = vmul.f32 %v3699_v26, %v3475_v4  ;;  %v5914_v52 = vld [vmem:[#allocation15 + $0x314] ss:$8 sps:$4 sm:$0xff]  }
 0x95b   : > { %v6044_v51 = vpop.eup %6043  ;;  %v3701_v55 = vadd.f32 1.0, %v6042_v24  ;;  %v3754_v43 = vpack.c.bf16 %v3738_v40, %v3730_v10  ;;  %v5915_v24 = vld [vmem:[#allocation15 + $0x200] ss:$8 sps:$4 sm:$0xff]  }
 0x95c   : > { %4639 = vmatpush1.bf16.msra.mxu0 %v5879_v5  ;;  %v6046_v0 = vpop.eup %6045  ;;  %v3700_v2 = vadd.f32 1.0, %v6044_v51  ;;  %v3740_v9 = vmul.f32 %v3708_v17, %v3484_v60  ;;  %v5917_v5 = vld [vmem:[#allocation15 + $0x204] ss:$8 sps:$4 sm:$0xff]   ;;  %v5923_v51 = vld [vmem:[#allocation15 + $0x2f4] ss:$8 sps:$4 sm:$0xff]  }
 0x95d   : > { %4640 = vmatprep.subr.bf16.mxu0 %v5887_v21  ;;  %4692 = vmatpush1.bf16.msra.mxu1 %v5882_v57  ;;  %v3707_v47 = vadd.f32 1.0, %v6046_v0  ;;  %v6048_v41 = vpop.eup %6047  ;;  %v3733_v13 = vmul.f32 %v3701_v55, %v3477_v44  ;;  %v5920_v57 = vld [vmem:[#allocation15 + $0x304] ss:$8 sps:$4 sm:$0xff]   ;;  %v5926_v17 = vld [vmem:[#allocation15 + $0x3f4] ss:$8 sps:$4 sm:$0xff]  }
 0x95e   : > { %4693 = vmatprep.subr.bf16.mxu1 %v5890_v62  ;;  %v3709_v32 = vadd.f32 1.0, %v6048_v41  ;;  %v3732_v22 = vmul.f32 %v3700_v2, %v3476_v34  ;;  %v5921_v55 = vld [vmem:[#allocation15 + $0x2f0] ss:$8 sps:$4 sm:$0xff]   ;;  %v5929_v2 = vld [vmem:[#allocation15 + $0x2e4] ss:$8 sps:$4 sm:$0xff]  }
 0x95f   : > { %v3739_v18 = vmul.f32 %v3707_v47, %v3483_v48 }
 0x960   : > { %4641 = vmatpush1.bf16.msra.mxu0 %v5885_v7  ;;  %v3741_v53 = vmul.f32 %v3709_v32, %v3485_v61  ;;  %v3756_v11 = vpack.c.bf16 %v3740_v9, %v3732_v22  ;;  %v5932_v9 = vld [vmem:[#allocation15 + $0x3e4] ss:$8 sps:$4 sm:$0xff]  }
 0x961   : > { %4642 = vmatprep.subr.bf16.mxu0 %v5893_v1  ;;  %4694 = vmatpush1.bf16.msra.mxu1 %v5888_v30  ;;  %v3755_v37 = vpack.c.bf16 %v3739_v18, %v3731_v36  ;;  %v5924_v36 = vld [vmem:[#allocation15 + $0x3f0] ss:$8 sps:$4 sm:$0xff]  }
 0x962   : > { %4695 = vmatprep.subr.bf16.mxu1 %v5896_v42  ;;  %v3757_v25 = vpack.c.bf16 %v3741_v53, %v3733_v13  ;;  %v5927_v53 = vld [vmem:[#allocation15 + $0x2e0] ss:$8 sps:$4 sm:$0xff]  }
 0x963   : > { %4572 = vmatprep.mubr.bf16.mxu0 %v3755_v37 }
 0x964   : > { %4643 = vmatpush1.bf16.msra.mxu0 %v5891_v19  ;;  %4625 = vmatprep.mubr.bf16.mxu1 %v3757_v25 }
 0x965   : > { %4644 = vmatprep.subr.bf16.mxu0 %v5899_v39  ;;  %4573 = vmatmul.mubr.bf16.gmra.mxu0 %v3754_v43 }
 0x966   : > { %4696 = vmatpush1.bf16.msra.mxu1 %v5894_v12 }
 0x967   : > { %4697 = vmatprep.subr.bf16.mxu1 %v5902_v14  ;;  %4626 = vmatmul.mubr.bf16.gmra.mxu1 %v3756_v11 }
 0x968   : > { %4645 = vmatpush1.bf16.msra.mxu0 %v5897_v59 }
 0x969   : > { %4646 = vmatprep.subr.bf16.mxu0 %v5905_v33  ;;  %v5935_v33 = vld [vmem:[#allocation15 + $0x2d4] ss:$8 sps:$4 sm:$0xff]  }
 0x96a   : > { %4698 = vmatpush1.bf16.msra.mxu1 %v5900_v15 }
 0x96b   : > { %4699 = vmatprep.subr.bf16.mxu1 %v5908_v16  ;;  %v5930_v16 = vld [vmem:[#allocation15 + $0x3e0] ss:$8 sps:$4 sm:$0xff]  }
 0x96c   : > { %4647 = vmatpush1.bf16.msra.mxu0 %v5903_v6 }
 0x96d   : > { %4648 = vmatprep.subr.bf16.mxu0 %v5911_v49 }
 0x96e   : > { %4700 = vmatpush1.bf16.msra.mxu1 %v5906_v31 }
 0x96f   : > { %4701 = vmatprep.subr.bf16.mxu1 %v5914_v52  ;;  %v7222_v21 = vpop.f32.mrf.mxu0  ;;  %v7224_v54 = vpop.f32.mrf.mxu1 }
 0x970   : > { %4649 = vmatpush1.bf16.msra.mxu0 %v5909_v8  ;;  %v3494_v46 = vmul.f32 %v7222_v21, %v7222_v21  ;;  %v3496_v62 = vmul.f32 %v7224_v54, %v7224_v54  ;;  %v5938_v8 = vld [vmem:[#allocation15 + $0x3d4] ss:$8 sps:$4 sm:$0xff]  }
 0x971   : > { %v7230_v7 = vpop.f32.mrf.mxu0  ;;  %v7232_v20 = vpop.f32.mrf.mxu1  ;;  %4650 = vmatprep.subr.bf16.mxu0 %v5917_v5 }
 0x972   : > { %4702 = vmatpush1.bf16.msra.mxu1 %v5912_v23  ;;  %v3526_v26 = vmul.f32 %v3494_v46, %v7222_v21  ;;  %v3528_v1 = vmul.f32 %v3496_v62, %v7224_v54  ;;  %v3495_v0 = vmul.f32 %v7230_v7, %v7230_v7  ;;  %v3497_v29 = vmul.f32 %v7232_v20, %v7232_v20  ;;  %v5933_v46 = vld [vmem:[#allocation15 + $0x2d0] ss:$8 sps:$4 sm:$0xff]   ;;  %v5941_v62 = vld [vmem:[#allocation15 + $0x2c4] ss:$8 sps:$4 sm:$0xff]  }
 0x973   : > { %4703 = vmatprep.subr.bf16.mxu1 %v5920_v57  ;;  %v7240_v30 = vpop.f32.mrf.mxu0  ;;  %v7242_v35 = vpop.f32.mrf.mxu1 }
 0x974   : > { %v3558_v4 = vmul.f32 0.044715, %v3526_v26  ;;  %v3560_v48 = vmul.f32 0.044715, %v3528_v1  ;;  %v3527_v47 = vmul.f32 %v3495_v0, %v7230_v7  ;;  %4651 = vmatpush1.bf16.msra.mxu0 %v5915_v24  ;;  %v3529_v42 = vmul.f32 %v3497_v29, %v7232_v20 }
 0x975   : > { %v3502_v41 = vmul.f32 %v7240_v30, %v7240_v30  ;;  %v3504_v44 = vmul.f32 %v7242_v35, %v7242_v35  ;;  %v7250_v60 = vpop.f32.mrf.mxu0  ;;  %v7252_v40 = vpop.f32.mrf.mxu1  ;;  %4652 = vmatprep.subr.bf16.mxu0 %v5923_v51 }
 0x976   : > { %v3590_v19 = vadd.f32 %v3558_v4, %v7222_v21  ;;  %v3559_v61 = vmul.f32 0.044715, %v3527_v47  ;;  %4704 = vmatpush1.bf16.msra.mxu1 %v5918_v56  ;;  %v3561_v18 = vmul.f32 0.044715, %v3529_v42  ;;  %v3503_v34 = vmul.f32 %v7250_v60, %v7250_v60  ;;  %v5936_v4 = vld [vmem:[#allocation15 + $0x3d0] ss:$8 sps:$4 sm:$0xff]  }
 0x977   : > { %v3534_v32 = vmul.f32 %v3502_v41, %v7240_v30  ;;  %v3536_v39 = vmul.f32 %v3504_v44, %v7242_v35  ;;  %4705 = vmatprep.subr.bf16.mxu1 %v5926_v17  ;;  %v7259_v10 = vpop.f32.mrf.mxu0  ;;  %v3592_v37 = vadd.f32 %v3560_v48, %v7224_v54  ;;  %v7265_v25 = vpop.f32.mrf.mxu1  ;;  %v3505_v15 = vmul.f32 %v7252_v40, %v7252_v40 }
 0x978   : > { %v3622_v12 = vmul.f32 0.7978846, %v3590_v19  ;;  %v3591_v13 = vadd.f32 %v3559_v61, %v7230_v7  ;;  %4653 = vmatpush2.bf16.msra.mxu0 %v5921_v55  ;;  %v3593_v14 = vadd.f32 %v3561_v18, %v7232_v20  ;;  %v3535_v59 = vmul.f32 %v3503_v34, %v7250_v60  ;;  %v5944_v55 = vld [vmem:[#allocation15 + $0x3c4] ss:$8 sps:$4 sm:$0xff]  }
 0x979   : > { %v3566_v43 = vmul.f32 0.044715, %v3534_v32  ;;  %v3568_v22 = vmul.f32 0.044715, %v3536_v39  ;;  %4654 = vmatprep.subr.bf16.mxu0 %v5929_v2  ;;  %v7271_v52 = vpop.f32.mrf.mxu0  ;;  %v3537_v23 = vmul.f32 %v3505_v15, %v7252_v40  ;;  %v3510_v57 = vmul.f32 %v7259_v10, %v7259_v10  ;;  %v7276_v1 = vpop.f32.mrf.mxu1  ;;  %v5939_v2 = vld [vmem:[#allocation15 + $0x2c0] ss:$8 sps:$4 sm:$0xff]  }
 0x97a   : > { %v3623_v11 = vmul.f32 0.7978846, %v3591_v13  ;;  %4706 = vmatpush2.bf16.msra.mxu1 %v5924_v36  ;;  %6049 = vtanh.f32 %v3622_v12  ;;  %v3625_v6 = vmul.f32 0.7978846, %v3593_v14  ;;  %v3567_v5 = vmul.f32 0.044715, %v3535_v59 }
 0x97b   : > { %v3598_v49 = vadd.f32 %v3566_v43, %v7240_v30  ;;  %v3600_v31 = vadd.f32 %v3568_v22, %v7242_v35  ;;  %4707 = vmatprep.subr.bf16.mxu1 %v5932_v9  ;;  %v3624_v24 = vmul.f32 0.7978846, %v3592_v37  ;;  %v3569_v56 = vmul.f32 0.044715, %v3537_v23  ;;  %v7284_v47 = vpop.f32.mrf.mxu0  ;;  %v7291_v18 = vpop.f32.mrf.mxu1  ;;  %v5947_v32 = vld [vmem:[#allocation15 + $0x2b4] ss:$8 sps:$4 sm:$0xff]  }
 0x97c   : > { %6051 = vtanh.f32 %v3623_v11  ;;  %4655 = vmatpush2.bf16.msra.mxu0 %v5927_v53  ;;  %v3599_v0 = vadd.f32 %v3567_v5, %v7250_v60  ;;  %v3542_v29 = vmul.f32 %v3510_v57, %v7259_v10  ;;  %v3512_v17 = vmul.f32 %v7265_v25, %v7265_v25  ;;  %v5942_v9 = vld [vmem:[#allocation15 + $0x3c0] ss:$8 sps:$4 sm:$0xff]   ;;  %v5950_v14 = vld [vmem:[#allocation15 + $0x3b4] ss:$8 sps:$4 sm:$0xff]   ;;  %v5948_v5 = vld [vmem:[#allocation15 + $0x3b0] ss:$8 sps:$4 sm:$0xff]  }
 0x97d   : > { %6053 = vtanh.f32 %v3625_v6  ;;  %v3630_v51 = vmul.f32 0.7978846, %v3598_v49  ;;  %v3632_v26 = vmul.f32 0.7978846, %v3600_v31  ;;  %4656 = vmatprep.subr.bf16.mxu0 %v5935_v33  ;;  %v3511_v48 = vmul.f32 %v7271_v52, %v7271_v52  ;;  %v7297_v53 = vpop.f32.mrf.mxu0  ;;  %v5945_v33 = vld [vmem:[#allocation15 + $0x2b0] ss:$8 sps:$4 sm:$0xff]  }
 0x97e   : > { %4708 = vmatpush2.bf16.msra.mxu1 %v5930_v16  ;;  %v3631_v42 = vmul.f32 0.7978846, %v3599_v0  ;;  %v3601_v41 = vadd.f32 %v3569_v56, %v7252_v40  ;;  %v3574_v44 = vmul.f32 0.044715, %v3542_v29  ;;  %v3544_v19 = vmul.f32 %v3512_v17, %v7265_v25  ;;  %v5953_v16 = vld [vmem:[#allocation15 + $0x2a4] ss:$8 sps:$4 sm:$0xff]  }
 0x97f   : > { %6055 = vtanh.f32 %v3630_v51  ;;  %4709 = vmatprep.subr.bf16.mxu1 %v5938_v8  ;;  %v3543_v61 = vmul.f32 %v3511_v48, %v7271_v52  ;;  %v3513_v36 = vmul.f32 %v7276_v1, %v7276_v1  ;;  %v3518_v34 = vmul.f32 %v7284_v47, %v7284_v47  ;;  %v7306_v8 = vpop.f32.mrf.mxu1  ;;  %v5951_v56 = vld [vmem:[#allocation15 + $0x2a0] ss:$8 sps:$4 sm:$0xff]  }
 0x980   : > { %6057 = vtanh.f32 %v3632_v26  ;;  %4657 = vmatpush2.bf16.msra.mxu0 %v5933_v46  ;;  %v3633_v39 = vmul.f32 0.7978846, %v3601_v41  ;;  %v3606_v12 = vadd.f32 %v3574_v44, %v7259_v10  ;;  %v3576_v43 = vmul.f32 0.044715, %v3544_v19  ;;  %v5956_v46 = vld [vmem:[#allocation15 + $0x3a4] ss:$8 sps:$4 sm:$0xff]  }
 0x981   : > { %6059 = vtanh.f32 %v3624_v24  ;;  %4658 = vmatprep.subr.bf16.mxu0 %v5941_v62  ;;  %v3575_v37 = vmul.f32 0.044715, %v3543_v61  ;;  %v3545_v13 = vmul.f32 %v3513_v36, %v7276_v1  ;;  %v3550_v22 = vmul.f32 %v3518_v34, %v7284_v47  ;;  %v5954_v29 = vld [vmem:[#allocation15 + $0x3a0] ss:$8 sps:$4 sm:$0xff]   ;;  %v5957_v36 = vld [vmem:[#allocation15 + $0x290] ss:$8 sps:$4 sm:$0xff]  }
 0x982   : > { %6061 = vtanh.f32 %v3631_v42  ;;  %4710 = vmatpush2.bf16.msra.mxu1 %v5936_v4  ;;  %v3520_v59 = vmul.f32 %v7291_v18, %v7291_v18  ;;  %v3519_v31 = vmul.f32 %v7297_v53, %v7297_v53  ;;  %v3638_v23 = vmul.f32 0.7978846, %v3606_v12  ;;  %v5959_v42 = vld [vmem:[#allocation15 + $0x294] ss:$8 sps:$4 sm:$0xff]  }
 0x983   : > { %4711 = vmatprep.subr.bf16.mxu1 %v5944_v55  ;;  %6063 = vtanh.f32 %v3633_v39  ;;  %v3607_v11 = vadd.f32 %v3575_v37, %v7271_v52  ;;  %v3577_v15 = vmul.f32 0.044715, %v3545_v13  ;;  %v3582_v6 = vmul.f32 0.044715, %v3550_v22  ;;  %v5962_v34 = vld [vmem:[#allocation15 + $0x394] ss:$8 sps:$4 sm:$0xff]  }
 0x984   : > { %4659 = vmatpush2.bf16.msra.mxu0 %v5939_v2  ;;  %v3552_v49 = vmul.f32 %v3520_v59, %v7291_v18  ;;  %v3608_v24 = vadd.f32 %v3576_v43, %v7265_v25  ;;  %v3551_v0 = vmul.f32 %v3519_v31, %v7297_v53  ;;  %v7313_v4 = vmul.f32 0.5, %v7222_v21  ;;  %v5965_v22 = vld [vmem:[#allocation15 + $0x284] ss:$8 sps:$4 sm:$0xff]  }
 0x985   : > { %4660 = vmatprep.subr.bf16.mxu0 %v5947_v32  ;;  %v3609_v57 = vadd.f32 %v3577_v15, %v7276_v1  ;;  %v3614_v51 = vadd.f32 %v3582_v6, %v7284_v47  ;;  %v3639_v48 = vmul.f32 0.7978846, %v3607_v11  ;;  %v3521_v55 = vmul.f32 %v7306_v8, %v7306_v8  ;;  %v5960_v15 = vld [vmem:[#allocation15 + $0x390] ss:$8 sps:$4 sm:$0xff]  }
 0x986   : > { %4712 = vmatpush2.bf16.msra.mxu1 %v5942_v9  ;;  %v3584_v26 = vmul.f32 0.044715, %v3552_v49  ;;  %v3463_v44 = vmul.f32 0.5, %v7230_v7  ;;  %v7319_v2 = vmul.f32 0.5, %v7232_v20  ;;  %6065 = vtanh.f32 %v3638_v23 }
 0x987   : > { %4713 = vmatprep.subr.bf16.mxu1 %v5950_v14  ;;  %v6050_v62 = vpop.eup %6049  ;;  %v3646_v19 = vmul.f32 0.7978846, %v3614_v51  ;;  %v3641_v21 = vmul.f32 0.7978846, %v3609_v57  ;;  %v3583_v32 = vmul.f32 0.044715, %v3551_v0  ;;  %v3553_v39 = vmul.f32 %v3521_v55, %v7306_v8 }
 0x988   : > { %4661 = vmatpush2.bf16.msra.mxu0 %v5945_v33  ;;  %v3616_v61 = vadd.f32 %v3584_v26, %v7291_v18  ;;  %v3470_v12 = vmul.f32 0.5, %v7240_v30  ;;  %v3640_v37 = vmul.f32 0.7978846, %v3608_v24  ;;  %v3686_v33 = vadd.f32 1.0, %v6050_v62  ;;  %v5963_v57 = vld [vmem:[#allocation15 + $0x280] ss:$8 sps:$4 sm:$0xff]  }
 0x989   : > { %v6052_v17 = vpop.eup %6051  ;;  %4662 = vmatprep.subr.bf16.mxu0 %v5953_v16  ;;  %6067 = vtanh.f32 %v3646_v19  ;;  %v3615_v14 = vadd.f32 %v3583_v32, %v7297_v53  ;;  %v3585_v43 = vmul.f32 0.044715, %v3553_v39  ;;  %v3472_v11 = vmul.f32 0.5, %v7242_v35 }
 0x98a   : > { %v6054_v41 = vpop.eup %6053  ;;  %4714 = vmatpush2.bf16.msra.mxu1 %v5948_v5  ;;  %v3648_v7 = vmul.f32 0.7978846, %v3616_v61  ;;  %6069 = vtanh.f32 %v3639_v48  ;;  %v3687_v30 = vadd.f32 1.0, %v6052_v17  ;;  %v5968_v5 = vld [vmem:[#allocation15 + $0x384] ss:$8 sps:$4 sm:$0xff]   ;;  %v3471_v23 = vmul.f32 0.5, %v7250_v60 }
 0x98b   : > { %4715 = vmatprep.subr.bf16.mxu1 %v5956_v46  ;;  %v3647_v49 = vmul.f32 0.7978846, %v3615_v14  ;;  %v3617_v31 = vadd.f32 %v3585_v43, %v7306_v8  ;;  %v3689_v62 = vadd.f32 1.0, %v6054_v41  ;;  %v3473_v0 = vmul.f32 0.5, %v7252_v40 }
 0x98c   : > { %v6056_v9 = vpop.eup %6055  ;;  %4663 = vmatpush2.bf16.msra.mxu0 %v5951_v56  ;;  %6071 = vtanh.f32 %v3648_v7  ;;  %v5966_v56 = vld [vmem:[#allocation15 + $0x380] ss:$8 sps:$4 sm:$0xff]   ;;  %v3718_v60 = vmul.f32 %v3686_v33, %v7313_v4  ;;  %v3464_v55 = vmul.f32 0.5, %v7224_v54  ;;  %v3479_v43 = vmul.f32 0.5, %v7271_v52 }
 0x98d   : > { %v6058_v20 = vpop.eup %6057  ;;  %v3694_v13 = vadd.f32 1.0, %v6056_v9  ;;  %4664 = vmatprep.subr.bf16.mxu0 %v5959_v42  ;;  %6073 = vtanh.f32 %v3641_v21  ;;  %v3649_v26 = vmul.f32 0.7978846, %v3617_v31  ;;  %v3721_v19 = vmul.f32 %v3689_v62, %v7319_v2 }
 0x98e   : > { %v6060_v59 = vpop.eup %6059  ;;  %4716 = vmatpush2.bf16.msra.mxu1 %v5954_v29  ;;  %v3696_v6 = vadd.f32 1.0, %v6058_v20  ;;  %6075 = vtanh.f32 %v3640_v37  ;;  %v3719_v29 = vmul.f32 %v3687_v30, %v3463_v44  ;;  %v3478_v2 = vmul.f32 0.5, %v7259_v10 }
 0x98f   : > { %v6062_v16 = vpop.eup %6061  ;;  %4717 = vmatprep.subr.bf16.mxu1 %v5962_v34  ;;  %v3688_v24 = vadd.f32 1.0, %v6060_v59  ;;  %v3726_v51 = vmul.f32 %v3694_v13, %v3470_v12  ;;  %6077 = vtanh.f32 %v3647_v49  ;;  %v3486_v20 = vmul.f32 0.5, %v7284_v47 }
 0x990   : > { %4665 = vmatpush2.bf16.msra.mxu0 %v5957_v36  ;;  %v3695_v46 = vadd.f32 1.0, %v6062_v16  ;;  %v6064_v35 = vpop.eup %6063  ;;  %v3728_v42 = vmul.f32 %v3696_v6, %v3472_v11  ;;  %6079 = vtanh.f32 %v3649_v26  ;;  %v3488_v30 = vmul.f32 0.5, %v7291_v18 }
 0x991   : > { %4666 = vmatprep.subr.bf16.mxu0 %v5965_v22  ;;  %v3697_v48 = vadd.f32 1.0, %v6064_v35  ;;  %v3720_v36 = vmul.f32 %v3688_v24, %v3464_v55  ;;  %v3750_v21 = vpack.c.bf16 %v3726_v51, %v3718_v60  ;;  %v3487_v22 = vmul.f32 0.5, %v7297_v53 }
 0x992   : > { %4718 = vmatpush2.bf16.msra.mxu1 %v5960_v15  ;;  %v3727_v17 = vmul.f32 %v3695_v46, %v3471_v23  ;;  %v3481_v15 = vmul.f32 0.5, %v7276_v1  ;;  %v3489_v49 = vmul.f32 0.5, %v7306_v8 }
 0x993   : > { %4719 = vmatprep.subr.bf16.mxu1 %v5968_v5  ;;  %v3729_v61 = vmul.f32 %v3697_v48, %v3473_v0  ;;  %v3752_v44 = vpack.c.bf16 %v3728_v42, %v3720_v36  ;;  %v6066_v32 = vpop.eup %6065  ;;  %v3480_v5 = vmul.f32 0.5, %v7265_v25 }
 0x994   : > { %4667 = vmatpush2.bf16.msra.mxu0 %v5963_v57  ;;  %v3751_v41 = vpack.c.bf16 %v3727_v17, %v3719_v29  ;;  %v3702_v13 = vadd.f32 1.0, %v6066_v32 }
 0x995   : > { %v3753_v40 = vpack.c.bf16 %v3729_v61, %v3721_v19 }
 0x996   : > { %4720 = vmatpush2.bf16.msra.mxu1 %v5966_v56  ;;  %4668 = vmatprep.mubr.bf16.mxu0 %v3751_v41  ;;  %v6068_v4 = vpop.eup %6067  ;;  %v3734_v23 = vmul.f32 %v3702_v13, %v3478_v2 }
 0x997   : > { %4669 = vmatmul.mubr.bf16.vlgmr.msra.gmra.mxu0 %v3750_v21  ;;  %4721 = vmatprep.mubr.bf16.mxu1 %v3753_v40  ;;  %v6070_v54 = vpop.eup %6069  ;;  %v3710_v9 = vadd.f32 1.0, %v6068_v4 }
 0x998   : > { %v3703_v37 = vadd.f32 1.0, %v6070_v54 }
 0x999   : > { %4722 = vmatmul.mubr.bf16.vlgmr.msra.gmra.mxu1 %v3752_v44  ;;  %v6072_v39 = vpop.eup %6071  ;;  %v3742_v16 = vmul.f32 %v3710_v9, %v3486_v20 }
 0x99a   : > { %v6074_v34 = vpop.eup %6073  ;;  %v3712_v14 = vadd.f32 1.0, %v6072_v39  ;;  %v3735_v10 = vmul.f32 %v3703_v37, %v3479_v43 }
 0x99b   : > { %v6076_v12 = vpop.eup %6075  ;;  %v3705_v33 = vadd.f32 1.0, %v6074_v34  ;;  %v3758_v62 = vpack.c.bf16 %v3742_v16, %v3734_v23 }
 0x99c   : > { %v6078_v7 = vpop.eup %6077  ;;  %v3704_v6 = vadd.f32 1.0, %v6076_v12  ;;  %v3744_v52 = vmul.f32 %v3712_v14, %v3488_v30 }
 0x99d   : > { %v3711_v59 = vadd.f32 1.0, %v6078_v7  ;;  %v6080_v11 = vpop.eup %6079  ;;  %v3737_v53 = vmul.f32 %v3705_v33, %v3481_v15 }
 0x99e   : > { %v3713_v47 = vadd.f32 1.0, %v6080_v11  ;;  %v3736_v35 = vmul.f32 %v3704_v6, %v3480_v5 }
 0x99f   : > { %v3743_v31 = vmul.f32 %v3711_v59, %v3487_v22 }
 0x9a0   : > { %v3745_v46 = vmul.f32 %v3713_v47, %v3489_v49  ;;  %v3760_v18 = vpack.c.bf16 %v3744_v52, %v3736_v35 }
 0x9a1   : > { %v3759_v57 = vpack.c.bf16 %v3743_v31, %v3735_v10 }
 0x9a2   : > { %v3761_v1 = vpack.c.bf16 %v3745_v46, %v3737_v53 }
 0x9a3   : > { %4678 = vmatprep.mubr.bf16.mxu0 %v3759_v57 }
 0x9a4   : > { %4679 = vmatmul.mubr.bf16.gmra.mxu0 %v3758_v62  ;;  %4731 = vmatprep.mubr.bf16.mxu1 %v3761_v1 }
 0x9a5   : > { %4732 = vmatmul.mubr.bf16.gmra.mxu1 %v3760_v18 }
 0xa17   : > { %v4564_v24 = vpop.f32.mrf.mxu0 }
 0xa18   : > { %v4617_v8 = vpop.f32.mrf.mxu1 }
 0xa19   : > { %v4566_v51 = vpop.f32.mrf.mxu0  ;;  %v4618_v61 = vadd.f32 %v4617_v8, %v4564_v24 }
 0xa1a   : > { %v4619_v26 = vpop.f32.mrf.mxu1 }
 0xa1b   : > { %v4568_v0 = vpop.f32.mrf.mxu0  ;;  %v4620_v40 = vadd.f32 %v4619_v26, %v4566_v51 }
 0xa1c   : > { %v4621_v56 = vpop.f32.mrf.mxu1 }
 0xa1d   : > { %v4570_v25 = vpop.f32.mrf.mxu0  ;;  %v4622_v54 = vadd.f32 %v4621_v56, %v4568_v0 }
 0xa1e   : > { %v4623_v29 = vpop.f32.mrf.mxu1 }
 0xa1f   : > { %v4624_v37 = vadd.f32 %v4623_v29, %v4570_v25 }
 0xa25   : > { %v4574_v17 = vpop.f32.mrf.mxu0 }
 0xa27   : > { %v4627_v48 = vpop.f32.mrf.mxu1  ;;  %v4576_v60 = vpop.f32.mrf.mxu0 }
 0xa28   : > { %v4628_v30 = vadd.f32 %v4627_v48, %v4574_v17 }
 0xa29   : > { %v4629_v55 = vpop.f32.mrf.mxu1  ;;  %v4578_v42 = vpop.f32.mrf.mxu0 }
 0xa2a   : > { %v4630_v6 = vadd.f32 %v4629_v55, %v4576_v60 }
 0xa2b   : > { %v4631_v41 = vpop.f32.mrf.mxu1  ;;  %v4580_v19 = vpop.f32.mrf.mxu0 }
 0xa2d   : > { %v4633_v36 = vpop.f32.mrf.mxu1 }
 0xa2e   : > { %v4634_v52 = vadd.f32 %v4633_v36, %v4580_v19 }
 0xa57   : > { %v4670_v21 = vpop.f32.mrf.mxu0 }
 0xa58   : > { %v4671_v44 = vadd.f32 %v4670_v21, %v4618_v61 }
 0xa59   : > { %v4723_v32 = vpop.f32.mrf.mxu1  ;;  %v4672_v4 = vpop.f32.mrf.mxu0 }
 0xa5a   : > { %v4724_v39 = vadd.f32 %v4723_v32, %v4671_v44  ;;  %v4673_v34 = vadd.f32 %v4672_v4, %v4620_v40 }
 0xa5b   : > { %v4725_v9 = vpop.f32.mrf.mxu1  ;;  %v4674_v12 = vpop.f32.mrf.mxu0 }
 0xa5c   : > { %v4742_v7 = vadd.f32 %v4724_v39, %v6981_v27  ;;  %v4726_v2 = vadd.f32 %v4725_v9, %v4673_v34  ;;  %v4675_v20 = vadd.f32 %v4674_v12, %v4622_v54 }
 0xa5d   : > { %v4727_v13 = vpop.f32.mrf.mxu1  ;;  %v4676_v14 = vpop.f32.mrf.mxu0 }
 0xa5e   : > { %4750 = vst [vmem:[%s7343_s26] sm:$0xff] %v4742_v7  ;;  %v4743_v43 = vadd.f32 %v4726_v2, %v6984_v63  ;;  %v4728_v22 = vadd.f32 %v4727_v13, %v4675_v20  ;;  %v4677_v59 = vadd.f32 %v4676_v14, %v4624_v37  ;;  %v4632_v63 = vadd.f32 %v4631_v41, %v4578_v42 }
 0xa5f   : > { %v4729_v33 = vpop.f32.mrf.mxu1 }
 0xa60   : > { %4751 = vst [vmem:[%s7343_s26 + $0x8] sm:$0xff] %v4743_v43  ;;  %v4744_v27 = vadd.f32 %v4728_v22, %v6989_v58  ;;  %v4730_v11 = vadd.f32 %v4729_v33, %v4677_v59 }
 0xa62   : > { %4752 = vst [vmem:[%s7343_s26 + $0x10] sm:$0xff] %v4744_v27  ;;  %v4745_v15 = vadd.f32 %v4730_v11, %v6992_v3 }
 0xa64   : > { %4753 = vst [vmem:[%s7343_s26 + $0x18] sm:$0xff] %v4745_v15  ;;  %v4680_v16 = vpop.f32.mrf.mxu0 }
 0xa65   : > { %v4681_v49 = vadd.f32 %v4680_v16, %v4628_v30  ;;  %v4733_v10 = vpop.f32.mrf.mxu1 }
 0xa66   : > { %v4682_v31 = vpop.f32.mrf.mxu0 }
 0xa67   : > { %v4734_v47 = vadd.f32 %v4733_v10, %v4681_v49  ;;  %v4683_v5 = vadd.f32 %v4682_v31, %v4630_v6  ;;  %v4735_v23 = vpop.f32.mrf.mxu1 }
 0xa68   : > { %v4684_v58 = vpop.f32.mrf.mxu0 }
 0xa69   : > { %v4746_v57 = vadd.f32 %v4734_v47, %v6997_v50  ;;  %v4736_v3 = vadd.f32 %v4735_v23, %v4683_v5  ;;  %v4685_v53 = vadd.f32 %v4684_v58, %v4632_v63  ;;  %v4737_v46 = vpop.f32.mrf.mxu1 }
 0xa6a   : > { %v4686_v62 = vpop.f32.mrf.mxu0 }
 0xa6b   : > { %4754 = vst [vmem:[%s7343_s26 + $0x20] sm:$0xff] %v4746_v57  ;;  %v4747_v35 = vadd.f32 %v4736_v3, %v7000_v38  ;;  %v4738_v1 = vadd.f32 %v4737_v46, %v4685_v53  ;;  %v4687_v18 = vadd.f32 %v4686_v62, %v4634_v52  ;;  %v4739_v24 = vpop.f32.mrf.mxu1 }
 0xa6d   : > { %4755 = vst [vmem:[%s7343_s26 + $0x28] sm:$0xff] %v4747_v35  ;;  %v4748_v50 = vadd.f32 %v4738_v1, %v7005_v28  ;;  %v4740_v8 = vadd.f32 %v4739_v24, %v4687_v18 }
 0xa6f   : > { %4756 = vst [vmem:[%s7343_s26 + $0x30] sm:$0xff] %v4748_v50  ;;  %v4749_v38 = vadd.f32 %v4740_v8, %v7008_v45 }
 0xa71   : > { %4757 = vst [vmem:[%s7343_s26 + $0x38] sm:$0xff] %v4749_v38 }
 0xa72   : > { %6312 = shalt.err (!%p6309_p8)
}
 0xa73   : > { %s6313_s28 = scalar_lea.hbm %s7364_s11, 1024  ;;  %s6317_s1 = scalar_lea.hbm %s7422_s12, 2048 }
 0xa74   : > { %p6314_p6 = scmp.ne.s32.totalorder %s7364_s11, %s6313_s28  ;;  %p6318_p0 = scmp.lt.s32.totalorder %s7364_s11, %s7422_s12 }
 0xa75   : > { %p6319_p2 = scmp.lt.s32.totalorder %s6317_s1, %s6313_s28 }
 0xa76   : > { %p6315_p11 = pnand %p6314_p6, %p7469_p10 }
 0xa77   : > { %p6320_p5 = por %p6319_p2, %p6318_p0 }
 0xa78   : > { %p6316_p7 = pneg %p6315_p11 }
 0xa7a   : > { %p6321_p9 = pnand %p6320_p5, %p6316_p7 }
 0xa7c   : > { %6324 = shalt.err (!%p6321_p9)
}
 0xa7d   : > { %s6398_s26 = smov 256   ;;  %s6399_s29 = smov 16  }
 0xa7e   : > { %5440 = dma.vmem_to_hbm [thread:$0]  (%p7469_p10), %s7357_s3, 1024, %s7364_s11, %s4759_s27, %s6398_s26, %s6398_s26, %s6399_s29  }
 0xa7f PF: > { %s4787_s15 = sand.u32 1, %s6367_s21   ;;  %p7470_p12 = scmp.ne.s32.totalorder %s7457_s17, 0 }
 0xa80   : > { %p7471_p13 = scmp.ge.s32.totalorder %s6379_s24, 2  ;;  %s4788_s14 = scalar_lea.sflag [#allocation5], %s4787_s15 }
 0xa82   : > { %p5469_p1 = pnand %p7471_p13, %p7470_p12 }
 0xa84   : > { %p5470_p3 = pneg %p5469_p1 }
 0xa86   : > { %6362 = dma.done.wait (%p5470_p3), %s4788_s14, 1024  }
 0xa87   : > { %6364 = vsyncadd (%p5470_p3), %s4788_s14, 4294966272  ;;  %s7472_s19 = sld [smem:[#allocation24_spill]]  ;;  %p29_p4 = scmp.ge.s32.totalorder %s6586_s16, 4  }
 0xa88   : > { %s7473_s21 = smov %s6371_s22  ;;  %s7474_s22 = smov %s6375_s23 }
 0xa89   : > { %s7476_s24 = smov %s6586_s16  ;;  %31 = sbr.rel (!%p29_p4) target bundleno = 17 (0x11), region = 141 }
 0xa8d   : > { %s7475_s23 = smov %s7472_s19 }
 0xa8e   :  { %4793 = vsyncpa [#allocation4], 1 }
 0xa8f   :  { %4795 = vsyncpa [#allocation4 + $0x1], 1 }
 0xa90   :  { %4796 = vsyncpa [#allocation7], 1 }
 0xa91   :  { %4797 = vsyncpa [#allocation10], 1 }
 0xa92   :  { %4798 = vsyncpa [#allocation13], 1 }
 0xa93   :  { %4799 = vsyncpa [#allocation16], 1 }
 0xa94   :  { %4800 = vsyncpa [#allocation5], 1 }
 0xa95   :  { %4802 = vsyncpa [#allocation5 + $0x1], 1 }

</bundles_post_ra>
